<compile_context>
chip_gen: v7x
topology: tpu7x:2x2x1
jax: 0.10.0
libtpu: 0.0.40
codegen_flags: <defaults>
</compile_context>

<pallas_src>
import functools
import math

import jax
import jax.numpy as jnp
from jax.experimental import pallas as pl
from jax.experimental.pallas import tpu as pltpu


# ----------------------------------------------------------------------------
# Padding helpers
# ----------------------------------------------------------------------------
def _round_up(v, m):
    return (v + m - 1) // m * m


def _head_padding(token_dim, num_heads):
    """Per-head padded head_dim (dhp) and padded model dim (Dp = nh*dhp, %128==0)."""
    assert token_dim % num_heads == 0
    dh = token_dim // num_heads
    g = 128 // math.gcd(num_heads, 128)
    dhp = _round_up(dh, g)
    return dh, dhp, num_heads * dhp


# ----------------------------------------------------------------------------
# Fused transformer-block kernel.  x block is (rows, Dp) with rows ordered
# attention-batch-major; per-token ops (LN, QKV, out-proj, FFN) run on the flat
# 2-D slab (tall, lane-dense matmuls), attention is batched per head over the
# n_batch tokens with sequence length = seq (= #windows).
# The attention einsums are MXU-hostile (contraction = head_dim, seq x seq
# outputs) but tiny next to the dense matmuls; they are effectively filler.
# ----------------------------------------------------------------------------
def _transformer_block_kernel(
    x_ref,
    ln1w, ln1b, wqkv, bqkv, wo, bo, ln2w, ln2b, w1, b1, w2, b2,
    o_ref,
    attn_ref,
    *, n_batch, seq, num_heads, head_dim_p, d_true,
):
    eps = 1e-5
    x = x_ref[...]                                  # (rows, Dp), padded lanes == 0
    rows, Dp = x.shape

    if Dp != d_true:
        # Mask so LayerNorm statistics are computed over the true D only.
        lane = jax.lax.broadcasted_iota(jnp.int32, (1, Dp), 1)
        dmask = (lane < d_true).astype(jnp.float32)
    else:
        dmask = None
    inv_d = 1.0 / float(d_true)

    def layer_norm(v, w_ref, b_ref):
        mu = jnp.sum(v, axis=-1, keepdims=True) * inv_d
        vc = v - mu if dmask is None else v - mu * dmask
        var = jnp.sum(vc * vc, axis=-1, keepdims=True) * inv_d
        return vc * jax.lax.rsqrt(var + eps) * w_ref[...] + b_ref[...]

    # --- LN1 + fused QKV projection (q scale already folded into wqkv/bqkv) ---
    h = layer_norm(x, ln1w, ln1b)
    qkv = jnp.dot(h, wqkv[...], preferred_element_type=jnp.float32) + bqkv[...]

    # --- attention: batch = n_batch tokens, sequence = seq windows ----------
    dhp = head_dim_p
    for hd in range(num_heads):
        lo = hd * dhp
        qh = qkv[:, lo:lo + dhp].reshape(n_batch, seq, dhp)
        kh = qkv[:, Dp + lo:Dp + lo + dhp].reshape(n_batch, seq, dhp)
        vh = qkv[:, 2 * Dp + lo:2 * Dp + lo + dhp].reshape(n_batch, seq, dhp)
        s = jnp.einsum('nqd,nkd->nqk', qh, kh,
                       preferred_element_type=jnp.float32)     # (n, seq, seq)
        s = s - jnp.max(s, axis=-1, keepdims=True)
        e = jnp.exp(s)
        # Exact division for parity with torch softmax; switch to
        # pl.reciprocal(..., approx=True) for an (approximate) EUP-slot divide.
        p = e / jnp.sum(e, axis=-1, keepdims=True)
        o = jnp.einsum('nqk,nkd->nqd', p, vh,
                       preferred_element_type=jnp.float32)      # (n, seq, dhp)
        # Per-head store into the VMEM scratch slab (no lane concatenate).
        attn_ref[:, lo:lo + dhp] = o.reshape(rows, dhp)

    # --- output projection + residual ---------------------------------------
    y = x + jnp.dot(attn_ref[...], wo[...],
                    preferred_element_type=jnp.float32) + bo[...]

    # --- LN2 + FFN (2-layer GELU MLP) + residual -----------------------------
    h2 = layer_norm(y, ln2w, ln2b)
    f = jnp.dot(h2, w1[...], preferred_element_type=jnp.float32) + b1[...]
    f = jax.nn.gelu(f, approximate=True)
    f = jnp.dot(f, w2[...], preferred_element_type=jnp.float32) + b2[...]
    o_ref[...] = (y + f).astype(o_ref.dtype)


# ----------------------------------------------------------------------------
# VMEM-budgeted tiling: split the attention-batch dim only when needed.
# ----------------------------------------------------------------------------
def _choose_tiling(N, Bw, Dp, Hp):
    try:
        vmem_cap = int(pltpu.get_tpu_info().vmem_capacity_bytes)
    except Exception:
        vmem_cap = 64 << 20          # conservative default (v7x per-TC VMEM)
    budget = int(vmem_cap * 0.75)

    # Single-buffered weights (pl.Buffered(1) on their BlockSpecs).
    weight_bytes = 4 * (4 * Dp * Dp + 2 * Dp * Hp + 8 * Dp + 2 * Hp)
    # Per-row activations: double-buffered x/out blocks, attn scratch, qkv,
    # FFN hidden, and a few (rows, Dp) temporaries (h, y, h2, f).
    act_row = 4 * (4 * Dp + Dp + 3 * Dp + Hp + 4 * Dp)

    candidates = [d for d in range(1, N + 1)
                  if N % d == 0 and ((N // d) * Bw) % 8 == 0]
    if not candidates:
        candidates = [1]

    n_split = candidates[-1]
    for d in candidates:
        if weight_bytes + ((N // d) * Bw) * act_row <= budget:
            n_split = d
            break

    # Expose an even "parallel" grid axis for multi-TensorCore chips (v7x)
    # only when the per-step work amortizes the ~0.35us step overhead; on
    # single-TC v5e/v6e the n_split==1 path above is preferred.
    if n_split == 1 and N * Bw >= 8192:
        for d in candidates:
            if d >= 2 and weight_bytes + ((N // d) * Bw) * act_row <= budget:
                n_split = d
                break

    tb = (N // n_split) * Bw
    vmem_limit = int(min(vmem_cap,
                         max(32 << 20, int(1.5 * (weight_bytes + tb * act_row)))))
    return n_split, tb, vmem_limit


def _param_spec(a):
    """Full-array, constant-index BlockSpec; single-buffered when supported."""
    nd = a.ndim
    idx = lambda i, _nd=nd: (0,) * _nd
    try:
        return pl.BlockSpec(a.shape, idx, pipeline_mode=pl.Buffered(1))
    except TypeError:       # older BlockSpec without pipeline_mode
        return pl.BlockSpec(a.shape, idx)


def transformer_block(x_nbd, p, *, num_heads, d_true, head_dim_p):
    """Apply one TransformerBlock to the token-major (N, Bw, Dp) window tensor."""
    N, Bw, Dp = x_nbd.shape
    Hp = p["b1"].shape[-1]
    T = N * Bw

    n_split, tb, vmem_limit = _choose_tiling(N, Bw, Dp, Hp)

    xf = x_nbd.reshape(T, Dp)           # free reshape (merges leading dims)
    param_names = ("ln1_w", "ln1_b", "wqkv", "bqkv", "wo", "bo",
                   "ln2_w", "ln2_b", "w1", "b1", "w2", "b2")
    param_list = [p[k] for k in param_names]

    kernel = functools.partial(
        _transformer_block_kernel,
        n_batch=N // n_split, seq=Bw, num_heads=num_heads,
        head_dim_p=head_dim_p, d_true=d_true,
    )

    out = pl.pallas_call(
        kernel,
        out_shape=jax.ShapeDtypeStruct((T, Dp), jnp.float32),
        grid=(n_split,),
        in_specs=[pl.BlockSpec((tb, Dp), lambda i: (i, 0))]
                 + [_param_spec(a) for a in param_list],
        out_specs=pl.BlockSpec((tb, Dp), lambda i: (i, 0)),
        scratch_shapes=[pltpu.VMEM((tb, Dp), jnp.float32)],
        compiler_params=pltpu.CompilerParams(
            dimension_semantics=("parallel",),
            vmem_limit_bytes=vmem_limit),
    )(xf, *param_list)

    return out.reshape(N, Bw, Dp)


# ----------------------------------------------------------------------------
# Window partitioning glue (pure reshapes / transposes / rolls, stays in JAX).
# Token-major layout so no extra permutes are needed around the pallas_call.
# ----------------------------------------------------------------------------
def extract_windows_token_major(x, S):
    """(B, H, W, D) -> (S*S, B*(H//S)*(W//S), D); out[n, bw] == torch-folded[bw, n]."""
    B, H, W, D = x.shape
    x = x.reshape(B, H // S, S, W // S, S, D)
    x = jnp.transpose(x, (2, 4, 0, 1, 3, 5))          # (S, S, B, H//S, W//S, D)
    return x.reshape(S * S, B * (H // S) * (W // S), D)


def combine_windows_token_major(x, original_shape, S):
    """Inverse of extract_windows_token_major."""
    B, H, W, D = original_shape
    x = x.reshape(S, S, B, H // S, W // S, D)
    x = jnp.transpose(x, (2, 3, 0, 4, 1, 5))          # (B, H//S, S, W//S, S, D)
    return x.reshape(B, H, W, D)


def shift_horizontally_and_vertically(x, shift):
    return jnp.roll(jnp.roll(x, shift, axis=1), shift, axis=2)


# ----------------------------------------------------------------------------
# Parameter preparation: torch-layout raw params -> padded, transposed,
# scale-folded kernel params (done once per call; tiny, constant-folded).
# ----------------------------------------------------------------------------
def prepare_kernel_params(raw, token_dim, num_heads):
    D = token_dim
    dh, dhp, Dp = _head_padding(D, num_heads)
    Hd = raw["ffn_b1"].shape[0]
    Hp = _round_up(Hd, 128)
    scale = 1.0 / math.sqrt(dh)

    def pad2(m, rows, cols):
        return jnp.pad(m, ((0, rows - m.shape[0]), (0, cols - m.shape[1])))

    def head_cols(m):          # (r, D) -> (r, Dp), per-head padded column layout
        r = m.shape[0]
        m = m.reshape(r, num_heads, dh)
        return jnp.pad(m, ((0, 0), (0, 0), (0, dhp - dh))).reshape(r, Dp)

    def head_rows(m):          # (D, c) -> (Dp, c), per-head padded row layout
        c = m.shape[1]
        m = m.reshape(num_heads, dh, c)
        return jnp.pad(m, ((0, 0), (0, dhp - dh), (0, 0))).reshape(Dp, c)

    def head_vec(v):           # (D,) -> (Dp,)
        return jnp.pad(v.reshape(num_heads, dh), ((0, 0), (0, dhp - dh))).reshape(Dp)

    def vec_pad(v, n):
        return jnp.pad(v, (0, n - v.shape[0]))[None]   # (1, n)

    wq, wk, wv = raw["in_proj_w"][:D], raw["in_proj_w"][D:2 * D], raw["in_proj_w"][2 * D:]
    bq, bk, bv = raw["in_proj_b"][:D], raw["in_proj_b"][D:2 * D], raw["in_proj_b"][2 * D:]

    Wq = pad2(head_cols(wq.T) * scale, Dp, Dp)          # q scale folded in
    Wk = pad2(head_cols(wk.T), Dp, Dp)
    Wv = pad2(head_cols(wv.T), Dp, Dp)
    wqkv = jnp.concatenate([Wq, Wk, Wv], axis=1)         # (Dp, 3*Dp)
    bqkv = jnp.concatenate([head_vec(bq) * scale, head_vec(bk), head_vec(bv)])[None]

    params = {
        "ln1_w": vec_pad(raw["ln1_w"], Dp), "ln1_b": vec_pad(raw["ln1_b"], Dp),
        "wqkv": wqkv, "bqkv": bqkv,
        "wo": pad2(head_rows(raw["out_w"].T), Dp, Dp),
        "bo": vec_pad(raw["out_b"], Dp),
        "ln2_w": vec_pad(raw["ln2_w"], Dp), "ln2_b": vec_pad(raw["ln2_b"], Dp),
        "w1": pad2(raw["ffn_w1"].T, Dp, Hp), "b1": vec_pad(raw["ffn_b1"], Hp),
        "w2": pad2(raw["ffn_w2"].T, Hp, Dp), "b2": vec_pad(raw["ffn_b2"], Dp),
    }
    return params, Dp, dhp


# ----------------------------------------------------------------------------
# Full SwinTransformerBlock forward (Pallas path).
# ----------------------------------------------------------------------------
def swin_transformer_block(x, raw1, raw2, *, window_size, num_heads):
    """x: (B, H, W, D) -> (B, H, W, D).  Load-balancing losses: none (GELU MLP FFN)."""
    B, H, W, D = x.shape
    S = window_size

    p1, Dp, dhp = prepare_kernel_params(raw1, D, num_heads)
    p2, _, _ = prepare_kernel_params(raw2, D, num_heads)

    # Pad D once; all glue and both blocks run in padded (lane-dense) space.
    xp = jnp.pad(x, ((0, 0), (0, 0), (0, 0), (0, Dp - D)))
    padded_shape = xp.shape

    xw = extract_windows_token_major(xp, S)
    xw = transformer_block(xw, p1, num_heads=num_heads, d_true=D, head_dim_p=dhp)
    xp = combine_windows_token_major(xw, padded_shape, S)

    xp = shift_horizontally_and_vertically(xp, S // 2)
    xw = extract_windows_token_major(xp, S)
    xw = transformer_block(xw, p2, num_heads=num_heads, d_true=D, head_dim_p=dhp)
    xp = combine_windows_token_major(xw, padded_shape, S)
    xp = shift_horizontally_and_vertically(xp, -(S // 2))

    return xp[..., :D]


# ----------------------------------------------------------------------------
# Pure-JAX reference (torch semantics, same injected FFN) for in-script checks.
# ----------------------------------------------------------------------------
def _transformer_block_ref(x, raw, num_heads):
    """x: (Nb, Sq, D) token-major; attention batch = Nb, sequence = Sq."""
    D = x.shape[-1]
    dh = D // num_heads

    def ln(v, w, b):
        mu = v.mean(-1, keepdims=True)
        var = ((v - mu) ** 2).mean(-1, keepdims=True)
        return (v - mu) * jax.lax.rsqrt(var + 1e-5) * w + b

    h = ln(x, raw["ln1_w"], raw["ln1_b"])
    qkv = h @ raw["in_proj_w"].T + raw["in_proj_b"]
    q, k, v = jnp.split(qkv, 3, axis=-1)
    q = q * (dh ** -0.5)

    def split_heads(t):
        Nb, Sq, _ = t.shape
        return t.reshape(Nb, Sq, num_heads, dh).transpose(0, 2, 1, 3)

    qh, kh, vh = map(split_heads, (q, k, v))
    s = jnp.einsum('bhqd,bhkd->bhqk', qh, kh)
    p = jax.nn.softmax(s, axis=-1)
    o = jnp.einsum('bhqk,bhkd->bhqd', p, vh)
    o = o.transpose(0, 2, 1, 3).reshape(x.shape)

    y = x + o @ raw["out_w"].T + raw["out_b"]
    h2 = ln(y, raw["ln2_w"], raw["ln2_b"])
    f = h2 @ raw["ffn_w1"].T + raw["ffn_b1"]
    f = jax.nn.gelu(f, approximate=True)
    f = f @ raw["ffn_w2"].T + raw["ffn_b2"]
    return y + f


def swin_ref(x, raw1, raw2, *, window_size, num_heads):
    S = window_size
    orig = x.shape
    xw = extract_windows_token_major(x, S)
    xw = _transformer_block_ref(xw, raw1, num_heads)
    x = combine_windows_token_major(xw, orig, S)
    x = shift_horizontally_and_vertically(x, S // 2)
    xw = extract_windows_token_major(x, S)
    xw = _transformer_block_ref(xw, raw2, num_heads)
    x = combine_windows_token_major(xw, orig, S)
    return shift_horizontally_and_vertically(x, -(S // 2))


# ----------------------------------------------------------------------------
# Deterministic raw (torch-layout) parameter construction.
# ----------------------------------------------------------------------------
def make_block_params(key, token_dim, hidden_dim):
    ks = jax.random.split(key, 7)
    D, Hd = token_dim, hidden_dim

    def w(k, shape, scale=0.05):
        return jax.random.normal(k, shape, jnp.float32) * scale

    return {
        "ln1_w": jnp.ones((D,), jnp.float32), "ln1_b": jnp.zeros((D,), jnp.float32),
        "ln2_w": jnp.ones((D,), jnp.float32), "ln2_b": jnp.zeros((D,), jnp.float32),
        "in_proj_w": w(ks[0], (3 * D, D)),    # nn.MultiheadAttention.in_proj_weight
        "in_proj_b": w(ks[1], (3 * D,)),      # in_proj_bias
        "out_w": w(ks[2], (D, D)),            # out_proj.weight (out, in)
        "out_b": jnp.zeros((D,), jnp.float32),
        "ffn_w1": w(ks[3], (Hd, D)), "ffn_b1": w(ks[4], (Hd,)),
        "ffn_w2": w(ks[5], (D, Hd)), "ffn_b2": w(ks[6], (D,)),
    }


if __name__ == "__main__":
    # Small, module-consistent shapes: B=2, H=W=8, D=32, window_size=4, 4 heads.
    B, Himg, Wimg, D = 2, 8, 8, 32
    window_size = 4
    num_heads = 4
    hidden_dim = 4 * D

    key = jax.random.PRNGKey(0)
    kx, k1, k2 = jax.random.split(key, 3)
    x = jax.random.normal(kx, (B, Himg, Wimg, D), jnp.float32)

    raw1 = make_block_params(k1, D, hidden_dim)
    raw2 = make_block_params(k2, D, hidden_dim)

    fwd = jax.jit(functools.partial(
        swin_transformer_block, window_size=window_size, num_heads=num_heads))
    out = fwd(x, raw1, raw2)
    jax.block_until_ready(out)
    assert out.shape == (B, Himg, Wimg, D) and out.dtype == jnp.float32

    ref_fn = jax.jit(functools.partial(
        swin_ref, window_size=window_size, num_heads=num_heads))
    ref = ref_fn(x, raw1, raw2)
    jax.block_until_ready(ref)

    max_err = float(jnp.max(jnp.abs(out - ref)))
    assert max_err < 5e-3, f"kernel vs pure-JAX reference mismatch: {max_err}"

    print("KERNEL_OK")
</pallas_src>

<mosaic_0001>
module attributes {stable_mosaic.version = 11 : i64} {
  func.func @_transformer_block_kernel(%arg0: i32, %arg1: memref<128x128xf32, #tpu.memory_space<vmem>>, %arg2: memref<1x128xf32, #tpu.memory_space<vmem>>, %arg3: memref<1x128xf32, #tpu.memory_space<vmem>>, %arg4: memref<128x384xf32, #tpu.memory_space<vmem>>, %arg5: memref<1x384xf32, #tpu.memory_space<vmem>>, %arg6: memref<128x128xf32, #tpu.memory_space<vmem>>, %arg7: memref<1x128xf32, #tpu.memory_space<vmem>>, %arg8: memref<1x128xf32, #tpu.memory_space<vmem>>, %arg9: memref<1x128xf32, #tpu.memory_space<vmem>>, %arg10: memref<128x128xf32, #tpu.memory_space<vmem>>, %arg11: memref<1x128xf32, #tpu.memory_space<vmem>>, %arg12: memref<128x128xf32, #tpu.memory_space<vmem>>, %arg13: memref<1x128xf32, #tpu.memory_space<vmem>>, %arg14: memref<128x128xf32, #tpu.memory_space<vmem>>, %arg15: memref<128x128xf32, #tpu.memory_space<vmem>>) attributes {dimension_semantics = [#tpu.dimension_semantics<parallel>], iteration_bounds = array<i64: 1>, scalar_prefetch = 0 : i64, scratch_operands = 1 : i64, tpu.core_type = #tpu.core_type<tc>, window_params = [{transform_indices = @transform_0, window_bounds = array<i64: 128, 128>}, {pipeline_mode = #tpu.pipeline_mode<synchronous>, transform_indices = @transform_1, window_bounds = array<i64: 1, 128>}, {pipeline_mode = #tpu.pipeline_mode<synchronous>, transform_indices = @transform_2, window_bounds = array<i64: 1, 128>}, {pipeline_mode = #tpu.pipeline_mode<synchronous>, transform_indices = @transform_3, window_bounds = array<i64: 128, 384>}, {pipeline_mode = #tpu.pipeline_mode<synchronous>, transform_indices = @transform_4, window_bounds = array<i64: 1, 384>}, {pipeline_mode = #tpu.pipeline_mode<synchronous>, transform_indices = @transform_5, window_bounds = array<i64: 128, 128>}, {pipeline_mode = #tpu.pipeline_mode<synchronous>, transform_indices = @transform_6, window_bounds = array<i64: 1, 128>}, {pipeline_mode = #tpu.pipeline_mode<synchronous>, transform_indices = @transform_7, window_bounds = array<i64: 1, 128>}, {pipeline_mode = #tpu.pipeline_mode<synchronous>, transform_indices = @transform_8, window_bounds = array<i64: 1, 128>}, {pipeline_mode = #tpu.pipeline_mode<synchronous>, transform_indices = @transform_9, window_bounds = array<i64: 128, 128>}, {pipeline_mode = #tpu.pipeline_mode<synchronous>, transform_indices = @transform_10, window_bounds = array<i64: 1, 128>}, {pipeline_mode = #tpu.pipeline_mode<synchronous>, transform_indices = @transform_11, window_bounds = array<i64: 128, 128>}, {pipeline_mode = #tpu.pipeline_mode<synchronous>, transform_indices = @transform_12, window_bounds = array<i64: 1, 128>}, {transform_indices = @transform_13, window_bounds = array<i64: 128, 128>}]} {
    %c0 = arith.constant 0 : index
    %c0_0 = arith.constant 0 : index
    %0 = vector.load %arg1[%c0, %c0_0] : memref<128x128xf32, #tpu.memory_space<vmem>>, vector<128x128xf32>
    %1 = tpu.iota {dimensions = array<i32: 1>} : vector<1x128xi32>
    %c32_i32 = arith.constant 32 : i32
    %2 = vector.broadcast %c32_i32 : i32 to vector<1x128xi32>
    %3 = arith.cmpi slt, %1, %2 : vector<1x128xi32>
    %4 = arith.extui %3 : vector<1x128xi1> to vector<1x128xi32>
    %5 = arith.sitofp %4 : vector<1x128xi32> to vector<1x128xf32>
    %cst = arith.constant dense<0.000000e+00> : vector<128xf32>
    %6 = vector.multi_reduction <add>, %0, %cst [1] : vector<128x128xf32> to vector<128xf32>
    %7 = vector.shape_cast %6 : vector<128xf32> to vector<128x1xf32>
    %cst_1 = arith.constant 3.125000e-02 : f32
    %8 = vector.broadcast %cst_1 : f32 to vector<128x1xf32>
    %9 = arith.mulf %7, %8 : vector<128x1xf32>
    %10 = vector.broadcast %9 : vector<128x1xf32> to vector<128x128xf32>
    %11 = vector.broadcast %5 : vector<1x128xf32> to vector<128x128xf32>
    %12 = arith.mulf %10, %11 : vector<128x128xf32>
    %13 = arith.subf %0, %12 : vector<128x128xf32>
    %14 = arith.mulf %13, %13 : vector<128x128xf32>
    %cst_2 = arith.constant dense<0.000000e+00> : vector<128xf32>
    %15 = vector.multi_reduction <add>, %14, %cst_2 [1] : vector<128x128xf32> to vector<128xf32>
    %16 = vector.shape_cast %15 : vector<128xf32> to vector<128x1xf32>
    %cst_3 = arith.constant 3.125000e-02 : f32
    %17 = vector.broadcast %cst_3 : f32 to vector<128x1xf32>
    %18 = arith.mulf %16, %17 : vector<128x1xf32>
    %cst_4 = arith.constant 9.99999974E-6 : f32
    %19 = vector.broadcast %cst_4 : f32 to vector<128x1xf32>
    %20 = arith.addf %18, %19 : vector<128x1xf32>
    %21 = math.rsqrt %20 : vector<128x1xf32>
    %22 = vector.broadcast %21 : vector<128x1xf32> to vector<128x128xf32>
    %23 = arith.mulf %13, %22 : vector<128x128xf32>
    %c0_5 = arith.constant 0 : index
    %c0_6 = arith.constant 0 : index
    %24 = vector.load %arg2[%c0_5, %c0_6] : memref<1x128xf32, #tpu.memory_space<vmem>>, vector<1x128xf32>
    %25 = vector.broadcast %24 : vector<1x128xf32> to vector<128x128xf32>
    %26 = arith.mulf %23, %25 : vector<128x128xf32>
    %c0_7 = arith.constant 0 : index
    %c0_8 = arith.constant 0 : index
    %27 = vector.load %arg3[%c0_7, %c0_8] : memref<1x128xf32, #tpu.memory_space<vmem>>, vector<1x128xf32>
    %28 = vector.broadcast %27 : vector<1x128xf32> to vector<128x128xf32>
    %29 = arith.addf %26, %28 : vector<128x128xf32>
    %c0_9 = arith.constant 0 : index
    %c0_10 = arith.constant 0 : index
    %30 = vector.load %arg4[%c0_9, %c0_10] : memref<128x384xf32, #tpu.memory_space<vmem>>, vector<128x384xf32>
    %cst_11 = arith.constant dense<0.000000e+00> : vector<128x384xf32>
    %31 = tpu.matmul %29, %30, %cst_11 {dimension_numbers = #tpu.dot_dimension_numbers<[1], [0], [0], [1], [0, 0, 1, 1], [], []>} : vector<128x128xf32>, vector<128x384xf32>, vector<128x384xf32> -> vector<128x384xf32>
    %c0_12 = arith.constant 0 : index
    %c0_13 = arith.constant 0 : index
    %32 = vector.load %arg5[%c0_12, %c0_13] : memref<1x384xf32, #tpu.memory_space<vmem>>, vector<1x384xf32>
    %33 = vector.broadcast %32 : vector<1x384xf32> to vector<128x384xf32>
    %34 = arith.addf %31, %33 : vector<128x384xf32>
    %35 = vector.extract_strided_slice %34 {offsets = [0, 0], sizes = [128, 32], strides = [1, 1]} : vector<128x384xf32> to vector<128x32xf32>
    %36 = vector.shape_cast %35 : vector<128x32xf32> to vector<16x8x32xf32>
    %37 = vector.extract_strided_slice %34 {offsets = [0, 128], sizes = [128, 32], strides = [1, 1]} : vector<128x384xf32> to vector<128x32xf32>
    %38 = vector.shape_cast %37 : vector<128x32xf32> to vector<16x8x32xf32>
    %39 = vector.extract_strided_slice %34 {offsets = [0, 256], sizes = [128, 32], strides = [1, 1]} : vector<128x384xf32> to vector<128x32xf32>
    %40 = vector.shape_cast %39 : vector<128x32xf32> to vector<16x8x32xf32>
    "tpu.trace_start"() <{level = 10 : i32, message = "nqd,nkd->nqk"}> : () -> ()
    %cst_14 = arith.constant dense<0.000000e+00> : vector<16x8x8xf32>
    %41 = tpu.matmul %36, %38, %cst_14 {dimension_numbers = #tpu.dot_dimension_numbers<[2], [2], [1], [1], [0, 0, 0, 1, 1, 1], [0], [0]>} : vector<16x8x32xf32>, vector<16x8x32xf32>, vector<16x8x8xf32> -> vector<16x8x8xf32>
    "tpu.trace_stop"() : () -> ()
    %cst_15 = arith.constant dense<0xFF800000> : vector<16x8xf32>
    %42 = vector.multi_reduction <maximumf>, %41, %cst_15 [2] : vector<16x8x8xf32> to vector<16x8xf32>
    %43 = vector.shape_cast %42 : vector<16x8xf32> to vector<16x8x1xf32>
    %44 = vector.broadcast %43 : vector<16x8x1xf32> to vector<16x8x8xf32>
    %45 = arith.subf %41, %44 : vector<16x8x8xf32>
    %46 = math.exp %45 : vector<16x8x8xf32>
    %cst_16 = arith.constant dense<0.000000e+00> : vector<16x8xf32>
    %47 = vector.multi_reduction <add>, %46, %cst_16 [2] : vector<16x8x8xf32> to vector<16x8xf32>
    %48 = vector.shape_cast %47 : vector<16x8xf32> to vector<16x8x1xf32>
    %49 = vector.broadcast %48 : vector<16x8x1xf32> to vector<16x8x8xf32>
    %50 = arith.divf %46, %49 : vector<16x8x8xf32>
    "tpu.trace_start"() <{level = 10 : i32, message = "nqk,nkd->nqd"}> : () -> ()
    %cst_17 = arith.constant dense<0.000000e+00> : vector<16x8x32xf32>
    %51 = tpu.matmul %50, %40, %cst_17 {dimension_numbers = #tpu.dot_dimension_numbers<[2], [1], [1], [2], [0, 0, 0, 1, 1, 2], [0], [0]>} : vector<16x8x8xf32>, vector<16x8x32xf32>, vector<16x8x32xf32> -> vector<16x8x32xf32>
    "tpu.trace_stop"() : () -> ()
    %52 = vector.shape_cast %51 : vector<16x8x32xf32> to vector<128x32xf32>
    %c0_18 = arith.constant 0 : index
    %c0_19 = arith.constant 0 : index
    %53 = vector.load %arg15[%c0_18, %c0_19] : memref<128x128xf32, #tpu.memory_space<vmem>>, vector<128x32xf32>
    tpu.vector_store %arg15[%c0_18, %c0_19], %52 {strides = array<i32>} : memref<128x128xf32, #tpu.memory_space<vmem>>, vector<128x32xf32>,
    %54 = vector.extract_strided_slice %34 {offsets = [0, 32], sizes = [128, 32], strides = [1, 1]} : vector<128x384xf32> to vector<128x32xf32>
    %55 = vector.shape_cast %54 : vector<128x32xf32> to vector<16x8x32xf32>
    %56 = vector.extract_strided_slice %34 {offsets = [0, 160], sizes = [128, 32], strides = [1, 1]} : vector<128x384xf32> to vector<128x32xf32>
    %57 = vector.shape_cast %56 : vector<128x32xf32> to vector<16x8x32xf32>
    %58 = vector.extract_strided_slice %34 {offsets = [0, 288], sizes = [128, 32], strides = [1, 1]} : vector<128x384xf32> to vector<128x32xf32>
    %59 = vector.shape_cast %58 : vector<128x32xf32> to vector<16x8x32xf32>
    "tpu.trace_start"() <{level = 10 : i32, message = "nqd,nkd->nqk"}> : () -> ()
    %cst_20 = arith.constant dense<0.000000e+00> : vector<16x8x8xf32>
    %60 = tpu.matmul %55, %57, %cst_20 {dimension_numbers = #tpu.dot_dimension_numbers<[2], [2], [1], [1], [0, 0, 0, 1, 1, 1], [0], [0]>} : vector<16x8x32xf32>, vector<16x8x32xf32>, vector<16x8x8xf32> -> vector<16x8x8xf32>
    "tpu.trace_stop"() : () -> ()
    %cst_21 = arith.constant dense<0xFF800000> : vector<16x8xf32>
    %61 = vector.multi_reduction <maximumf>, %60, %cst_21 [2] : vector<16x8x8xf32> to vector<16x8xf32>
    %62 = vector.shape_cast %61 : vector<16x8xf32> to vector<16x8x1xf32>
    %63 = vector.broadcast %62 : vector<16x8x1xf32> to vector<16x8x8xf32>
    %64 = arith.subf %60, %63 : vector<16x8x8xf32>
    %65 = math.exp %64 : vector<16x8x8xf32>
    %cst_22 = arith.constant dense<0.000000e+00> : vector<16x8xf32>
    %66 = vector.multi_reduction <add>, %65, %cst_22 [2] : vector<16x8x8xf32> to vector<16x8xf32>
    %67 = vector.shape_cast %66 : vector<16x8xf32> to vector<16x8x1xf32>
    %68 = vector.broadcast %67 : vector<16x8x1xf32> to vector<16x8x8xf32>
    %69 = arith.divf %65, %68 : vector<16x8x8xf32>
    "tpu.trace_start"() <{level = 10 : i32, message = "nqk,nkd->nqd"}> : () -> ()
    %cst_23 = arith.constant dense<0.000000e+00> : vector<16x8x32xf32>
    %70 = tpu.matmul %69, %59, %cst_23 {dimension_numbers = #tpu.dot_dimension_numbers<[2], [1], [1], [2], [0, 0, 0, 1, 1, 2], [0], [0]>} : vector<16x8x8xf32>, vector<16x8x32xf32>, vector<16x8x32xf32> -> vector<16x8x32xf32>
    "tpu.trace_stop"() : () -> ()
    %71 = vector.shape_cast %70 : vector<16x8x32xf32> to vector<128x32xf32>
    %c0_24 = arith.constant 0 : index
    %c32 = arith.constant 32 : index
    %72 = vector.load %arg15[%c0_24, %c32] : memref<128x128xf32, #tpu.memory_space<vmem>>, vector<128x32xf32>
    tpu.vector_store %arg15[%c0_24, %c32], %71 {strides = array<i32>} : memref<128x128xf32, #tpu.memory_space<vmem>>, vector<128x32xf32>,
    %73 = vector.extract_strided_slice %34 {offsets = [0, 64], sizes = [128, 32], strides = [1, 1]} : vector<128x384xf32> to vector<128x32xf32>
    %74 = vector.shape_cast %73 : vector<128x32xf32> to vector<16x8x32xf32>
    %75 = vector.extract_strided_slice %34 {offsets = [0, 192], sizes = [128, 32], strides = [1, 1]} : vector<128x384xf32> to vector<128x32xf32>
    %76 = vector.shape_cast %75 : vector<128x32xf32> to vector<16x8x32xf32>
    %77 = vector.extract_strided_slice %34 {offsets = [0, 320], sizes = [128, 32], strides = [1, 1]} : vector<128x384xf32> to vector<128x32xf32>
    %78 = vector.shape_cast %77 : vector<128x32xf32> to vector<16x8x32xf32>
    "tpu.trace_start"() <{level = 10 : i32, message = "nqd,nkd->nqk"}> : () -> ()
    %cst_25 = arith.constant dense<0.000000e+00> : vector<16x8x8xf32>
    %79 = tpu.matmul %74, %76, %cst_25 {dimension_numbers = #tpu.dot_dimension_numbers<[2], [2], [1], [1], [0, 0, 0, 1, 1, 1], [0], [0]>} : vector<16x8x32xf32>, vector<16x8x32xf32>, vector<16x8x8xf32> -> vector<16x8x8xf32>
    "tpu.trace_stop"() : () -> ()
    %cst_26 = arith.constant dense<0xFF800000> : vector<16x8xf32>
    %80 = vector.multi_reduction <maximumf>, %79, %cst_26 [2] : vector<16x8x8xf32> to vector<16x8xf32>
    %81 = vector.shape_cast %80 : vector<16x8xf32> to vector<16x8x1xf32>
    %82 = vector.broadcast %81 : vector<16x8x1xf32> to vector<16x8x8xf32>
    %83 = arith.subf %79, %82 : vector<16x8x8xf32>
    %84 = math.exp %83 : vector<16x8x8xf32>
    %cst_27 = arith.constant dense<0.000000e+00> : vector<16x8xf32>
    %85 = vector.multi_reduction <add>, %84, %cst_27 [2] : vector<16x8x8xf32> to vector<16x8xf32>
    %86 = vector.shape_cast %85 : vector<16x8xf32> to vector<16x8x1xf32>
    %87 = vector.broadcast %86 : vector<16x8x1xf32> to vector<16x8x8xf32>
    %88 = arith.divf %84, %87 : vector<16x8x8xf32>
    "tpu.trace_start"() <{level = 10 : i32, message = "nqk,nkd->nqd"}> : () -> ()
    %cst_28 = arith.constant dense<0.000000e+00> : vector<16x8x32xf32>
    %89 = tpu.matmul %88, %78, %cst_28 {dimension_numbers = #tpu.dot_dimension_numbers<[2], [1], [1], [2], [0, 0, 0, 1, 1, 2], [0], [0]>} : vector<16x8x8xf32>, vector<16x8x32xf32>, vector<16x8x32xf32> -> vector<16x8x32xf32>
    "tpu.trace_stop"() : () -> ()
    %90 = vector.shape_cast %89 : vector<16x8x32xf32> to vector<128x32xf32>
    %c0_29 = arith.constant 0 : index
    %c64 = arith.constant 64 : index
    %91 = vector.load %arg15[%c0_29, %c64] : memref<128x128xf32, #tpu.memory_space<vmem>>, vector<128x32xf32>
    tpu.vector_store %arg15[%c0_29, %c64], %90 {strides = array<i32>} : memref<128x128xf32, #tpu.memory_space<vmem>>, vector<128x32xf32>,
    %92 = vector.extract_strided_slice %34 {offsets = [0, 96], sizes = [128, 32], strides = [1, 1]} : vector<128x384xf32> to vector<128x32xf32>
    %93 = vector.shape_cast %92 : vector<128x32xf32> to vector<16x8x32xf32>
    %94 = vector.extract_strided_slice %34 {offsets = [0, 224], sizes = [128, 32], strides = [1, 1]} : vector<128x384xf32> to vector<128x32xf32>
    %95 = vector.shape_cast %94 : vector<128x32xf32> to vector<16x8x32xf32>
    %96 = vector.extract_strided_slice %34 {offsets = [0, 352], sizes = [128, 32], strides = [1, 1]} : vector<128x384xf32> to vector<128x32xf32>
    %97 = vector.shape_cast %96 : vector<128x32xf32> to vector<16x8x32xf32>
    "tpu.trace_start"() <{level = 10 : i32, message = "nqd,nkd->nqk"}> : () -> ()
    %cst_30 = arith.constant dense<0.000000e+00> : vector<16x8x8xf32>
    %98 = tpu.matmul %93, %95, %cst_30 {dimension_numbers = #tpu.dot_dimension_numbers<[2], [2], [1], [1], [0, 0, 0, 1, 1, 1], [0], [0]>} : vector<16x8x32xf32>, vector<16x8x32xf32>, vector<16x8x8xf32> -> vector<16x8x8xf32>
    "tpu.trace_stop"() : () -> ()
    %cst_31 = arith.constant dense<0xFF800000> : vector<16x8xf32>
    %99 = vector.multi_reduction <maximumf>, %98, %cst_31 [2] : vector<16x8x8xf32> to vector<16x8xf32>
    %100 = vector.shape_cast %99 : vector<16x8xf32> to vector<16x8x1xf32>
    %101 = vector.broadcast %100 : vector<16x8x1xf32> to vector<16x8x8xf32>
    %102 = arith.subf %98, %101 : vector<16x8x8xf32>
    %103 = math.exp %102 : vector<16x8x8xf32>
    %cst_32 = arith.constant dense<0.000000e+00> : vector<16x8xf32>
    %104 = vector.multi_reduction <add>, %103, %cst_32 [2] : vector<16x8x8xf32> to vector<16x8xf32>
    %105 = vector.shape_cast %104 : vector<16x8xf32> to vector<16x8x1xf32>
    %106 = vector.broadcast %105 : vector<16x8x1xf32> to vector<16x8x8xf32>
    %107 = arith.divf %103, %106 : vector<16x8x8xf32>
    "tpu.trace_start"() <{level = 10 : i32, message = "nqk,nkd->nqd"}> : () -> ()
    %cst_33 = arith.constant dense<0.000000e+00> : vector<16x8x32xf32>
    %108 = tpu.matmul %107, %97, %cst_33 {dimension_numbers = #tpu.dot_dimension_numbers<[2], [1], [1], [2], [0, 0, 0, 1, 1, 2], [0], [0]>} : vector<16x8x8xf32>, vector<16x8x32xf32>, vector<16x8x32xf32> -> vector<16x8x32xf32>
    "tpu.trace_stop"() : () -> ()
    %109 = vector.shape_cast %108 : vector<16x8x32xf32> to vector<128x32xf32>
    %c0_34 = arith.constant 0 : index
    %c96 = arith.constant 96 : index
    %110 = vector.load %arg15[%c0_34, %c96] : memref<128x128xf32, #tpu.memory_space<vmem>>, vector<128x32xf32>
    tpu.vector_store %arg15[%c0_34, %c96], %109 {strides = array<i32>} : memref<128x128xf32, #tpu.memory_space<vmem>>, vector<128x32xf32>,
    %c0_35 = arith.constant 0 : index
    %c0_36 = arith.constant 0 : index
    %111 = vector.load %arg15[%c0_35, %c0_36] : memref<128x128xf32, #tpu.memory_space<vmem>>, vector<128x128xf32>
    %c0_37 = arith.constant 0 : index
    %c0_38 = arith.constant 0 : index
    %112 = vector.load %arg6[%c0_37, %c0_38] : memref<128x128xf32, #tpu.memory_space<vmem>>, vector<128x128xf32>
    %cst_39 = arith.constant dense<0.000000e+00> : vector<128x128xf32>
    %113 = tpu.matmul %111, %112, %cst_39 {dimension_numbers = #tpu.dot_dimension_numbers<[1], [0], [0], [1], [0, 0, 1, 1], [], []>} : vector<128x128xf32>, vector<128x128xf32>, vector<128x128xf32> -> vector<128x128xf32>
    %114 = arith.addf %0, %113 : vector<128x128xf32>
    %c0_40 = arith.constant 0 : index
    %c0_41 = arith.constant 0 : index
    %115 = vector.load %arg7[%c0_40, %c0_41] : memref<1x128xf32, #tpu.memory_space<vmem>>, vector<1x128xf32>
    %116 = vector.broadcast %115 : vector<1x128xf32> to vector<128x128xf32>
    %117 = arith.addf %114, %116 : vector<128x128xf32>
    %cst_42 = arith.constant dense<0.000000e+00> : vector<128xf32>
    %118 = vector.multi_reduction <add>, %117, %cst_42 [1] : vector<128x128xf32> to vector<128xf32>
    %119 = vector.shape_cast %118 : vector<128xf32> to vector<128x1xf32>
    %cst_43 = arith.constant 3.125000e-02 : f32
    %120 = vector.broadcast %cst_43 : f32 to vector<128x1xf32>
    %121 = arith.mulf %119, %120 : vector<128x1xf32>
    %122 = vector.broadcast %121 : vector<128x1xf32> to vector<128x128xf32>
    %123 = vector.broadcast %5 : vector<1x128xf32> to vector<128x128xf32>
    %124 = arith.mulf %122, %123 : vector<128x128xf32>
    %125 = arith.subf %117, %124 : vector<128x128xf32>
    %126 = arith.mulf %125, %125 : vector<128x128xf32>
    %cst_44 = arith.constant dense<0.000000e+00> : vector<128xf32>
    %127 = vector.multi_reduction <add>, %126, %cst_44 [1] : vector<128x128xf32> to vector<128xf32>
    %128 = vector.shape_cast %127 : vector<128xf32> to vector<128x1xf32>
    %cst_45 = arith.constant 3.125000e-02 : f32
    %129 = vector.broadcast %cst_45 : f32 to vector<128x1xf32>
    %130 = arith.mulf %128, %129 : vector<128x1xf32>
    %cst_46 = arith.constant 9.99999974E-6 : f32
    %131 = vector.broadcast %cst_46 : f32 to vector<128x1xf32>
    %132 = arith.addf %130, %131 : vector<128x1xf32>
    %133 = math.rsqrt %132 : vector<128x1xf32>
    %134 = vector.broadcast %133 : vector<128x1xf32> to vector<128x128xf32>
    %135 = arith.mulf %125, %134 : vector<128x128xf32>
    %c0_47 = arith.constant 0 : index
    %c0_48 = arith.constant 0 : index
    %136 = vector.load %arg8[%c0_47, %c0_48] : memref<1x128xf32, #tpu.memory_space<vmem>>, vector<1x128xf32>
    %137 = vector.broadcast %136 : vector<1x128xf32> to vector<128x128xf32>
    %138 = arith.mulf %135, %137 : vector<128x128xf32>
    %c0_49 = arith.constant 0 : index
    %c0_50 = arith.constant 0 : index
    %139 = vector.load %arg9[%c0_49, %c0_50] : memref<1x128xf32, #tpu.memory_space<vmem>>, vector<1x128xf32>
    %140 = vector.broadcast %139 : vector<1x128xf32> to vector<128x128xf32>
    %141 = arith.addf %138, %140 : vector<128x128xf32>
    %c0_51 = arith.constant 0 : index
    %c0_52 = arith.constant 0 : index
    %142 = vector.load %arg10[%c0_51, %c0_52] : memref<128x128xf32, #tpu.memory_space<vmem>>, vector<128x128xf32>
    %cst_53 = arith.constant dense<0.000000e+00> : vector<128x128xf32>
    %143 = tpu.matmul %141, %142, %cst_53 {dimension_numbers = #tpu.dot_dimension_numbers<[1], [0], [0], [1], [0, 0, 1, 1], [], []>} : vector<128x128xf32>, vector<128x128xf32>, vector<128x128xf32> -> vector<128x128xf32>
    %c0_54 = arith.constant 0 : index
    %c0_55 = arith.constant 0 : index
    %144 = vector.load %arg11[%c0_54, %c0_55] : memref<1x128xf32, #tpu.memory_space<vmem>>, vector<1x128xf32>
    %145 = vector.broadcast %144 : vector<1x128xf32> to vector<128x128xf32>
    %146 = arith.addf %143, %145 : vector<128x128xf32>
    %147 = arith.mulf %146, %146 : vector<128x128xf32>
    %148 = arith.mulf %146, %147 : vector<128x128xf32>
    %cst_56 = arith.constant 4.471500e-02 : f32
    %149 = vector.broadcast %cst_56 : f32 to vector<128x128xf32>
    %150 = arith.mulf %149, %148 : vector<128x128xf32>
    %151 = arith.addf %146, %150 : vector<128x128xf32>
    %cst_57 = arith.constant 0.797884583 : f32
    %152 = vector.broadcast %cst_57 : f32 to vector<128x128xf32>
    %153 = arith.mulf %152, %151 : vector<128x128xf32>
    %154 = math.tanh %153 : vector<128x128xf32>
    %cst_58 = arith.constant 1.000000e+00 : f32
    %155 = vector.broadcast %cst_58 : f32 to vector<128x128xf32>
    %156 = arith.addf %155, %154 : vector<128x128xf32>
    %cst_59 = arith.constant 5.000000e-01 : f32
    %157 = vector.broadcast %cst_59 : f32 to vector<128x128xf32>
    %158 = arith.mulf %157, %156 : vector<128x128xf32>
    %159 = arith.mulf %146, %158 : vector<128x128xf32>
    %c0_60 = arith.constant 0 : index
    %c0_61 = arith.constant 0 : index
    %160 = vector.load %arg12[%c0_60, %c0_61] : memref<128x128xf32, #tpu.memory_space<vmem>>, vector<128x128xf32>
    %cst_62 = arith.constant dense<0.000000e+00> : vector<128x128xf32>
    %161 = tpu.matmul %159, %160, %cst_62 {dimension_numbers = #tpu.dot_dimension_numbers<[1], [0], [0], [1], [0, 0, 1, 1], [], []>} : vector<128x128xf32>, vector<128x128xf32>, vector<128x128xf32> -> vector<128x128xf32>
    %c0_63 = arith.constant 0 : index
    %c0_64 = arith.constant 0 : index
    %162 = vector.load %arg13[%c0_63, %c0_64] : memref<1x128xf32, #tpu.memory_space<vmem>>, vector<1x128xf32>
    %163 = vector.broadcast %162 : vector<1x128xf32> to vector<128x128xf32>
    %164 = arith.addf %161, %163 : vector<128x128xf32>
    %165 = arith.addf %117, %164 : vector<128x128xf32>
    %c0_65 = arith.constant 0 : index
    %c0_66 = arith.constant 0 : index
    %166 = vector.load %arg14[%c0_65, %c0_66] : memref<128x128xf32, #tpu.memory_space<vmem>>, vector<128x128xf32>
    tpu.vector_store %arg14[%c0_65, %c0_66], %165 {strides = array<i32>} : memref<128x128xf32, #tpu.memory_space<vmem>>, vector<128x128xf32>,
    return
  }
  func.func @transform_0(%arg0: i32) -> (i32, i32) {
    %c0_i32 = arith.constant 0 : i32
    %c0_i32_0 = arith.constant 0 : i32
    return %arg0, %c0_i32 : i32, i32
  }
  func.func @transform_1(%arg0: i32) -> (i32, i32) {
    %c0_i32 = arith.constant 0 : i32
    %c0_i32_0 = arith.constant 0 : i32
    %c0_i32_1 = arith.constant 0 : i32
    return %c0_i32, %c0_i32_0 : i32, i32
  }
  func.func @transform_2(%arg0: i32) -> (i32, i32) {
    %c0_i32 = arith.constant 0 : i32
    %c0_i32_0 = arith.constant 0 : i32
    %c0_i32_1 = arith.constant 0 : i32
    return %c0_i32, %c0_i32_0 : i32, i32
  }
  func.func @transform_3(%arg0: i32) -> (i32, i32) {
    %c0_i32 = arith.constant 0 : i32
    %c0_i32_0 = arith.constant 0 : i32
    %c0_i32_1 = arith.constant 0 : i32
    return %c0_i32, %c0_i32_0 : i32, i32
  }
  func.func @transform_4(%arg0: i32) -> (i32, i32) {
    %c0_i32 = arith.constant 0 : i32
    %c0_i32_0 = arith.constant 0 : i32
    %c0_i32_1 = arith.constant 0 : i32
    return %c0_i32, %c0_i32_0 : i32, i32
  }
  func.func @transform_5(%arg0: i32) -> (i32, i32) {
    %c0_i32 = arith.constant 0 : i32
    %c0_i32_0 = arith.constant 0 : i32
    %c0_i32_1 = arith.constant 0 : i32
    return %c0_i32, %c0_i32_0 : i32, i32
  }
  func.func @transform_6(%arg0: i32) -> (i32, i32) {
    %c0_i32 = arith.constant 0 : i32
    %c0_i32_0 = arith.constant 0 : i32
    %c0_i32_1 = arith.constant 0 : i32
    return %c0_i32, %c0_i32_0 : i32, i32
  }
  func.func @transform_7(%arg0: i32) -> (i32, i32) {
    %c0_i32 = arith.constant 0 : i32
    %c0_i32_0 = arith.constant 0 : i32
    %c0_i32_1 = arith.constant 0 : i32
    return %c0_i32, %c0_i32_0 : i32, i32
  }
  func.func @transform_8(%arg0: i32) -> (i32, i32) {
    %c0_i32 = arith.constant 0 : i32
    %c0_i32_0 = arith.constant 0 : i32
    %c0_i32_1 = arith.constant 0 : i32
    return %c0_i32, %c0_i32_0 : i32, i32
  }
  func.func @transform_9(%arg0: i32) -> (i32, i32) {
    %c0_i32 = arith.constant 0 : i32
    %c0_i32_0 = arith.constant 0 : i32
    %c0_i32_1 = arith.constant 0 : i32
    return %c0_i32, %c0_i32_0 : i32, i32
  }
  func.func @transform_10(%arg0: i32) -> (i32, i32) {
    %c0_i32 = arith.constant 0 : i32
    %c0_i32_0 = arith.constant 0 : i32
    %c0_i32_1 = arith.constant 0 : i32
    return %c0_i32, %c0_i32_0 : i32, i32
  }
  func.func @transform_11(%arg0: i32) -> (i32, i32) {
    %c0_i32 = arith.constant 0 : i32
    %c0_i32_0 = arith.constant 0 : i32
    %c0_i32_1 = arith.constant 0 : i32
    return %c0_i32, %c0_i32_0 : i32, i32
  }
  func.func @transform_12(%arg0: i32) -> (i32, i32) {
    %c0_i32 = arith.constant 0 : i32
    %c0_i32_0 = arith.constant 0 : i32
    %c0_i32_1 = arith.constant 0 : i32
    return %c0_i32, %c0_i32_0 : i32, i32
  }
  func.func @transform_13(%arg0: i32) -> (i32, i32) {
    %c0_i32 = arith.constant 0 : i32
    %c0_i32_0 = arith.constant 0 : i32
    return %arg0, %c0_i32 : i32, i32
  }
}

</mosaic_0001>

<bundles_post_ra>
// kernel: swin_transformer_block.2
= control target key start
LH: loop header
LB: loop body
LE: loop exit
PB: predicated region body
PF: predicated region fallthrough
CT: control target
= control target key end

     0   :  { %v17674_v2 = vmov 0.0   ;;  %v60_v41 = vlaneseq  ;;  %vm14399_vm1 = vmmov 0   ;;  %vm674_vm2 = vcmask 261120   ;;  %s14400_s20 = smov 96   ;;  %s14402_s21 = smov 32   ;;  %s17660_s0 = inlined_call_operand.vmem [shape: f32[128,128], index: 0, kind: input, shape index: {}]   ;;  %s17661_s3 = inlined_call_operand.vmem [shape: f32[128,384], index: 3, kind: input, shape index: {}]   ;;  %s17662_s1 = inlined_call_operand.vmem [shape: f32[1,128], index: 1, kind: input, shape index: {}]   ;;  %s17663_s2 = inlined_call_operand.vmem [shape: f32[1,128], index: 2, kind: input, shape index: {}]   ;;  %s17664_s4 = inlined_call_operand.vmem [shape: f32[1,384], index: 4, kind: input, shape index: {}]   ;;  %s17665_s5 = inlined_call_operand.vmem [shape: f32[128,128], index: 5, kind: input, shape index: {}]   ;;  %s17666_s6 = inlined_call_operand.vmem [shape: f32[1,128], index: 6, kind: input, shape index: {}]   ;;  %s17667_s9 = inlined_call_operand.vmem [shape: f32[128,128], index: 9, kind: input, shape index: {}]   ;;  %s17668_s7 = inlined_call_operand.vmem [shape: f32[1,128], index: 7, kind: input, shape index: {}]   ;;  %s17669_s8 = inlined_call_operand.vmem [shape: f32[1,128], index: 8, kind: input, shape index: {}]   ;;  %s17670_s11 = inlined_call_operand.vmem [shape: f32[128,128], index: 11, kind: input, shape index: {}]   ;;  %s17671_s10 = inlined_call_operand.vmem [shape: f32[1,128], index: 10, kind: input, shape index: {}]   ;;  %s17672_s12 = inlined_call_operand.vmem [shape: f32[1,128], index: 12, kind: input, shape index: {}]   ;;  %s17673_s13 = inlined_call_operand.vmem [shape: f32[128,128], index: 13, kind: output, shape index: {}]  }
   0x1   :  { %v14476_v0 = vld [vmem:[%s17660_s0] sm:$0xff]  ;;  %v14481_v1 = vld [vmem:[%s17660_s0 + $0x10] sm:$0xff]  ;;  %432 = vmatprep.mubr.f32.mxu0 %v17674_v2  ;;  %v14489_v3 = vld [vmem:[%s17660_s0 + $0x8] sm:$0xff]  ;;  %vm1891_vm3 = vcmask 64512   ;;  %vm5972_vm4 = vcmask 523520   ;;  %vm8693_vm5 = vcmask 785920  }
   0x2   :  { %65 = vadd.xlane.f32.xlu0 %v14476_v0  ;;  %69 = vadd.xlane.f32.xlu1 %v14481_v1  ;;  %v14494_v4 = vld [vmem:[%s17660_s0 + $0x18] sm:$0xff]  ;;  %v14501_v5 = vld [vmem:[%s17660_s0 + $0x20] sm:$0xff]  ;;  %v14506_v6 = vld [vmem:[%s17660_s0 + $0x28] sm:$0xff]  ;;  %v61_v42 = vand.u32 127, %v60_v41  ;;  %vm11414_vm6 = vcmask 1048320  }
   0x3   :  { %v14513_v7 = vld [vmem:[%s17660_s0 + $0x30] sm:$0xff]  ;;  %v14518_v8 = vld [vmem:[%s17660_s0 + $0x38] sm:$0xff]  ;;  %v14525_v9 = vld [vmem:[%s17660_s0 + $0x40] sm:$0xff] }
   0x4   :  { %v14530_v10 = vld [vmem:[%s17660_s0 + $0x48] sm:$0xff]  ;;  %v14537_v11 = vld [vmem:[%s17660_s0 + $0x50] sm:$0xff]  ;;  %v14542_v12 = vld [vmem:[%s17660_s0 + $0x58] sm:$0xff]  ;;  %vm62_vm0 = vcmp.lt.s32.totalorder %v61_v42, 32 }
   0x5   :  { %v14549_v13 = vld [vmem:[%s17660_s0 + $0x60] sm:$0xff]  ;;  %v14554_v14 = vld [vmem:[%s17660_s0 + $0x68] sm:$0xff]  ;;  %v14561_v15 = vld [vmem:[%s17660_s0 + $0x70] sm:$0xff]  ;;  %v14620_v43 = vsel %vm62_vm0, 1.0, %v17674_v2 }
   0x6   :  { %67 = vadd.xlane.f32.xlu0 %v14489_v3  ;;  %71 = vadd.xlane.f32.xlu1 %v14494_v4  ;;  %v14566_v16 = vld [vmem:[%s17660_s0 + $0x78] sm:$0xff]  ;;  %v304_v17 = vld [vmem:[%s17661_s3 + $0x8] sm:$0xff]  ;;  %v307_v18 = vld [vmem:[%s17661_s3 + $0x20] sm:$0xff]  ;;  %17724 = vst [vmem:[#allocation3_spill] sm:$0xff] %v14620_v43 }
   0x7   :  { %v303_v19 = vld [vmem:[%s17661_s3] sm:$0xff]  ;;  %v13849_v20 = vpack.c.bf16 %v307_v18, %v304_v17  ;;  %v306_v21 = vld [vmem:[%s17661_s3 + $0x18] sm:$0xff]  ;;  %v313_v23 = vld [vmem:[%s17661_s3 + $0x50] sm:$0xff] }
   0x8   :  { %v310_v22 = vld [vmem:[%s17661_s3 + $0x38] sm:$0xff]  ;;  %v13851_v24 = vpack.c.bf16 %v306_v21, %v303_v19  ;;  %v305_v26 = vld [vmem:[%s17661_s3 + $0x10] sm:$0xff]  ;;  %v308_v27 = vld [vmem:[%s17661_s3 + $0x28] sm:$0xff] }
   0x9   :  { %v13853_v25 = vpack.c.bf16 %v313_v23, %v310_v22  ;;  %v309_v28 = vld [vmem:[%s17661_s3 + $0x30] sm:$0xff]  ;;  %13850 = vmatprep.subr.bf16.mxu0 %v13849_v20  ;;  %v13881_v29 = vpack.c.bf16 %v308_v27, %v305_v26  ;;  %v312_v30 = vld [vmem:[%s17661_s3 + $0x48] sm:$0xff]  ;;  %v319_v32 = vld [vmem:[%s17661_s3 + $0x80] sm:$0xff] }
   0xa   :  { %73 = vadd.xlane.f32.xlu0 %v14501_v5  ;;  %75 = vadd.xlane.f32.xlu1 %v14506_v6  ;;  %v316_v31 = vld [vmem:[%s17661_s3 + $0x68] sm:$0xff]  ;;  %v13855_v33 = vpack.c.bf16 %v312_v30, %v309_v28  ;;  %v311_v34 = vld [vmem:[%s17661_s3 + $0x40] sm:$0xff]  ;;  %v314_v35 = vld [vmem:[%s17661_s3 + $0x58] sm:$0xff] }
   0xb   :  { %13852 = vmatpush1.bf16.msra.mxu0 %v13851_v24  ;;  %13882 = vmatprep.subr.bf16.mxu1 %v13881_v29  ;;  %v13857_v36 = vpack.c.bf16 %v319_v32, %v316_v31  ;;  %v13885_v37 = vpack.c.bf16 %v314_v35, %v311_v34  ;;  %v315_v38 = vld [vmem:[%s17661_s3 + $0x60] sm:$0xff]  ;;  %v318_v39 = vld [vmem:[%s17661_s3 + $0x78] sm:$0xff] }
   0xc   :  { %13854 = vmatprep.subr.bf16.mxu0 %v13853_v25  ;;  %13884 = vmatpush3.bf16.msra.mxu1 %v13881_v29  ;;  %v13859_v40 = vpack.c.bf16 %v318_v39, %v315_v38  ;;  %v322_v42 = vld [vmem:[%s17661_s3 + $0x98] sm:$0xff] }
   0xd   :  { %13886 = vmatprep.subr.bf16.mxu1 %v13885_v37 }
   0xe   :  { %77 = vadd.xlane.f32.xlu0 %v14513_v7  ;;  %79 = vadd.xlane.f32.xlu1 %v14518_v8 }
   0xf   :  { %13856 = vmatpush1.bf16.msra.mxu0 %v13855_v33 }
  0x10   :  { %13858 = vmatprep.subr.bf16.mxu0 %v13857_v36  ;;  %13888 = vmatpush3.bf16.msra.mxu1 %v13885_v37 }
  0x12   :  { %81 = vadd.xlane.f32.xlu0 %v14525_v9  ;;  %83 = vadd.xlane.f32.xlu1 %v14530_v10 }
  0x13   :  { %13860 = vmatpush1.bf16.msra.mxu0 %v13859_v40 }
  0x16   :  { %85 = vadd.xlane.f32.xlu0 %v14537_v11  ;;  %87 = vadd.xlane.f32.xlu1 %v14542_v12 }
  0x1a   :  { %89 = vadd.xlane.f32.xlu0 %v14549_v13  ;;  %91 = vadd.xlane.f32.xlu1 %v14554_v14 }
  0x1e   :  { %93 = vadd.xlane.f32.xlu0 %v14561_v15  ;;  %95 = vadd.xlane.f32.xlu1 %v14566_v16 }
  0x8f   :  { %v66_v44 = vpop.xlane.xlu0 %65  ;;  %v70_v45 = vpop.xlane.xlu1 %69 }
  0x90   :  { %v97_v46 = vmul.f32 0.03125, %v66_v44  ;;  %v99_v47 = vmul.f32 0.03125, %v70_v45  ;;  %v325_v44 = vld [vmem:[%s17661_s3 + $0xb0] sm:$0xff] }
  0x91   :  { %v317_v45 = vld [vmem:[%s17661_s3 + $0x70] sm:$0xff] }
  0x92   :  { %v113_v48 = vmul.f32 %v14620_v43, %v97_v46  ;;  %v115_v49 = vmul.f32 %v14620_v43, %v99_v47  ;;  %v13861_v46 = vpack.c.bf16 %v325_v44, %v322_v42  ;;  %v324_v47 = vld [vmem:[%s17661_s3 + $0xa8] sm:$0xff] }
  0x93   :  { %v68_v50 = vpop.xlane.xlu0 %67  ;;  %v72_v51 = vpop.xlane.xlu1 %71 }
  0x94   :  { %v98_v52 = vmul.f32 0.03125, %v68_v50  ;;  %v100_v53 = vmul.f32 0.03125, %v72_v51  ;;  %v14625_v54 = vsub.f32 %v14476_v0, %v113_v48  ;;  %v14628_v55 = vsub.f32 %v14481_v1, %v115_v49  ;;  %13862 = vmatprep.subr.bf16.mxu0 %v13861_v46 }
  0x96   :  { %v114_v56 = vmul.f32 %v14620_v43, %v98_v52  ;;  %v116_v57 = vmul.f32 %v14620_v43, %v100_v53  ;;  %v145_v58 = vmul.f32 %v14625_v54, %v14625_v54  ;;  %v147_v61 = vmul.f32 %v14628_v55, %v14628_v55 }
  0x97   :  { %v74_v59 = vpop.xlane.xlu0 %73  ;;  %v76_v60 = vpop.xlane.xlu1 %75 }
  0x98   :  { %v101_v62 = vmul.f32 0.03125, %v74_v59  ;;  %161 = vadd.xlane.f32.xlu0 %v145_v58  ;;  %v102_v63 = vmul.f32 0.03125, %v76_v60  ;;  %v14637_v0 = vsub.f32 %v14489_v3, %v114_v56  ;;  %v14640_v1 = vsub.f32 %v14494_v4, %v116_v57 }
  0x9a   :  { %v117_v17 = vmul.f32 %v14620_v43, %v101_v62  ;;  %v118_v18 = vmul.f32 %v14620_v43, %v102_v63  ;;  %v146_v19 = vmul.f32 %v14637_v0, %v14637_v0  ;;  %v148_v22 = vmul.f32 %v14640_v1, %v14640_v1  ;;  %v328_v62 = vld [vmem:[%s17661_s3 + $0xc8] sm:$0xff]  ;;  %v331_v63 = vld [vmem:[%s17661_s3 + $0xe0] sm:$0xff] }
  0x9b   :  { %v78_v20 = vpop.xlane.xlu0 %77  ;;  %v80_v21 = vpop.xlane.xlu1 %79 }
  0x9c   :  { %v103_v23 = vmul.f32 0.03125, %v78_v20  ;;  %165 = vadd.xlane.f32.xlu0 %v147_v61  ;;  %163 = vadd.xlane.f32.xlu1 %v146_v19  ;;  %v104_v3 = vmul.f32 0.03125, %v80_v21  ;;  %v14649_v24 = vsub.f32 %v14501_v5, %v117_v17  ;;  %v14652_v4 = vsub.f32 %v14506_v6, %v118_v18  ;;  %v323_v17 = vld [vmem:[%s17661_s3 + $0xa0] sm:$0xff]  ;;  %v326_v19 = vld [vmem:[%s17661_s3 + $0xb8] sm:$0xff] }
  0x9d   :  { %v327_v20 = vld [vmem:[%s17661_s3 + $0xc0] sm:$0xff]  ;;  %v330_v21 = vld [vmem:[%s17661_s3 + $0xd8] sm:$0xff] }
  0x9e   :  { %v119_v25 = vmul.f32 %v14620_v43, %v103_v23  ;;  %v120_v26 = vmul.f32 %v14620_v43, %v104_v3  ;;  %v149_v27 = vmul.f32 %v14649_v24, %v14649_v24  ;;  %v150_v30 = vmul.f32 %v14652_v4, %v14652_v4 }
  0x9f   :  { %v82_v28 = vpop.xlane.xlu0 %81  ;;  %v84_v29 = vpop.xlane.xlu1 %83 }
  0xa0   :  { %v105_v31 = vmul.f32 0.03125, %v82_v28  ;;  %167 = vadd.xlane.f32.xlu1 %v148_v22  ;;  %169 = vadd.xlane.f32.xlu0 %v149_v27  ;;  %v106_v5 = vmul.f32 0.03125, %v84_v29  ;;  %v14661_v32 = vsub.f32 %v14513_v7, %v119_v25  ;;  %v14664_v6 = vsub.f32 %v14518_v8, %v120_v26 }
  0xa1   :  { %v13865_v25 = vpack.c.bf16 %v331_v63, %v328_v62  ;;  %v13893_v26 = vpack.c.bf16 %v326_v19, %v323_v17  ;;  %v13867_v27 = vpack.c.bf16 %v330_v21, %v327_v20  ;;  %v344_v62 = vld [vmem:[%s17661_s3 + $0x148] sm:$0xff]  ;;  %v345_v63 = vld [vmem:[%s17661_s3 + $0x150] sm:$0xff]  ;;  %v350_v19 = vld [vmem:[%s17661_s3 + $0x178] sm:$0xff] }
  0xa2   :  { %v121_v33 = vmul.f32 %v14620_v43, %v105_v31  ;;  %v122_v34 = vmul.f32 %v14620_v43, %v106_v5  ;;  %v151_v35 = vmul.f32 %v14661_v32, %v14661_v32  ;;  %v152_v38 = vmul.f32 %v14664_v6, %v14664_v6  ;;  %v334_v5 = vld [vmem:[%s17661_s3 + $0xf8] sm:$0xff]  ;;  %v348_v17 = vld [vmem:[%s17661_s3 + $0x168] sm:$0xff] }
  0xa3   :  { %v86_v36 = vpop.xlane.xlu0 %85  ;;  %v88_v37 = vpop.xlane.xlu1 %87 }
  0xa4   :  { %v107_v39 = vmul.f32 0.03125, %v86_v36  ;;  %171 = vadd.xlane.f32.xlu1 %v150_v30  ;;  %173 = vadd.xlane.f32.xlu0 %v151_v35  ;;  %v108_v7 = vmul.f32 0.03125, %v88_v37  ;;  %v14673_v40 = vsub.f32 %v14525_v9, %v121_v33  ;;  %v14676_v8 = vsub.f32 %v14530_v10, %v122_v34  ;;  %v320_v9 = vld [vmem:[%s17661_s3 + $0x88] sm:$0xff]  ;;  %v321_v10 = vld [vmem:[%s17661_s3 + $0x90] sm:$0xff] }
  0xa5   :  { %v13889_v56 = vpack.c.bf16 %v320_v9, %v317_v45  ;;  %v13863_v57 = vpack.c.bf16 %v324_v47, %v321_v10  ;;  %v337_v33 = vld [vmem:[%s17661_s3 + $0x110] sm:$0xff]  ;;  %v332_v36 = vld [vmem:[%s17661_s3 + $0xe8] sm:$0xff]  ;;  %v343_v10 = vld [vmem:[%s17661_s3 + $0x140] sm:$0xff] }
  0xa6   :  { %v123_v48 = vmul.f32 %v14620_v43, %v107_v39  ;;  %v124_v49 = vmul.f32 %v14620_v43, %v108_v7  ;;  %v153_v50 = vmul.f32 %v14673_v40, %v14673_v40  ;;  %v154_v53 = vmul.f32 %v14676_v8, %v14676_v8  ;;  %v329_v34 = vld [vmem:[%s17661_s3 + $0xd0] sm:$0xff]  ;;  %v340_v9 = vld [vmem:[%s17661_s3 + $0x128] sm:$0xff]  ;;  %v335_v47 = vld [vmem:[%s17661_s3 + $0x100] sm:$0xff] }
  0xa7   :  { %v90_v51 = vpop.xlane.xlu0 %89  ;;  %v92_v52 = vpop.xlane.xlu1 %91  ;;  %13890 = vmatprep.subr.bf16.mxu1 %v13889_v56  ;;  %13864 = vmatpush1.bf16.msra.mxu0 %v13863_v57  ;;  %v333_v37 = vld [vmem:[%s17661_s3 + $0xf0] sm:$0xff]  ;;  %v13869_v39 = vpack.c.bf16 %v337_v33, %v334_v5  ;;  %v13897_v7 = vpack.c.bf16 %v332_v36, %v329_v34 }
  0xa8   :  { %v109_v58 = vmul.f32 0.03125, %v90_v51  ;;  %175 = vadd.xlane.f32.xlu1 %v152_v38  ;;  %177 = vadd.xlane.f32.xlu0 %v153_v50  ;;  %v110_v59 = vmul.f32 0.03125, %v92_v52  ;;  %v14703_v60 = vsub.f32 %v14537_v11, %v123_v48  ;;  %v14706_v61 = vsub.f32 %v14542_v12, %v124_v49  ;;  %v336_v38 = vld [vmem:[%s17661_s3 + $0x108] sm:$0xff]  ;;  %v338_v48 = vld [vmem:[%s17661_s3 + $0x118] sm:$0xff]  ;;  %v339_v49 = vld [vmem:[%s17661_s3 + $0x120] sm:$0xff] }
  0xa9   :  { %13892 = vmatpush3.bf16.msra.mxu1 %v13889_v56  ;;  %13866 = vmatprep.subr.bf16.mxu0 %v13865_v25  ;;  %v13871_v42 = vpack.c.bf16 %v336_v38, %v333_v37  ;;  %v342_v50 = vld [vmem:[%s17661_s3 + $0x138] sm:$0xff]  ;;  %v13901_v51 = vpack.c.bf16 %v338_v48, %v335_v47  ;;  %v349_v57 = vld [vmem:[%s17661_s3 + $0x170] sm:$0xff] }
  0xaa   :  { %v125_v11 = vmul.f32 %v14620_v43, %v109_v58  ;;  %v126_v18 = vmul.f32 %v14620_v43, %v110_v59  ;;  %v155_v12 = vmul.f32 %v14703_v60, %v14703_v60  ;;  %v156_v3 = vmul.f32 %v14706_v61, %v14706_v61  ;;  %13894 = vmatprep.subr.bf16.mxu1 %v13893_v26  ;;  %v346_v56 = vld [vmem:[%s17661_s3 + $0x158] sm:$0xff]  ;;  %v341_v58 = vld [vmem:[%s17661_s3 + $0x130] sm:$0xff] }
  0xab   :  { %v94_v22 = vpop.xlane.xlu0 %93  ;;  %v96_v23 = vpop.xlane.xlu1 %95  ;;  %13868 = vmatpush1.bf16.msra.mxu0 %v13867_v27  ;;  %v13875_v52 = vpack.c.bf16 %v342_v50, %v339_v49  ;;  %v13877_v59 = vpack.c.bf16 %v349_v57, %v346_v56  ;;  %v14825_v49 = vld [vmem:[%s17663_s2] ss:$0 sm:$0xff] }
  0xac   :  { %v111_v28 = vmul.f32 0.03125, %v94_v22  ;;  %179 = vadd.xlane.f32.xlu1 %v154_v53  ;;  %181 = vadd.xlane.f32.xlu0 %v155_v12  ;;  %v112_v29 = vmul.f32 0.03125, %v96_v23  ;;  %v14733_v30 = vsub.f32 %v14549_v13, %v125_v11  ;;  %v14736_v31 = vsub.f32 %v14554_v14, %v126_v18  ;;  %v347_v12 = vld [vmem:[%s17661_s3 + $0x160] sm:$0xff] }
  0xad   :  { %13896 = vmatpush3.bf16.msra.mxu1 %v13893_v26  ;;  %13870 = vmatprep.subr.bf16.mxu0 %v13869_v39  ;;  %v13905_v11 = vpack.c.bf16 %v344_v62, %v341_v58  ;;  %v13879_v18 = vpack.c.bf16 %v348_v17, %v345_v63  ;;  %v13909_v20 = vpack.c.bf16 %v350_v19, %v347_v12 }
  0xae   :  { %v127_v13 = vmul.f32 %v14620_v43, %v111_v28  ;;  %v128_v35 = vmul.f32 %v14620_v43, %v112_v29  ;;  %v157_v14 = vmul.f32 %v14733_v30, %v14733_v30  ;;  %v158_v44 = vmul.f32 %v14736_v31, %v14736_v31  ;;  %13898 = vmatprep.subr.bf16.mxu1 %v13897_v7 }
  0xaf   :  { %13872 = vmatpush1.bf16.msra.mxu0 %v13871_v42 }
  0xb0   :  { %183 = vadd.xlane.f32.xlu1 %v156_v3  ;;  %185 = vadd.xlane.f32.xlu0 %v157_v14  ;;  %v14763_v45 = vsub.f32 %v14561_v15, %v127_v13  ;;  %v14766_v46 = vsub.f32 %v14566_v16, %v128_v35  ;;  %v13873_v16 = vpack.c.bf16 %v343_v10, %v340_v9  ;;  %v14819_v9 = vld [vmem:[%s17662_s1] ss:$0 sm:$0xff] }
  0xb1   :  { %13900 = vmatpush3.bf16.msra.mxu1 %v13897_v7 }
  0xb2   :  { %v159_v15 = vmul.f32 %v14763_v45, %v14763_v45  ;;  %v160_v53 = vmul.f32 %v14766_v46, %v14766_v46  ;;  %13874 = vmatprep.subr.bf16.mxu0 %v13873_v16  ;;  %13902 = vmatprep.subr.bf16.mxu1 %v13901_v51 }
  0xb3   :  { %13876 = vmatpush1.bf16.msra.mxu0 %v13875_v52 }
  0xb4   :  { %187 = vadd.xlane.f32.xlu1 %v158_v44  ;;  %189 = vadd.xlane.f32.xlu0 %v159_v15 }
  0xb5   :  { %13904 = vmatpush3.bf16.msra.mxu1 %v13901_v51  ;;  %13878 = vmatprep.subr.bf16.mxu0 %v13877_v59 }
  0xb6   :  { %13906 = vmatprep.subr.bf16.mxu1 %v13905_v11 }
  0xb7   :  { %13880 = vmatpush1.bf16.msra.mxu0 %v13879_v18 }
  0xb8   :  { %191 = vadd.xlane.f32.xlu1 %v160_v53  ;;  %13081 = vmatprep.subr.mxu0 %v17674_v2 }
  0xb9   :  { %13908 = vmatpush3.bf16.msra.mxu1 %v13905_v11 }
  0xba   :  { %13910 = vmatprep.subr.bf16.mxu1 %v13909_v20 }
  0xbd   :  { %13912 = vmatpush3.bf16.msra.mxu1 %v13909_v20 }
  0xbe   :  { %13041 = vmatprep.subr.mxu1 %v17674_v2 }
 0x125   :  { %v162_v21 = vpop.xlane.xlu0 %161 }
 0x126   :  { %v193_v22 = vmul.f32 0.03125, %v162_v21 }
 0x128   :  { %v209_v23 = vadd.f32 1e-05, %v193_v22 }
 0x129   :  { %v164_v3 = vpop.xlane.xlu1 %163  ;;  %v166_v25 = vpop.xlane.xlu0 %165 }
 0x12a   :  { %14030 = vrsqrt.f32 %v209_v23  ;;  %v194_v26 = vmul.f32 0.03125, %v164_v3  ;;  %v195_v27 = vmul.f32 0.03125, %v166_v25 }
 0x12c   :  { %v210_v28 = vadd.f32 1e-05, %v194_v26  ;;  %v211_v29 = vadd.f32 1e-05, %v195_v27 }
 0x12d   :  { %v168_v5 = vpop.xlane.xlu1 %167  ;;  %v170_v33 = vpop.xlane.xlu0 %169 }
 0x12e   :  { %14032 = vrsqrt.f32 %v210_v28  ;;  %v196_v34 = vmul.f32 0.03125, %v168_v5  ;;  %v197_v13 = vmul.f32 0.03125, %v170_v33 }
 0x12f   :  { %14034 = vrsqrt.f32 %v211_v29 }
 0x130   :  { %v212_v35 = vadd.f32 1e-05, %v196_v34  ;;  %v213_v14 = vadd.f32 1e-05, %v197_v13 }
 0x131   :  { %v172_v36 = vpop.xlane.xlu1 %171  ;;  %v174_v37 = vpop.xlane.xlu0 %173 }
 0x132   :  { %14036 = vrsqrt.f32 %v212_v35  ;;  %v198_v38 = vmul.f32 0.03125, %v172_v36  ;;  %v199_v39 = vmul.f32 0.03125, %v174_v37 }
 0x133   :  { %14038 = vrsqrt.f32 %v213_v14 }
 0x134   :  { %v14031_v7 = vpop.eup %14030  ;;  %v214_v42 = vadd.f32 1e-05, %v198_v38  ;;  %v215_v44 = vadd.f32 1e-05, %v199_v39 }
 0x135   :  { %v176_v10 = vpop.xlane.xlu1 %175  ;;  %v178_v47 = vpop.xlane.xlu0 %177  ;;  %v241_v15 = vmul.f32 %v14031_v7, %v14625_v54 }
 0x136   :  { %14040 = vrsqrt.f32 %v214_v42  ;;  %v200_v16 = vmul.f32 0.03125, %v176_v10  ;;  %v201_v48 = vmul.f32 0.03125, %v178_v47 }
 0x137   :  { %14042 = vrsqrt.f32 %v215_v44  ;;  %v264_v50 = vmul.f32 %v14819_v9, %v241_v15 }
 0x138   :  { %v14033_v51 = vpop.eup %14032  ;;  %v216_v52 = vadd.f32 1e-05, %v200_v16  ;;  %v217_v53 = vadd.f32 1e-05, %v201_v48 }
 0x139   :  { %v14035_v56 = vpop.eup %14034  ;;  %v180_v57 = vpop.xlane.xlu1 %179  ;;  %v287_v59 = vadd.f32 %v14825_v49, %v264_v50  ;;  %v242_v54 = vmul.f32 %v14033_v51, %v14637_v0 }
 0x13a   :  { %v182_v58 = vpop.xlane.xlu0 %181  ;;  %14044 = vrsqrt.f32 %v216_v52  ;;  %v202_v62 = vmul.f32 0.03125, %v180_v57  ;;  %v243_v17 = vmul.f32 %v14035_v56, %v14628_v55 }
 0x13b   :  { %v203_v63 = vmul.f32 0.03125, %v182_v58  ;;  %14046 = vrsqrt.f32 %v217_v53  ;;  %433 = vmatmul.mubr.f32.vlgmr.msra.gmra.mrb[0].mxu0 %v287_v59  ;;  %13017 = vmatprep.mubr.f32.mxu1 %v287_v59  ;;  %v265_v11 = vmul.f32 %v14819_v9, %v242_v54 }
 0x13c   :  { %v14037_v18 = vpop.eup %14036  ;;  %v218_v12 = vadd.f32 1e-05, %v202_v62  ;;  %438 = vmatprep.mubr.f32.mxu0 %v17674_v2  ;;  %v266_v20 = vmul.f32 %v14819_v9, %v243_v17 }
 0x13d   :  { %v219_v19 = vadd.f32 1e-05, %v203_v63  ;;  %v14039_v21 = vpop.eup %14038  ;;  %v184_v22 = vpop.xlane.xlu1 %183  ;;  %v288_v23 = vadd.f32 %v14825_v49, %v265_v11  ;;  %v244_v3 = vmul.f32 %v14037_v18, %v14640_v1 }
 0x13e   :  { %v186_v0 = vpop.xlane.xlu0 %185  ;;  %14048 = vrsqrt.f32 %v218_v12  ;;  %v204_v55 = vmul.f32 0.03125, %v184_v22  ;;  %v289_v26 = vadd.f32 %v14825_v49, %v266_v20  ;;  %v245_v28 = vmul.f32 %v14039_v21, %v14649_v24 }
 0x13f   :  { %v205_v25 = vmul.f32 0.03125, %v186_v0  ;;  %14050 = vrsqrt.f32 %v219_v19  ;;  %439 = vmatmul.mubr.f32.gmra.mrb[2].mxu0 %v288_v23  ;;  %13018 = vmatmul.mubr.f32.vlgmr.msra.gmra.mrb[0].mxu1 %v288_v23  ;;  %v267_v27 = vmul.f32 %v14819_v9, %v244_v3 }
 0x140   :  { %v14041_v29 = vpop.eup %14040  ;;  %v220_v5 = vadd.f32 1e-05, %v204_v55  ;;  %13020 = vmatprep.mubr.f32.mxu1 %v289_v26  ;;  %444 = vmatprep.mubr.f32.mxu0 %v17674_v2  ;;  %v268_v14 = vmul.f32 %v14819_v9, %v245_v28 }
 0x141   :  { %v221_v33 = vadd.f32 1e-05, %v205_v25  ;;  %v14043_v34 = vpop.eup %14042  ;;  %v188_v1 = vpop.xlane.xlu1 %187  ;;  %v290_v35 = vadd.f32 %v14825_v49, %v267_v27  ;;  %v246_v36 = vmul.f32 %v14041_v29, %v14652_v4 }
 0x142   :  { %v190_v13 = vpop.xlane.xlu0 %189  ;;  %14052 = vrsqrt.f32 %v220_v5  ;;  %v206_v37 = vmul.f32 0.03125, %v188_v1  ;;  %v247_v24 = vmul.f32 %v14043_v34, %v14661_v32  ;;  %v291_v39 = vadd.f32 %v14825_v49, %v268_v14 }
 0x143   :  { %v207_v38 = vmul.f32 0.03125, %v190_v13  ;;  %14054 = vrsqrt.f32 %v221_v33  ;;  %445 = vmatmul.mubr.f32.gmra.mrb[4].mxu0 %v289_v26  ;;  %13021 = vmatmul.mubr.f32.gmra.mrb[2].mxu1 %v290_v35  ;;  %v269_v7 = vmul.f32 %v14819_v9, %v246_v36 }
 0x144   :  { %v14045_v42 = vpop.eup %14044  ;;  %v222_v44 = vadd.f32 1e-05, %v206_v37  ;;  %450 = vmatprep.mubr.f32.mxu0 %v17674_v2  ;;  %v270_v47 = vmul.f32 %v14819_v9, %v247_v24  ;;  %13023 = vmatprep.mubr.f32.mxu1 %v291_v39 }
 0x145   :  { %v223_v10 = vadd.f32 1e-05, %v207_v38  ;;  %v14047_v4 = vpop.eup %14046  ;;  %v192_v15 = vpop.xlane.xlu1 %191  ;;  %v292_v16 = vadd.f32 %v14825_v49, %v269_v7  ;;  %v248_v32 = vmul.f32 %v14045_v42, %v14664_v6 }
 0x146   :  { %14056 = vrsqrt.f32 %v222_v44  ;;  %v208_v48 = vmul.f32 0.03125, %v192_v15  ;;  %v293_v50 = vadd.f32 %v14825_v49, %v270_v47  ;;  %v249_v51 = vmul.f32 %v14047_v4, %v14673_v40 }
 0x147   :  { %14058 = vrsqrt.f32 %v223_v10  ;;  %451 = vmatmul.mubr.f32.gmra.mrb[6].mxu0 %v290_v35  ;;  %13024 = vmatmul.mubr.f32.gmra.mrb[4].mxu1 %v292_v16  ;;  %v271_v52 = vmul.f32 %v14819_v9, %v248_v32 }
 0x148   :  { %v14049_v53 = vpop.eup %14048  ;;  %v224_v56 = vadd.f32 1e-05, %v208_v48  ;;  %13026 = vmatprep.mubr.f32.mxu1 %v293_v50  ;;  %456 = vmatprep.mubr.f32.mxu0 %v17674_v2  ;;  %v272_v57 = vmul.f32 %v14819_v9, %v249_v51 }
 0x149   :  { %v14051_v58 = vpop.eup %14050  ;;  %v294_v6 = vadd.f32 %v14825_v49, %v271_v52  ;;  %v250_v59 = vmul.f32 %v14049_v53, %v14676_v8 }
 0x14a   :  { %14060 = vrsqrt.f32 %v224_v56  ;;  %v295_v40 = vadd.f32 %v14825_v49, %v272_v57  ;;  %v251_v54 = vmul.f32 %v14051_v58, %v14703_v60 }
 0x14b   :  { %457 = vmatmul.mubr.f32.gmra.mrb[8].mxu0 %v291_v39  ;;  %13027 = vmatmul.mubr.f32.gmra.mrb[6].mxu1 %v294_v6  ;;  %v273_v62 = vmul.f32 %v14819_v9, %v250_v59 }
 0x14c   :  { %v14053_v63 = vpop.eup %14052  ;;  %13029 = vmatprep.mubr.f32.mxu1 %v295_v40  ;;  %462 = vmatprep.mubr.f32.mxu0 %v17674_v2  ;;  %v274_v17 = vmul.f32 %v14819_v9, %v251_v54 }
 0x14d   :  { %v14055_v11 = vpop.eup %14054  ;;  %v296_v18 = vadd.f32 %v14825_v49, %v273_v62  ;;  %v252_v8 = vmul.f32 %v14053_v63, %v14706_v61 }
 0x14e   :  { %v297_v12 = vadd.f32 %v14825_v49, %v274_v17  ;;  %v253_v19 = vmul.f32 %v14055_v11, %v14733_v30 }
 0x14f   :  { %463 = vmatmul.mubr.f32.gmra.mrb[10].mxu0 %v292_v16  ;;  %13030 = vmatmul.mubr.f32.gmra.mrb[8].mxu1 %v296_v18  ;;  %v275_v60 = vmul.f32 %v14819_v9, %v252_v8 }
 0x150   :  { %v14057_v20 = vpop.eup %14056  ;;  %13032 = vmatprep.mubr.f32.mxu1 %v297_v12  ;;  %468 = vmatprep.mubr.f32.mxu0 %v17674_v2  ;;  %v276_v21 = vmul.f32 %v14819_v9, %v253_v19 }
 0x151   :  { %v14059_v22 = vpop.eup %14058  ;;  %v298_v0 = vadd.f32 %v14825_v49, %v275_v60  ;;  %v254_v23 = vmul.f32 %v14057_v20, %v14736_v31 }
 0x152   :  { %v299_v61 = vadd.f32 %v14825_v49, %v276_v21  ;;  %v255_v3 = vmul.f32 %v14059_v22, %v14763_v45 }
 0x153   :  { %469 = vmatmul.mubr.f32.gmra.mrb[12].mxu0 %v293_v50  ;;  %13033 = vmatmul.mubr.f32.gmra.mrb[10].mxu1 %v298_v0  ;;  %v277_v30 = vmul.f32 %v14819_v9, %v254_v23 }
 0x154   :  { %v14061_v55 = vpop.eup %14060  ;;  %13035 = vmatprep.mubr.f32.mxu1 %v299_v61  ;;  %474 = vmatprep.mubr.f32.mxu0 %v17674_v2  ;;  %v278_v25 = vmul.f32 %v14819_v9, %v255_v3 }
 0x155   :  { %v300_v26 = vadd.f32 %v14825_v49, %v277_v30  ;;  %v256_v27 = vmul.f32 %v14061_v55, %v14766_v46  ;;  %v354_v46 = vshrl.u32 %v60_v41, 7 }
 0x156   :  { %v301_v31 = vadd.f32 %v14825_v49, %v278_v25 }
 0x157   :  { %475 = vmatmul.mubr.f32.gmra.mrb[14].mxu0 %v294_v6  ;;  %13036 = vmatmul.mubr.f32.gmra.mrb[12].mxu1 %v300_v26  ;;  %v279_v45 = vmul.f32 %v14819_v9, %v256_v27  ;;  %v355_v9 = vsub.s32 0, %v354_v46  ;;  %v359_v29 = vsub.s32 1, %v354_v46  ;;  %v363_v41 = vsub.s32 2, %v354_v46 }
 0x158   :  { %13038 = vmatprep.mubr.f32.mxu1 %v301_v31  ;;  %480 = vmatprep.mubr.f32.mxu0 %v17674_v2 }
 0x159   :  { %v302_v28 = vadd.f32 %v14825_v49, %v279_v45  ;;  %v351_v49 = vld [vmem:[%s17664_s4] sm:$0x7]  ;;  %s14401_s4 = smov 64  }
 0x15a   :  { %v14897_v5 = vrot.slane %v351_v49, %v355_v9  ;;  %v14899_v33 = vrot.slane %v351_v49, %v359_v29  ;;  %v14924_v7 = vrot.slane %v351_v49, %v363_v41 }
 0x15b   :  { %481 = vmatmul.mubr.f32.gmra.mrb[16].mxu0 %v295_v40  ;;  %13039 = vmatmul.mubr.f32.gmra.mrb[14].mxu1 %v302_v28 }
 0x15c   :  { %486 = vmatprep.mubr.f32.mxu0 %v17674_v2  ;;  %13043 = vmatprep.mubr.msk.f32.mxu1 %vm14399_vm1, %v17674_v2 }
 0x15f   :  { %487 = vmatmul.mubr.f32.gmra.mrb[18].mxu0 %v296_v18 }
 0x160   :  { %492 = vmatprep.mubr.f32.mxu0 %v17674_v2 }
 0x163   :  { %493 = vmatmul.mubr.f32.gmra.mrb[20].mxu0 %v297_v12 }
 0x164   :  { %498 = vmatprep.mubr.f32.mxu0 %v17674_v2 }
 0x167   :  { %499 = vmatmul.mubr.f32.gmra.mrb[22].mxu0 %v298_v0 }
 0x168   :  { %504 = vmatprep.mubr.f32.mxu0 %v17674_v2 }
 0x16b   :  { %505 = vmatmul.mubr.f32.gmra.mrb[24].mxu0 %v299_v61 }
 0x16c   :  { %510 = vmatprep.mubr.f32.mxu0 %v17674_v2 }
 0x16f   :  { %511 = vmatmul.mubr.f32.gmra.mrb[26].mxu0 %v300_v26 }
 0x170   :  { %516 = vmatprep.mubr.f32.mxu0 %v17674_v2 }
 0x173   :  { %517 = vmatmul.mubr.f32.gmra.mrb[28].mxu0 %v301_v31 }
 0x174   :  { %522 = vmatprep.mubr.f32.mxu0 %v17674_v2 }
 0x177   :  { %523 = vmatmul.mubr.f32.gmra.mrb[30].mxu0 %v302_v28 }
 0x178   :  { %13083 = vmatprep.mubr.msk.f32.mxu0 %vm14399_vm1, %v17674_v2 }
 0x20e   :  { %v434_v34 = vpop.f32.mrb[0].mxu0 }
 0x20f   :  { %v14902_v1 = vadd.f32 %v434_v34, %v14897_v5  ;;  %v436_v13 = vpop.f32.mrb[1].mxu0 }
 0x210   :  { %v14905_v35 = vadd.f32 %v436_v13, %v14899_v33 }
 0x211   :  { %17725 = vst [vmem:[#allocation4_spill] sm:$0xff] %v14902_v1  ;;  %3252 = vrot.lane.b32.xlu1 %v14902_v1, %s14400_s20 }
 0x212   :  { %17726 = vst [vmem:[#allocation5_spill] sm:$0xff] %v14905_v35  ;;  %v440_v14 = vpop.f32.mrb[2].mxu0  ;;  %v14909_v36 = vpop.f32.mrb[0].mxu1  ;;  %3254 = vrot.lane.b32.xlu0 %v14905_v35, %s14400_s20  ;;  %13042 = vmatpush3.xpose.msk.msra.mxu1 %vm674_vm2, %v14905_v35 }
 0x213   :  { %v14916_v37 = vadd.f32 %v440_v14, %v14897_v5  ;;  %v442_v38 = vpop.f32.mrb[3].mxu0  ;;  %v14918_v24 = vpop.f32.mrb[1].mxu1  ;;  %13046 = vmatprep.subr.mxu1 %v17674_v2 }
 0x214   :  { %v14922_v39 = vadd.f32 %v442_v38, %v14899_v33 }
 0x215   :  { %17727 = vst [vmem:[#allocation6_spill] sm:$0xff] %v14916_v37  ;;  %3330 = vrot.lane.b32.xlu1 %v14916_v37, %s14400_s20  ;;  %13044 = vmatmul.mubr.msk.f32.vlgmr.msra.gmra.mrb[16].mxu1 %vm674_vm2, %v14902_v1 }
 0x216   :  { %17728 = vst [vmem:[#allocation7_spill] sm:$0xff] %v14922_v39  ;;  %v446_v42 = vpop.f32.mrb[4].mxu0  ;;  %v13022_v44 = vpop.f32.mrb[2].mxu1  ;;  %13047 = vmatpush3.xpose.msk.msra.mxu1 %vm674_vm2, %v14922_v39  ;;  %13048 = vmatprep.mubr.msk.f32.mxu1 %vm14399_vm1, %v17674_v2 }
 0x217   :  { %v14935_v10 = vadd.f32 %v446_v42, %v14897_v5  ;;  %v14938_v47 = vadd.f32 %v13022_v44, %v14924_v7  ;;  %v448_v4 = vpop.f32.mrb[5].mxu0  ;;  %v605_v15 = vpop.f32.mrb[3].mxu1  ;;  %13051 = vmatprep.subr.mxu1 %v17674_v2 }
 0x218   :  { %v14942_v16 = vadd.f32 %v448_v4, %v14899_v33  ;;  %v14945_v32 = vadd.f32 %v605_v15, %v14924_v7 }
 0x219   :  { %17729 = vst [vmem:[#allocation8_spill] sm:$0xff] %v14935_v10  ;;  %3332 = vrot.lane.b32.xlu1 %v14922_v39, %s14400_s20  ;;  %3408 = vrot.lane.b32.xlu0 %v14935_v10, %s14400_s20 }
 0x21a   :  { %17730 = vst [vmem:[#allocation9_spill] sm:$0xff] %v14942_v16  ;;  %17731 = vst [vmem:[#allocation10_spill] sm:$0xff] %v14945_v32  ;;  %13049 = vmatmul.mubr.msk.f32.vlgmr.msra.gmra.mrb[18].mxu1 %vm674_vm2, %v14916_v37  ;;  %v452_v48 = vpop.f32.mrb[6].mxu0  ;;  %v13025_v50 = vpop.f32.mrb[4].mxu1 }
 0x21b   :  { %v14954_v51 = vadd.f32 %v452_v48, %v14897_v5  ;;  %v14957_v52 = vadd.f32 %v13025_v50, %v14924_v7  ;;  %13052 = vmatpush3.xpose.msk.msra.mxu1 %vm674_vm2, %v14942_v16  ;;  %v454_v53 = vpop.f32.mrb[7].mxu0  ;;  %v615_v56 = vpop.f32.mrb[5].mxu1  ;;  %13053 = vmatprep.mubr.msk.f32.mxu1 %vm14399_vm1, %v17674_v2 }
 0x21c   :  { %v14964_v57 = vadd.f32 %v454_v53, %v14899_v33  ;;  %v14967_v58 = vadd.f32 %v615_v56, %v14924_v7  ;;  %13056 = vmatprep.subr.mxu1 %v17674_v2 }
 0x21d   :  { %17732 = vst [vmem:[#allocation11_spill] sm:$0xff] %v14954_v51  ;;  %3486 = vrot.lane.b32.xlu1 %v14954_v51, %s14400_s20  ;;  %3410 = vrot.lane.b32.xlu0 %v14942_v16, %s14400_s20 }
 0x21e   :  { %17733 = vst [vmem:[#allocation12_spill] sm:$0xff] %v14964_v57  ;;  %17734 = vst [vmem:[#allocation13_spill] sm:$0xff] %v14967_v58  ;;  %13054 = vmatmul.mubr.msk.f32.vlgmr.msra.gmra.mrb[20].mxu1 %vm674_vm2, %v14935_v10  ;;  %v458_v6 = vpop.f32.mrb[8].mxu0  ;;  %v13028_v59 = vpop.f32.mrb[6].mxu1 }
 0x21f   :  { %v14977_v40 = vadd.f32 %v13028_v59, %v14924_v7  ;;  %13057 = vmatpush3.xpose.msk.msra.mxu1 %vm674_vm2, %v14964_v57  ;;  %v460_v54 = vpop.f32.mrb[9].mxu0  ;;  %v625_v62 = vpop.f32.mrb[7].mxu1  ;;  %13058 = vmatprep.mubr.msk.f32.mxu1 %vm14399_vm1, %v17674_v2  ;;  %v15002_v60 = vadd.f32 %v458_v6, %v14897_v5 }
 0x220   :  { %v14984_v63 = vadd.f32 %v460_v54, %v14899_v33  ;;  %v14987_v17 = vadd.f32 %v625_v62, %v14924_v7  ;;  %13061 = vmatprep.subr.mxu1 %v17674_v2 }
 0x221   :  { %3488 = vrot.lane.b32.xlu1 %v14964_v57, %s14400_s20  ;;  %17736 = vst [vmem:[#allocation15_spill] sm:$0xff] %v15002_v60 }
 0x222   :  { %17735 = vst [vmem:[#allocation14_spill] sm:$0xff] %v14984_v63  ;;  %13059 = vmatmul.mubr.msk.f32.vlgmr.msra.gmra.mrb[22].mxu1 %vm674_vm2, %v14954_v51  ;;  %v464_v11 = vpop.f32.mrb[10].mxu0  ;;  %v13031_v18 = vpop.f32.mrb[8].mxu1 }
 0x223   :  { %v14995_v8 = vadd.f32 %v13031_v18, %v14924_v7  ;;  %13062 = vmatpush3.xpose.msk.msra.mxu1 %vm674_vm2, %v14984_v63  ;;  %v466_v12 = vpop.f32.mrb[11].mxu0  ;;  %v635_v19 = vpop.f32.mrb[9].mxu1  ;;  %13063 = vmatprep.mubr.msk.f32.mxu1 %vm14399_vm1, %v17674_v2  ;;  %v15021_v30 = vadd.f32 %v464_v11, %v14897_v5 }
 0x224   :  { %v15005_v20 = vadd.f32 %v466_v12, %v14899_v33  ;;  %v15008_v21 = vadd.f32 %v635_v19, %v14924_v7  ;;  %13066 = vmatprep.subr.mxu1 %v17674_v2 }
 0x225   :  { %17740 = vst [vmem:[#allocation19_spill] sm:$0xff] %v15021_v30 }
 0x226   :  { %17737 = vst [vmem:[#allocation16_spill] sm:$0xff] %v15005_v20  ;;  %17738 = vst [vmem:[#allocation17_spill] sm:$0xff] %v15008_v21  ;;  %13064 = vmatmul.mubr.msk.f32.vlgmr.msra.gmra.mrb[24].mxu1 %vm674_vm2, %v15002_v60  ;;  %v470_v22 = vpop.f32.mrb[12].mxu0  ;;  %v13034_v0 = vpop.f32.mrb[10].mxu1 }
 0x227   :  { %v15014_v23 = vadd.f32 %v13034_v0, %v14924_v7  ;;  %13067 = vmatpush3.xpose.msk.msra.mxu1 %vm674_vm2, %v15005_v20  ;;  %v472_v61 = vpop.f32.mrb[13].mxu0  ;;  %v645_v3 = vpop.f32.mrb[11].mxu1  ;;  %13068 = vmatprep.mubr.msk.f32.mxu1 %vm14399_vm1, %v17674_v2  ;;  %v15040_v46 = vadd.f32 %v470_v22, %v14897_v5 }
 0x228   :  { %v15024_v55 = vadd.f32 %v472_v61, %v14899_v33  ;;  %v15027_v25 = vadd.f32 %v645_v3, %v14924_v7  ;;  %13071 = vmatprep.subr.mxu1 %v17674_v2 }
 0x229   :  { %17739 = vst [vmem:[#allocation18_spill] sm:$0xff] %v15014_v23 }
 0x22a   :  { %17741 = vst [vmem:[#allocation20_spill] sm:$0xff] %v15024_v55  ;;  %17742 = vst [vmem:[#allocation21_spill] sm:$0xff] %v15027_v25  ;;  %13069 = vmatmul.mubr.msk.f32.vlgmr.msra.gmra.mrb[26].mxu1 %vm674_vm2, %v15021_v30  ;;  %v476_v26 = vpop.f32.mrb[14].mxu0  ;;  %v13037_v27 = vpop.f32.mrb[12].mxu1 }
 0x22b   :  { %v15033_v31 = vadd.f32 %v13037_v27, %v14924_v7  ;;  %13072 = vmatpush3.xpose.msk.msra.mxu1 %vm674_vm2, %v15024_v55  ;;  %v478_v45 = vpop.f32.mrb[15].mxu0  ;;  %v655_v28 = vpop.f32.mrb[13].mxu1  ;;  %13073 = vmatprep.mubr.msk.f32.mxu1 %vm14399_vm1, %v17674_v2  ;;  %v15059_v38 = vadd.f32 %v476_v26, %v14897_v5 }
 0x22c   :  { %v15043_v9 = vadd.f32 %v478_v45, %v14899_v33  ;;  %v15046_v49 = vadd.f32 %v655_v28, %v14924_v7  ;;  %13076 = vmatprep.subr.mxu1 %v17674_v2 }
 0x22d   :  { %17743 = vst [vmem:[#allocation22_spill] sm:$0xff] %v15033_v31 }
 0x22e   :  { %17744 = vst [vmem:[#allocation23_spill] sm:$0xff] %v15043_v9  ;;  %17745 = vst [vmem:[#allocation24_spill] sm:$0xff] %v15046_v49  ;;  %13074 = vmatmul.mubr.msk.f32.vlgmr.msra.gmra.mrb[28].mxu1 %vm674_vm2, %v15040_v46  ;;  %v482_v29 = vpop.f32.mrb[16].mxu0  ;;  %v13040_v34 = vpop.f32.mrb[14].mxu1 }
 0x22f   :  { %v15052_v13 = vadd.f32 %v13040_v34, %v14924_v7  ;;  %13077 = vmatpush3.xpose.msk.msra.mxu1 %vm674_vm2, %v15043_v9  ;;  %v484_v41 = vpop.f32.mrb[17].mxu0  ;;  %v665_v14 = vpop.f32.mrb[15].mxu1  ;;  %13078 = vmatprep.mubr.msk.f32.mxu1 %vm14399_vm1, %v17674_v2  ;;  %v15073_v15 = vadd.f32 %v482_v29, %v14897_v5 }
 0x230   :  { %v15062_v42 = vadd.f32 %v484_v41, %v14899_v33  ;;  %v15065_v44 = vadd.f32 %v665_v14, %v14924_v7  ;;  %13086 = vmatprep.subr.mxu1 %v17674_v2 }
 0x231   :  { %17746 = vst [vmem:[#allocation25_spill] sm:$0xff] %v15052_v13 }
 0x232   :  { %17747 = vst [vmem:[#allocation26_spill] sm:$0xff] %v15065_v44  ;;  %13079 = vmatmul.mubr.msk.f32.vlgmr.msra.gmra.mrb[30].mxu1 %vm674_vm2, %v15059_v38  ;;  %v488_v4 = vpop.f32.mrb[18].mxu0  ;;  %13082 = vmatpush3.xpose.msk.msra.mxu0 %vm674_vm2, %v15062_v42 }
 0x233   :  { %v490_v48 = vpop.f32.mrb[19].mxu0  ;;  %13088 = vmatprep.mubr.msk.f32.mxu1 %vm14399_vm1, %v17674_v2  ;;  %13091 = vmatprep.subr.mxu0 %v17674_v2  ;;  %v15088_v56 = vadd.f32 %v488_v4, %v14897_v5 }
 0x234   :  { %v15079_v50 = vadd.f32 %v490_v48, %v14899_v33 }
 0x235   :  { %13084 = vmatmul.mubr.msk.f32.vlgmr.msra.gmra.mrb[32].mxu0 %vm674_vm2, %v15073_v15 }
 0x236   :  { %v494_v53 = vpop.f32.mrb[20].mxu0  ;;  %13087 = vmatpush3.xpose.msk.msra.mxu1 %vm674_vm2, %v15079_v50  ;;  %13093 = vmatprep.mubr.msk.f32.mxu0 %vm14399_vm1, %v17674_v2 }
 0x237   :  { %v496_v6 = vpop.f32.mrb[21].mxu0  ;;  %13096 = vmatprep.subr.mxu1 %v17674_v2  ;;  %v15101_v62 = vadd.f32 %v494_v53, %v14897_v5  ;;  %v15161_v53 = vadd.f32 %v14918_v24, %v14924_v7 }
 0x238   :  { %v15092_v59 = vadd.f32 %v496_v6, %v14899_v33 }
 0x239   :  { %13089 = vmatmul.mubr.msk.f32.vlgmr.msra.gmra.mrb[32].mxu1 %vm674_vm2, %v15088_v56  ;;  %17749 = vst [vmem:[#allocation28_spill] sm:$0xff] %v15161_v53 }
 0x23a   :  { %v500_v54 = vpop.f32.mrb[22].mxu0  ;;  %13092 = vmatpush3.xpose.msk.msra.mxu0 %vm674_vm2, %v15092_v59  ;;  %13098 = vmatprep.mubr.msk.f32.mxu1 %vm14399_vm1, %v17674_v2 }
 0x23b   :  { %v502_v11 = vpop.f32.mrb[23].mxu0  ;;  %13101 = vmatprep.subr.mxu0 %v17674_v2  ;;  %v15114_v19 = vadd.f32 %v500_v54, %v14897_v5 }
 0x23c   :  { %v15105_v18 = vadd.f32 %v502_v11, %v14899_v33 }
 0x23d   :  { %13094 = vmatmul.mubr.msk.f32.vlgmr.msra.gmra.mrb[34].mxu0 %vm674_vm2, %v15101_v62 }
 0x23e   :  { %v506_v12 = vpop.f32.mrb[24].mxu0  ;;  %13097 = vmatpush3.xpose.msk.msra.mxu1 %vm674_vm2, %v15105_v18  ;;  %13103 = vmatprep.mubr.msk.f32.mxu0 %vm14399_vm1, %v17674_v2 }
 0x23f   :  { %v508_v22 = vpop.f32.mrb[25].mxu0  ;;  %13106 = vmatprep.subr.mxu1 %v17674_v2  ;;  %v15127_v3 = vadd.f32 %v506_v12, %v14897_v5 }
 0x240   :  { %v15118_v0 = vadd.f32 %v508_v22, %v14899_v33 }
 0x241   :  { %13099 = vmatmul.mubr.msk.f32.vlgmr.msra.gmra.mrb[34].mxu1 %vm674_vm2, %v15114_v19 }
 0x242   :  { %v512_v61 = vpop.f32.mrb[26].mxu0  ;;  %13102 = vmatpush3.xpose.msk.msra.mxu0 %vm674_vm2, %v15118_v0  ;;  %13108 = vmatprep.mubr.msk.f32.mxu1 %vm14399_vm1, %v17674_v2 }
 0x243   :  { %v514_v26 = vpop.f32.mrb[27].mxu0  ;;  %13111 = vmatprep.subr.mxu0 %v17674_v2  ;;  %v15140_v28 = vadd.f32 %v512_v61, %v14897_v5 }
 0x244   :  { %v15131_v27 = vadd.f32 %v514_v26, %v14899_v33 }
 0x245   :  { %13104 = vmatmul.mubr.msk.f32.vlgmr.msra.gmra.mrb[36].mxu0 %vm674_vm2, %v15127_v3 }
 0x246   :  { %v518_v45 = vpop.f32.mrb[28].mxu0  ;;  %13107 = vmatpush3.xpose.msk.msra.mxu1 %vm674_vm2, %v15131_v27  ;;  %13113 = vmatprep.mubr.msk.f32.mxu0 %vm14399_vm1, %v17674_v2 }
 0x247   :  { %v520_v29 = vpop.f32.mrb[29].mxu0  ;;  %13116 = vmatprep.subr.mxu1 %v17674_v2  ;;  %v15153_v14 = vadd.f32 %v518_v45, %v14897_v5 }
 0x248   :  { %v15144_v34 = vadd.f32 %v520_v29, %v14899_v33 }
 0x249   :  { %13109 = vmatmul.mubr.msk.f32.vlgmr.msra.gmra.mrb[36].mxu1 %vm674_vm2, %v15140_v28  ;;  %17748 = vst [vmem:[#allocation27_spill] sm:$0xff] %v15153_v14 }
 0x24a   :  { %v524_v41 = vpop.f32.mrb[30].mxu0  ;;  %13112 = vmatpush3.xpose.msk.msra.mxu0 %vm674_vm2, %v15144_v34  ;;  %13118 = vmatprep.mubr.msk.f32.mxu1 %vm14399_vm1, %v17674_v2 }
 0x24b   :  { %v15156_v4 = vadd.f32 %v524_v41, %v14897_v5  ;;  %v526_v48 = vpop.f32.mrb[31].mxu0  ;;  %13121 = vmatprep.subr.mxu0 %v17674_v2  ;;  %v15176_v5 = vadd.f32 %v14909_v36, %v14924_v7 }
 0x24c   :  { %v15164_v6 = vadd.f32 %v526_v48, %v14899_v33 }
 0x24d   :  { %13114 = vmatmul.mubr.msk.f32.vlgmr.msra.gmra.mrb[38].mxu0 %vm674_vm2, %v15153_v14 }
 0x24e   :  { %13117 = vmatpush3.xpose.msk.msra.mxu1 %vm674_vm2, %v15164_v6  ;;  %13122 = vmatpush3.msra.mxu0 %v15161_v53 }
 0x24f   :  { %13126 = vmatprep.subr.mxu1 %v17674_v2  ;;  %13123 = vmatprep.mubr.msk.f32.mxu0 %vm14399_vm1, %v17674_v2 }
 0x250   :  { %13131 = vmatprep.subr.mxu0 %v17674_v2 }
 0x251   :  { %13119 = vmatmul.mubr.msk.f32.vlgmr.msra.gmra.mrb[38].mxu1 %vm674_vm2, %v15156_v4 }
 0x252   :  { %13127 = vmatpush3.msra.mxu1 %v15176_v5  ;;  %13128 = vmatprep.mubr.msk.f32.mxu1 %vm14399_vm1, %v17674_v2 }
 0x253   :  { %13136 = vmatprep.subr.mxu1 %v17674_v2 }
 0x2e8   :  { %v15185_v33 = vpop.f32.mrb[16].mxu1 }
 0x2e9   :  { %v13045_v24 = vpop.f32.mrb[17].mxu1  ;;  %v1892_v36 = vsel %vm1891_vm3, %v15185_v33, -inf }
 0x2ea   :  { %1893 = vmax.xlane.f32.xlu0 %v1892_v36 }
 0x2ed   :  { %v15189_v7 = vpop.f32.mrb[18].mxu1 }
 0x2ee   :  { %v13050_v54 = vpop.f32.mrb[19].mxu1  ;;  %v1895_v11 = vsel %vm1891_vm3, %v15189_v7, -inf }
 0x2ef   :  { %1896 = vmax.xlane.f32.xlu1 %v1895_v11 }
 0x2f1   :  { %v15193_v12 = vpop.f32.mrb[20].mxu1 }
 0x2f2   :  { %v13055_v22 = vpop.f32.mrb[21].mxu1  ;;  %v1898_v61 = vsel %vm1891_vm3, %v15193_v12, -inf }
 0x2f3   :  { %1899 = vmax.xlane.f32.xlu0 %v1898_v61 }
 0x2f5   :  { %v15197_v26 = vpop.f32.mrb[22].mxu1 }
 0x2f6   :  { %v13060_v45 = vpop.f32.mrb[23].mxu1  ;;  %v1901_v29 = vsel %vm1891_vm3, %v15197_v26, -inf }
 0x2f7   :  { %1902 = vmax.xlane.f32.xlu1 %v1901_v29 }
 0x2f9   :  { %v15201_v41 = vpop.f32.mrb[24].mxu1 }
 0x2fa   :  { %v13065_v48 = vpop.f32.mrb[25].mxu1  ;;  %v1904_v24 = vsel %vm1891_vm3, %v15201_v41, -inf }
 0x2fb   :  { %1905 = vmax.xlane.f32.xlu0 %v1904_v24 }
 0x2fd   :  { %v15205_v36 = vpop.f32.mrb[26].mxu1 }
 0x2fe   :  { %v13070_v54 = vpop.f32.mrb[27].mxu1  ;;  %v1907_v11 = vsel %vm1891_vm3, %v15205_v36, -inf }
 0x2ff   :  { %1908 = vmax.xlane.f32.xlu1 %v1907_v11 }
 0x301   :  { %v15209_v22 = vpop.f32.mrb[28].mxu1 }
 0x302   :  { %v13075_v61 = vpop.f32.mrb[29].mxu1  ;;  %v1910_v45 = vsel %vm1891_vm3, %v15209_v22, -inf }
 0x303   :  { %1911 = vmax.xlane.f32.xlu0 %v1910_v45 }
 0x305   :  { %v15213_v29 = vpop.f32.mrb[30].mxu1 }
 0x306   :  { %v13080_v48 = vpop.f32.mrb[31].mxu1  ;;  %v1913_v24 = vsel %vm1891_vm3, %v15213_v29, -inf }
 0x307   :  { %1914 = vmax.xlane.f32.xlu1 %v1913_v24 }
 0x308   :  { %v15217_v2 = vpop.f32.mrb[32].mxu0 }
 0x309   :  { %v13085_v54 = vpop.f32.mrb[33].mxu0  ;;  %v1916_v11 = vsel %vm1891_vm3, %v15217_v2, -inf }
 0x30a   :  { %1917 = vmax.xlane.f32.xlu0 %v1916_v11 }
 0x30c   :  { %v15221_v43 = vpop.f32.mrb[32].mxu1 }
 0x30d   :  { %v13090_v61 = vpop.f32.mrb[33].mxu1  ;;  %v1919_v45 = vsel %vm1891_vm3, %v15221_v43, -inf }
 0x30e   :  { %1920 = vmax.xlane.f32.xlu1 %v1919_v45 }
 0x310   :  { %v15225_v51 = vpop.f32.mrb[34].mxu0 }
 0x311   :  { %v13095_v48 = vpop.f32.mrb[35].mxu0  ;;  %v1922_v24 = vsel %vm1891_vm3, %v15225_v51, -inf }
 0x312   :  { %1923 = vmax.xlane.f32.xlu0 %v1922_v24 }
 0x314   :  { %v15229_v57 = vpop.f32.mrb[34].mxu1 }
 0x315   :  { %v13100_v54 = vpop.f32.mrb[35].mxu1  ;;  %v1925_v11 = vsel %vm1891_vm3, %v15229_v57, -inf }
 0x316   :  { %1926 = vmax.xlane.f32.xlu1 %v1925_v11 }
 0x318   :  { %v15233_v37 = vpop.f32.mrb[36].mxu0 }
 0x319   :  { %v13105_v61 = vpop.f32.mrb[37].mxu0  ;;  %v1928_v45 = vsel %vm1891_vm3, %v15233_v37, -inf }
 0x31a   :  { %1929 = vmax.xlane.f32.xlu0 %v1928_v45 }
 0x31c   :  { %v15237_v39 = vpop.f32.mrb[36].mxu1 }
 0x31d   :  { %v13110_v48 = vpop.f32.mrb[37].mxu1  ;;  %v1931_v24 = vsel %vm1891_vm3, %v15237_v39, -inf }
 0x31e   :  { %1932 = vmax.xlane.f32.xlu1 %v1931_v24  ;;  %v15259_v48 = vpop.permute.xlu1 %3252 }
 0x31f   :  { %17750 = vst [vmem:[#allocation29_spill] sm:$0xff] %v15259_v48 }
 0x320   :  { %v15241_v13 = vpop.f32.mrb[38].mxu0 }
 0x321   :  { %v13115_v54 = vpop.f32.mrb[39].mxu0  ;;  %v1934_v11 = vsel %vm1891_vm3, %v15241_v13, -inf }
 0x322   :  { %1935 = vmax.xlane.f32.xlu0 %v1934_v11  ;;  %v15261_v24 = vpop.permute.xlu1 %3330  ;;  %v15265_v54 = vpop.permute.xlu0 %3254 }
 0x323   :  { %17751 = vst [vmem:[#allocation30_spill] sm:$0xff] %v15261_v24  ;;  %17752 = vst [vmem:[#allocation31_spill] sm:$0xff] %v15265_v54 }
 0x324   :  { %v15245_v31 = vpop.f32.mrb[38].mxu1 }
 0x325   :  { %v13120_v61 = vpop.f32.mrb[39].mxu1  ;;  %v1937_v45 = vsel %vm1891_vm3, %v15245_v31, -inf }
 0x326   :  { %v15267_v11 = vpop.permute.xlu1 %3332  ;;  %v15269_v61 = vpop.permute.xlu0 %3408 }
 0x327   :  { %17753 = vst [vmem:[#allocation32_spill] sm:$0xff] %v15267_v11  ;;  %17754 = vst [vmem:[#allocation33_spill] sm:$0xff] %v15269_v61 }
 0x32f   :  { %3644 = vrot.lane.b32.xlu1 %v15005_v20, %s14400_s20 }
 0x333   :  { %3642 = vrot.lane.b32.xlu1 %v15021_v30, %s14400_s20 }
 0x338   :  { %3566 = vrot.lane.b32.xlu0 %v14984_v63, %s14400_s20 }
 0x33c   :  { %3564 = vrot.lane.b32.xlu0 %v15002_v60, %s14400_s20  ;;  %v15271_v60 = vpop.permute.xlu1 %3486 }
 0x33d   :  { %17755 = vst [vmem:[#allocation34_spill] sm:$0xff] %v15271_v60 }
 0x340   :  { %3722 = vrot.lane.b32.xlu0 %v15024_v55, %s14400_s20  ;;  %v15273_v55 = vpop.permute.xlu0 %3410  ;;  %v15275_v30 = vpop.permute.xlu1 %3488 }
 0x341   :  { %17756 = vst [vmem:[#allocation35_spill] sm:$0xff] %v15273_v55  ;;  %17757 = vst [vmem:[#allocation36_spill] sm:$0xff] %v15275_v30 }
 0x357   :  { %1938 = vmax.xlane.f32.xlu1 %v1937_v45 }
 0x368   :  { %3800 = vrot.lane.b32.xlu1 %v15043_v9, %s14400_s20 }
 0x377   :  { %v1894_v63 = vpop.xlane.xlu0 %1893 }
 0x378   :  { %v1940_v45 = vsub.f32 %v15185_v33, %v1894_v63 }
 0x37a   :  { %v1956_v20 = vmul.f32 1.442695, %v1940_v45 }
 0x37c   :  { %14062 = vpow2.f32 %v1956_v20  ;;  %v1897_v24 = vpop.xlane.xlu1 %1896 }
 0x37d   :  { %v1941_v9 = vsub.f32 %v15189_v7, %v1897_v24 }
 0x37f   :  { %v1958_v48 = vmul.f32 1.442695, %v1941_v9 }
 0x380   :  { %v1900_v54 = vpop.xlane.xlu0 %1899 }
 0x381   :  { %14064 = vpow2.f32 %v1958_v48  ;;  %v1942_v11 = vsub.f32 %v15193_v12, %v1900_v54 }
 0x383   :  { %v1960_v61 = vmul.f32 1.442695, %v1942_v11 }
 0x384   :  { %v1903_v23 = vpop.xlane.xlu1 %1902 }
 0x385   :  { %14066 = vpow2.f32 %v1960_v61  ;;  %v1943_v60 = vsub.f32 %v15197_v26, %v1903_v23 }
 0x386   :  { %v15281_v55 = vpop.eup %14062 }
 0x387   :  { %v1962_v30 = vmul.f32 1.442695, %v1943_v60  ;;  %v1988_v63 = vsel %vm1891_vm3, %v15281_v55, 0.0 }
 0x388   :  { %v1906_v20 = vpop.xlane.xlu0 %1905  ;;  %1989 = vadd.xlane.f32.xlu0 %v1988_v63 }
 0x389   :  { %14068 = vpow2.f32 %v1962_v30  ;;  %v1944_v9 = vsub.f32 %v15201_v41, %v1906_v20 }
 0x38b   :  { %v15286_v33 = vpop.eup %14064  ;;  %v1964_v7 = vmul.f32 1.442695, %v1944_v9 }
 0x38c   :  { %v1909_v12 = vpop.xlane.xlu1 %1908  ;;  %v1991_v48 = vsel %vm1891_vm3, %v15286_v33, 0.0 }
 0x38d   :  { %14070 = vpow2.f32 %v1964_v7  ;;  %v1945_v23 = vsub.f32 %v15205_v36, %v1909_v12  ;;  %1992 = vadd.xlane.f32.xlu1 %v1991_v48 }
 0x38f   :  { %v15291_v60 = vpop.eup %14066  ;;  %v1966_v26 = vmul.f32 1.442695, %v1945_v23 }
 0x390   :  { %v1912_v24 = vpop.xlane.xlu0 %1911  ;;  %v1994_v30 = vsel %vm1891_vm3, %v15291_v60, 0.0 }
 0x391   :  { %14072 = vpow2.f32 %v1966_v26  ;;  %v1946_v41 = vsub.f32 %v15209_v22, %v1912_v24  ;;  %1995 = vadd.xlane.f32.xlu0 %v1994_v30 }
 0x393   :  { %v15296_v54 = vpop.eup %14068  ;;  %v1968_v11 = vmul.f32 1.442695, %v1946_v41 }
 0x394   :  { %v1915_v61 = vpop.xlane.xlu1 %1914  ;;  %v1997_v45 = vsel %vm1891_vm3, %v15296_v54, 0.0 }
 0x395   :  { %14074 = vpow2.f32 %v1968_v11  ;;  %v1947_v36 = vsub.f32 %v15213_v29, %v1915_v61  ;;  %1998 = vadd.xlane.f32.xlu1 %v1997_v45 }
 0x397   :  { %v15301_v63 = vpop.eup %14070  ;;  %v1970_v20 = vmul.f32 1.442695, %v1947_v36  ;;  %v1918_v9 = vpop.xlane.xlu0 %1917 }
 0x398   :  { %v1948_v7 = vsub.f32 %v15217_v2, %v1918_v9  ;;  %v2000_v22 = vsel %vm1891_vm3, %v15301_v63, 0.0 }
 0x399   :  { %14076 = vpow2.f32 %v1970_v20  ;;  %2001 = vadd.xlane.f32.xlu0 %v2000_v22 }
 0x39a   :  { %v1972_v12 = vmul.f32 1.442695, %v1948_v7 }
 0x39b   :  { %v15306_v48 = vpop.eup %14072  ;;  %v1921_v23 = vpop.xlane.xlu1 %1920 }
 0x39c   :  { %14078 = vpow2.f32 %v1972_v12  ;;  %v1949_v26 = vsub.f32 %v15221_v43, %v1921_v23  ;;  %v2003_v29 = vsel %vm1891_vm3, %v15306_v48, 0.0 }
 0x39d   :  { %2004 = vadd.xlane.f32.xlu1 %v2003_v29 }
 0x39e   :  { %v1974_v24 = vmul.f32 1.442695, %v1949_v26 }
 0x39f   :  { %v15311_v30 = vpop.eup %14074  ;;  %v1924_v2 = vpop.xlane.xlu0 %1923 }
 0x3a0   :  { %14080 = vpow2.f32 %v1974_v24  ;;  %v1950_v41 = vsub.f32 %v15225_v51, %v1924_v2  ;;  %v2006_v11 = vsel %vm1891_vm3, %v15311_v30, 0.0 }
 0x3a1   :  { %2007 = vadd.xlane.f32.xlu0 %v2006_v11 }
 0x3a2   :  { %v1976_v61 = vmul.f32 1.442695, %v1950_v41 }
 0x3a3   :  { %v15316_v45 = vpop.eup %14076  ;;  %v1927_v36 = vpop.xlane.xlu1 %1926 }
 0x3a4   :  { %14082 = vpow2.f32 %v1976_v61  ;;  %v1951_v43 = vsub.f32 %v15229_v57, %v1927_v36  ;;  %v2009_v20 = vsel %vm1891_vm3, %v15316_v45, 0.0 }
 0x3a5   :  { %2010 = vadd.xlane.f32.xlu1 %v2009_v20 }
 0x3a6   :  { %v15321_v9 = vpop.eup %14078  ;;  %v1978_v7 = vmul.f32 1.442695, %v1951_v43 }
 0x3a7   :  { %v1930_v22 = vpop.xlane.xlu0 %1929  ;;  %v2012_v51 = vsel %vm1891_vm3, %v15321_v9, 0.0 }
 0x3a8   :  { %14084 = vpow2.f32 %v1978_v7  ;;  %v1952_v12 = vsub.f32 %v15233_v37, %v1930_v22  ;;  %2013 = vadd.xlane.f32.xlu0 %v2012_v51 }
 0x3aa   :  { %v15326_v23 = vpop.eup %14080  ;;  %v1980_v26 = vmul.f32 1.442695, %v1952_v12 }
 0x3ab   :  { %v1933_v29 = vpop.xlane.xlu1 %1932  ;;  %v2015_v57 = vsel %vm1891_vm3, %v15326_v23, 0.0 }
 0x3ac   :  { %14086 = vpow2.f32 %v1980_v26  ;;  %v1953_v24 = vsub.f32 %v15237_v39, %v1933_v29  ;;  %2016 = vadd.xlane.f32.xlu1 %v2015_v57 }
 0x3ae   :  { %v15331_v2 = vpop.eup %14082  ;;  %v1982_v41 = vmul.f32 1.442695, %v1953_v24 }
 0x3af   :  { %v1936_v11 = vpop.xlane.xlu0 %1935  ;;  %v2018_v61 = vsel %vm1891_vm3, %v15331_v2, 0.0  ;;  %v15356_v26 = vpop.permute.xlu1 %3644 }
 0x3b0   :  { %14088 = vpow2.f32 %v1982_v41  ;;  %v1954_v37 = vsub.f32 %v15241_v13, %v1936_v11  ;;  %2019 = vadd.xlane.f32.xlu0 %v2018_v61 }
 0x3b2   :  { %v15336_v36 = vpop.eup %14084  ;;  %v1984_v43 = vmul.f32 1.442695, %v1954_v37 }
 0x3b3   :  { %v2021_v20 = vsel %vm1891_vm3, %v15336_v36, 0.0  ;;  %v15362_v29 = vpop.permute.xlu1 %3642 }
 0x3b4   :  { %14090 = vpow2.f32 %v1984_v43  ;;  %2022 = vadd.xlane.f32.xlu1 %v2021_v20 }
 0x3b6   :  { %v15340_v39 = vpop.eup %14086 }
 0x3b7   :  { %v2024_v7 = vsel %vm1891_vm3, %v15340_v39, 0.0 }
 0x3b8   :  { %2025 = vadd.xlane.f32.xlu0 %v2024_v7 }
 0x3ba   :  { %v15344_v22 = vpop.eup %14088 }
 0x3bb   :  { %v2027_v13 = vsel %vm1891_vm3, %v15344_v22, 0.0 }
 0x3bc   :  { %2028 = vadd.xlane.f32.xlu1 %v2027_v13 }
 0x3be   :  { %v15348_v51 = vpop.eup %14090 }
 0x3bf   :  { %v2030_v12 = vsel %vm1891_vm3, %v15348_v51, 0.0 }
 0x3c0   :  { %2031 = vadd.xlane.f32.xlu0 %v2030_v12 }
 0x3cd   :  { %3798 = vrot.lane.b32.xlu1 %v15059_v38, %s14400_s20 }
 0x3d6   :  { %3720 = vrot.lane.b32.xlu0 %v15040_v46, %s14400_s20 }
 0x3da   :  { %3878 = vrot.lane.b32.xlu0 %v15062_v42, %s14400_s20 }
 0x3de   :  { %3876 = vrot.lane.b32.xlu0 %v15073_v15, %s14400_s20 }
 0x3e2   :  { %4034 = vrot.lane.b32.xlu0 %v15092_v59, %s14400_s20 }
 0x3e4   :  { %v1939_v57 = vpop.xlane.xlu1 %1938 }
 0x3e5   :  { %v1955_v24 = vsub.f32 %v15245_v31, %v1939_v57  ;;  %v15387_v31 = vpop.permute.xlu0 %3566 }
 0x3e6   :  { %4032 = vrot.lane.b32.xlu0 %v15101_v62, %s14400_s20 }
 0x3e7   :  { %v1986_v41 = vmul.f32 1.442695, %v1955_v24 }
 0x3e8   :  { %v15409_v7 = vpop.permute.xlu1 %3800 }
 0x3e9   :  { %14092 = vpow2.f32 %v1986_v41  ;;  %v15397_v37 = vpop.permute.xlu0 %3564 }
 0x3ea   :  { %4190 = vrot.lane.b32.xlu0 %v15118_v0, %s14400_s20 }
 0x3ed   :  { %v15403_v43 = vpop.permute.xlu0 %3722 }
 0x3ee   :  { %4188 = vrot.lane.b32.xlu0 %v15127_v3, %s14400_s20 }
 0x3f2   :  { %4346 = vrot.lane.b32.xlu0 %v15144_v34, %s14400_s20 }
 0x3f3   :  { %v15375_v11 = vpop.eup %14092 }
 0x3f4   :  { %v2033_v61 = vsel %vm1891_vm3, %v15375_v11, 0.0 }
 0x3f5   :  { %2034 = vadd.xlane.f32.xlu1 %v2033_v61  ;;  %v17758_v61 = vmov 0.0  }
 0x3f6   :  { %4344 = vrot.lane.b32.xlu0 %v15153_v14, %s14400_s20 }
 0x3fa   :  { %4677 = vrot.lane.b32.xlu0 %v15161_v53, %s14400_s20 }
 0x3fe   :  { %4831 = vrot.lane.b32.xlu0 %v14945_v32, %s14400_s20 }
 0x402   :  { %4985 = vrot.lane.b32.xlu0 %v14967_v58, %s14400_s20 }
 0x406   :  { %3956 = vrot.lane.b32.xlu1 %v15079_v50, %s14400_s20  ;;  %5293 = vrot.lane.b32.xlu0 %v15008_v21, %s14400_s20 }
 0x40a   :  { %3954 = vrot.lane.b32.xlu1 %v15088_v56, %s14400_s20  ;;  %5447 = vrot.lane.b32.xlu0 %v15027_v25, %s14400_s20 }
 0x40e   :  { %4112 = vrot.lane.b32.xlu1 %v15105_v18, %s14400_s20  ;;  %5601 = vrot.lane.b32.xlu0 %v15046_v49, %s14400_s20 }
 0x412   :  { %4110 = vrot.lane.b32.xlu1 %v15114_v19, %s14400_s20  ;;  %5755 = vrot.lane.b32.xlu0 %v15065_v44, %s14400_s20 }
 0x415   :  { %v1990_v20 = vpop.xlane.xlu0 %1989 }
 0x416   :  { %14094 = vrcp.f32 %v1990_v20  ;;  %4268 = vrot.lane.b32.xlu1 %v15131_v27, %s14400_s20  ;;  %5991 = vrot.lane.b32.xlu0 %v14905_v35, %s14401_s4  ;;  %v17776_v35 = vld [vmem:[#allocation19_spill] sm:$0xff] }
 0x41a   :  { %v1993_v13 = vpop.xlane.xlu1 %1992  ;;  %4266 = vrot.lane.b32.xlu1 %v15140_v28, %s14400_s20  ;;  %5989 = vrot.lane.b32.xlu0 %v14902_v1, %s14401_s4 }
 0x41b   :  { %14096 = vrcp.f32 %v1993_v13 }
 0x41e   :  { %v1996_v12 = vpop.xlane.xlu0 %1995  ;;  %4424 = vrot.lane.b32.xlu1 %v15164_v6, %s14400_s20  ;;  %6147 = vrot.lane.b32.xlu0 %v14942_v16, %s14401_s4 }
 0x41f   :  { %14098 = vrcp.f32 %v1996_v12 }
 0x420   :  { %v14095_v57 = vpop.eup %14094 }
 0x421   :  { %v2037_v24 = vmul.f32 %v14095_v57, %v15281_v55 }
 0x422   :  { %v1999_v41 = vpop.xlane.xlu1 %1998  ;;  %4422 = vrot.lane.b32.xlu1 %v15156_v4, %s14400_s20  ;;  %6145 = vrot.lane.b32.xlu0 %v14935_v10, %s14401_s4 }
 0x423   :  { %14100 = vrcp.f32 %v1999_v41  ;;  %13124 = vmatmul.mubr.msk.f32.vlgmr.msra.gmra.mrb[40].mxu0 %vm1891_vm3, %v2037_v24 }
 0x424   :  { %13132 = vmatpush3.msra.mxu0 %v14945_v32  ;;  %13133 = vmatprep.mubr.msk.f32.mxu0 %vm14399_vm1, %v17758_v61 }
 0x425   :  { %v14097_v20 = vpop.eup %14096  ;;  %13141 = vmatprep.subr.mxu0 %v17758_v61 }
 0x426   :  { %v2002_v13 = vpop.xlane.xlu0 %2001  ;;  %4754 = vrot.lane.b32.xlu1 %v15176_v5, %s14400_s20  ;;  %v2039_v55 = vmul.f32 %v14097_v20, %v15286_v33 }
 0x427   :  { %14102 = vrcp.f32 %v2002_v13 }
 0x428   :  { %13129 = vmatmul.mubr.msk.f32.vlgmr.msra.gmra.mrb[40].mxu1 %vm1891_vm3, %v2039_v55 }
 0x429   :  { %v14099_v12 = vpop.eup %14098  ;;  %13137 = vmatpush3.msra.mxu1 %v14938_v47  ;;  %13138 = vmatprep.mubr.msk.f32.mxu1 %vm14399_vm1, %v17758_v61 }
 0x42a   :  { %v2005_v57 = vpop.xlane.xlu1 %2004  ;;  %4908 = vrot.lane.b32.xlu1 %v14938_v47, %s14400_s20  ;;  %v2041_v24 = vmul.f32 %v14099_v12, %v15291_v60  ;;  %13146 = vmatprep.subr.mxu1 %v17758_v61 }
 0x42b   :  { %14104 = vrcp.f32 %v2005_v57 }
 0x42c   :  { %13134 = vmatmul.mubr.msk.f32.vlgmr.msra.gmra.mrb[42].mxu0 %vm1891_vm3, %v2041_v24 }
 0x42d   :  { %v14101_v33 = vpop.eup %14100  ;;  %13142 = vmatpush3.msra.mxu0 %v14967_v58  ;;  %13143 = vmatprep.mubr.msk.f32.mxu0 %vm14399_vm1, %v17758_v61 }
 0x42e   :  { %v2008_v41 = vpop.xlane.xlu0 %2007  ;;  %5062 = vrot.lane.b32.xlu1 %v14957_v52, %s14400_s20  ;;  %v2043_v20 = vmul.f32 %v14101_v33, %v15296_v54  ;;  %13151 = vmatprep.subr.mxu0 %v17758_v61 }
 0x42f   :  { %14106 = vrcp.f32 %v2008_v41 }
 0x430   :  { %13139 = vmatmul.mubr.msk.f32.vlgmr.msra.gmra.mrb[42].mxu1 %vm1891_vm3, %v2043_v20  ;;  %v17759_v20 = vld [vmem:[#allocation18_spill] sm:$0xff] }
 0x431   :  { %v14103_v60 = vpop.eup %14102  ;;  %13147 = vmatpush3.msra.mxu1 %v14957_v52  ;;  %13148 = vmatprep.mubr.msk.f32.mxu1 %vm14399_vm1, %v17758_v61 }
 0x432   :  { %v2011_v13 = vpop.xlane.xlu1 %2010  ;;  %5139 = vrot.lane.b32.xlu1 %v14987_v17, %s14400_s20  ;;  %v2045_v55 = vmul.f32 %v14103_v60, %v15301_v63  ;;  %13156 = vmatprep.subr.mxu1 %v17758_v61 }
 0x433   :  { %14108 = vrcp.f32 %v2011_v13 }
 0x434   :  { %13144 = vmatmul.mubr.msk.f32.vlgmr.msra.gmra.mrb[44].mxu0 %vm1891_vm3, %v2045_v55 }
 0x435   :  { %v14105_v54 = vpop.eup %14104  ;;  %13152 = vmatpush3.msra.mxu0 %v14987_v17  ;;  %v2014_v12 = vpop.xlane.xlu0 %2013  ;;  %13153 = vmatprep.mubr.msk.f32.mxu0 %vm14399_vm1, %v17758_v61 }
 0x436   :  { %14110 = vrcp.f32 %v2014_v12  ;;  %5216 = vrot.lane.b32.xlu1 %v14977_v40, %s14400_s20  ;;  %v2047_v57 = vmul.f32 %v14105_v54, %v15306_v48  ;;  %13161 = vmatprep.subr.mxu0 %v17758_v61  ;;  %v17760_v54 = vld [vmem:[#allocation22_spill] sm:$0xff] }
 0x438   :  { %13149 = vmatmul.mubr.msk.f32.vlgmr.msra.gmra.mrb[44].mxu1 %vm1891_vm3, %v2047_v57  ;;  %v17761_v57 = vld [vmem:[#allocation25_spill] sm:$0xff] }
 0x439   :  { %v14107_v63 = vpop.eup %14106  ;;  %13157 = vmatpush3.msra.mxu1 %v14977_v40  ;;  %v2017_v24 = vpop.xlane.xlu1 %2016  ;;  %13158 = vmatprep.mubr.msk.f32.mxu1 %vm14399_vm1, %v17758_v61 }
 0x43a   :  { %14112 = vrcp.f32 %v2017_v24  ;;  %5370 = vrot.lane.b32.xlu1 %v14995_v8, %s14400_s20  ;;  %v2049_v33 = vmul.f32 %v14107_v63, %v15311_v30  ;;  %13166 = vmatprep.subr.mxu1 %v17758_v61 }
 0x43c   :  { %13154 = vmatmul.mubr.msk.f32.vlgmr.msra.gmra.mrb[46].mxu0 %vm1891_vm3, %v2049_v33 }
 0x43d   :  { %v14109_v48 = vpop.eup %14108  ;;  %13162 = vmatpush3.msra.mxu0 %v15008_v21  ;;  %v2020_v41 = vpop.xlane.xlu0 %2019  ;;  %13163 = vmatprep.mubr.msk.f32.mxu0 %vm14399_vm1, %v17758_v61 }
 0x43e   :  { %14114 = vrcp.f32 %v2020_v41  ;;  %5524 = vrot.lane.b32.xlu1 %v17759_v20, %s14400_s20  ;;  %v2051_v60 = vmul.f32 %v14109_v48, %v15316_v45  ;;  %13171 = vmatprep.subr.mxu0 %v17758_v61 }
 0x440   :  { %v14111_v30 = vpop.eup %14110  ;;  %13159 = vmatmul.mubr.msk.f32.vlgmr.msra.gmra.mrb[46].mxu1 %vm1891_vm3, %v2051_v60 }
 0x441   :  { %13167 = vmatpush3.msra.mxu1 %v14995_v8  ;;  %v2023_v13 = vpop.xlane.xlu1 %2022  ;;  %v2053_v55 = vmul.f32 %v14111_v30, %v15321_v9  ;;  %13168 = vmatprep.mubr.msk.f32.mxu1 %vm14399_vm1, %v17758_v61 }
 0x442   :  { %14116 = vrcp.f32 %v2023_v13  ;;  %5678 = vrot.lane.b32.xlu1 %v17760_v54, %s14400_s20  ;;  %13176 = vmatprep.subr.mxu1 %v17758_v61 }
 0x443   :  { %13164 = vmatmul.mubr.msk.f32.vlgmr.msra.gmra.mrb[48].mxu0 %vm1891_vm3, %v2053_v55 }
 0x444   :  { %v14113_v45 = vpop.eup %14112  ;;  %13172 = vmatpush3.msra.mxu0 %v15027_v25  ;;  %13173 = vmatprep.mubr.msk.f32.mxu0 %vm14399_vm1, %v17758_v61 }
 0x445   :  { %v2026_v12 = vpop.xlane.xlu0 %2025  ;;  %v2055_v9 = vmul.f32 %v14113_v45, %v15326_v23  ;;  %13181 = vmatprep.subr.mxu0 %v17758_v61  ;;  %v17762_v23 = vld [vmem:[#allocation7_spill] sm:$0xff] }
 0x446   :  { %14118 = vrcp.f32 %v2026_v12  ;;  %5832 = vrot.lane.b32.xlu1 %v17761_v57, %s14400_s20 }
 0x447   :  { %13169 = vmatmul.mubr.msk.f32.vlgmr.msra.gmra.mrb[48].mxu1 %vm1891_vm3, %v2055_v9 }
 0x448   :  { %v14115_v63 = vpop.eup %14114  ;;  %13177 = vmatpush3.msra.mxu1 %v17759_v20  ;;  %13178 = vmatprep.mubr.msk.f32.mxu1 %vm14399_vm1, %v17758_v61 }
 0x449   :  { %v2029_v24 = vpop.xlane.xlu1 %2028  ;;  %v2057_v33 = vmul.f32 %v14115_v63, %v15331_v2  ;;  %13186 = vmatprep.subr.mxu1 %v17758_v61  ;;  %v17763_v2 = vld [vmem:[#allocation6_spill] sm:$0xff] }
 0x44a   :  { %14120 = vrcp.f32 %v2029_v24  ;;  %6069 = vrot.lane.b32.xlu1 %v17762_v23, %s14401_s4 }
 0x44b   :  { %13174 = vmatmul.mubr.msk.f32.vlgmr.msra.gmra.mrb[50].mxu0 %vm1891_vm3, %v2057_v33 }
 0x44c   :  { %v14117_v48 = vpop.eup %14116  ;;  %13182 = vmatpush3.msra.mxu0 %v15046_v49  ;;  %13183 = vmatprep.mubr.msk.f32.mxu0 %vm14399_vm1, %v17758_v61 }
 0x44d   :  { %v2032_v41 = vpop.xlane.xlu0 %2031  ;;  %v2059_v60 = vmul.f32 %v14117_v48, %v15336_v36  ;;  %13191 = vmatprep.subr.mxu0 %v17758_v61  ;;  %v17764_v36 = vld [vmem:[#allocation12_spill] sm:$0xff] }
 0x44e   :  { %14122 = vrcp.f32 %v2032_v41  ;;  %6067 = vrot.lane.b32.xlu1 %v17763_v2, %s14401_s4  ;;  %v17767_v41 = vld [vmem:[#allocation29_spill] sm:$0xff] }
 0x44f   :  { %13179 = vmatmul.mubr.msk.f32.vlgmr.msra.gmra.mrb[50].mxu1 %vm1891_vm3, %v2059_v60  ;;  %v17768_v60 = vld [vmem:[#allocation35_spill] sm:$0xff] }
 0x450   :  { %v14119_v30 = vpop.eup %14118  ;;  %13187 = vmatpush3.msra.mxu1 %v17760_v54  ;;  %13188 = vmatprep.mubr.msk.f32.mxu1 %vm14399_vm1, %v17758_v61 }
 0x451   :  { %v3721_v13 = vpop.permute.xlu0 %3720  ;;  %v2061_v55 = vmul.f32 %v14119_v30, %v15340_v39  ;;  %13196 = vmatprep.subr.mxu1 %v17758_v61  ;;  %v17765_v39 = vld [vmem:[#allocation11_spill] sm:$0xff]  ;;  %v17769_v30 = vld [vmem:[#allocation33_spill] sm:$0xff] }
 0x452   :  { %6225 = vrot.lane.b32.xlu1 %v17764_v36, %s14401_s4 }
 0x453   :  { %13184 = vmatmul.mubr.msk.f32.vlgmr.msra.gmra.mrb[52].mxu0 %vm1891_vm3, %v2061_v55 }
 0x454   :  { %v14121_v45 = vpop.eup %14120  ;;  %13192 = vmatpush3.msra.mxu0 %v15065_v44  ;;  %13193 = vmatprep.mubr.msk.f32.mxu0 %vm14399_vm1, %v17758_v61  ;;  %v17781_v44 = vld [vmem:[#allocation20_spill] sm:$0xff] }
 0x455   :  { %v3879_v12 = vpop.permute.xlu0 %3878  ;;  %v2063_v9 = vmul.f32 %v14121_v45, %v15344_v22  ;;  %13201 = vmatprep.subr.mxu0 %v17758_v61  ;;  %v17766_v22 = vld [vmem:[#allocation31_spill] sm:$0xff] }
 0x456   :  { %6223 = vrot.lane.b32.xlu1 %v17765_v39, %s14401_s4 }
 0x457   :  { %13189 = vmatmul.mubr.msk.f32.vlgmr.msra.gmra.mrb[52].mxu1 %vm1891_vm3, %v2063_v9 }
 0x458   :  { %v14123_v63 = vpop.eup %14122  ;;  %13197 = vmatpush3.msra.mxu1 %v17761_v57  ;;  %13198 = vmatprep.mubr.msk.f32.mxu1 %vm14399_vm1, %v17758_v61 }
 0x459   :  { %v3877_v24 = vpop.permute.xlu0 %3876  ;;  %v2065_v33 = vmul.f32 %v14123_v63, %v15348_v51  ;;  %13206 = vmatprep.subr.mxu1 %v17758_v61 }
 0x45b   :  { %13194 = vmatmul.mubr.msk.f32.vlgmr.msra.gmra.mrb[54].mxu0 %vm1891_vm3, %v2065_v33 }
 0x45c   :  { %13202 = vmatpush3.xpose.msk.msra.mxu0 %vm674_vm2, %v17766_v22  ;;  %13203 = vmatprep.mubr.msk.f32.mxu0 %vm14399_vm1, %v17758_v61 }
 0x45d   :  { %v4035_v48 = vpop.permute.xlu0 %4034  ;;  %13211 = vmatprep.subr.mxu0 %v17758_v61 }
 0x45f   :  { %13204 = vmatmul.mubr.msk.f32.vlgmr.msra.gmra.mrb[56].mxu0 %vm674_vm2, %v17767_v41 }
 0x460   :  { %13212 = vmatpush3.xpose.msk.msra.mxu0 %vm674_vm2, %v17768_v60  ;;  %13213 = vmatprep.mubr.msk.f32.mxu0 %vm14399_vm1, %v17758_v61  ;;  %v17771_v60 = vld [vmem:[#allocation30_spill] sm:$0xff] }
 0x461   :  { %v4033_v51 = vpop.permute.xlu0 %4032  ;;  %13221 = vmatprep.subr.mxu0 %v17758_v61 }
 0x463   :  { %13214 = vmatmul.mubr.msk.f32.vlgmr.msra.gmra.mrb[58].mxu0 %vm674_vm2, %v17769_v30  ;;  %v17773_v30 = vld [vmem:[#allocation34_spill] sm:$0xff] }
 0x464   :  { %13222 = vmatpush3.xpose.msk.msra.mxu0 %vm674_vm2, %v15387_v31  ;;  %13223 = vmatprep.mubr.msk.f32.mxu0 %vm14399_vm1, %v17758_v61 }
 0x465   :  { %v4191_v55 = vpop.permute.xlu0 %4190  ;;  %13231 = vmatprep.subr.mxu0 %v17758_v61 }
 0x467   :  { %13224 = vmatmul.mubr.msk.f32.vlgmr.msra.gmra.mrb[60].mxu0 %vm674_vm2, %v15397_v37 }
 0x468   :  { %13232 = vmatpush3.xpose.msk.msra.mxu0 %vm674_vm2, %v15403_v43  ;;  %13233 = vmatprep.mubr.msk.f32.mxu0 %vm14399_vm1, %v17758_v61 }
 0x469   :  { %v4189_v45 = vpop.permute.xlu0 %4188  ;;  %13241 = vmatprep.subr.mxu0 %v17758_v61 }
 0x46b   :  { %13234 = vmatmul.mubr.msk.f32.vlgmr.msra.gmra.mrb[62].mxu0 %vm674_vm2, %v3721_v13  ;;  %v3799_v13 = vpop.permute.xlu1 %3798 }
 0x46c   :  { %13242 = vmatpush3.xpose.msk.msra.mxu0 %vm674_vm2, %v3879_v12  ;;  %13243 = vmatprep.mubr.msk.f32.mxu0 %vm14399_vm1, %v17758_v61 }
 0x46d   :  { %13251 = vmatprep.subr.mxu0 %v17758_v61  ;;  %v4347_v31 = vpop.permute.xlu0 %4346 }
 0x46f   :  { %13244 = vmatmul.mubr.msk.f32.vlgmr.msra.gmra.mrb[64].mxu0 %vm674_vm2, %v3877_v24 }
 0x470   :  { %13252 = vmatpush3.xpose.msk.msra.mxu0 %vm674_vm2, %v4035_v48  ;;  %13253 = vmatprep.mubr.msk.f32.mxu0 %vm14399_vm1, %v17758_v61  ;;  %v17770_v48 = vld [vmem:[#allocation32_spill] sm:$0xff] }
 0x471   :  { %13261 = vmatprep.subr.mxu0 %v17758_v61  ;;  %v4345_v37 = vpop.permute.xlu0 %4344 }
 0x473   :  { %13254 = vmatmul.mubr.msk.f32.vlgmr.msra.gmra.mrb[66].mxu0 %vm674_vm2, %v4033_v51  ;;  %v17772_v51 = vld [vmem:[#allocation36_spill] sm:$0xff] }
 0x474   :  { %13262 = vmatpush3.xpose.msk.msra.mxu0 %vm674_vm2, %v4191_v55  ;;  %13263 = vmatprep.mubr.msk.f32.mxu0 %vm14399_vm1, %v17758_v61 }
 0x475   :  { %13271 = vmatprep.subr.mxu0 %v17758_v61  ;;  %v4678_v43 = vpop.permute.xlu0 %4677 }
 0x477   :  { %13264 = vmatmul.mubr.msk.f32.vlgmr.msra.gmra.mrb[68].mxu0 %vm674_vm2, %v4189_v45 }
 0x478   :  { %13272 = vmatpush3.xpose.msk.msra.mxu0 %vm674_vm2, %v4347_v31  ;;  %13273 = vmatprep.mubr.msk.f32.mxu0 %vm14399_vm1, %v17758_v61 }
 0x479   :  { %13281 = vmatprep.subr.mxu0 %v17758_v61 }
 0x47b   :  { %13274 = vmatmul.mubr.msk.f32.vlgmr.msra.gmra.mrb[70].mxu0 %vm674_vm2, %v4345_v37 }
 0x47c   :  { %13282 = vmatpush3.msra.mxu0 %v4678_v43  ;;  %13283 = vmatprep.mubr.msk.f32.mxu0 %vm14399_vm1, %v17758_v61 }
 0x47d   :  { %13291 = vmatprep.subr.mxu0 %v17758_v61 }
 0x482   :  { %v2035_v12 = vpop.xlane.xlu1 %2034 }
 0x483   :  { %14124 = vrcp.f32 %v2035_v12 }
 0x486   :  { %v3957_v9 = vpop.permute.xlu1 %3956 }
 0x48a   :  { %v3955_v63 = vpop.permute.xlu1 %3954 }
 0x48d   :  { %v14125_v24 = vpop.eup %14124 }
 0x48e   :  { %v4113_v33 = vpop.permute.xlu1 %4112  ;;  %v2067_v22 = vmul.f32 %v14125_v24, %v15375_v11 }
 0x490   :  { %13199 = vmatmul.mubr.msk.f32.vlgmr.msra.gmra.mrb[54].mxu1 %vm1891_vm3, %v2067_v22 }
 0x491   :  { %13207 = vmatpush3.xpose.msk.msra.mxu1 %vm674_vm2, %v17770_v48  ;;  %13208 = vmatprep.mubr.msk.f32.mxu1 %vm14399_vm1, %v17758_v61 }
 0x492   :  { %v4111_v41 = vpop.permute.xlu1 %4110  ;;  %13216 = vmatprep.subr.mxu1 %v17758_v61 }
 0x494   :  { %13209 = vmatmul.mubr.msk.f32.vlgmr.msra.gmra.mrb[56].mxu1 %vm674_vm2, %v17771_v60 }
 0x495   :  { %13217 = vmatpush3.xpose.msk.msra.mxu1 %vm674_vm2, %v17772_v51  ;;  %13218 = vmatprep.mubr.msk.f32.mxu1 %vm14399_vm1, %v17758_v61 }
 0x496   :  { %13226 = vmatprep.subr.mxu1 %v17758_v61  ;;  %v4269_v11 = vpop.permute.xlu1 %4268 }
 0x498   :  { %13219 = vmatmul.mubr.msk.f32.vlgmr.msra.gmra.mrb[58].mxu1 %vm674_vm2, %v17773_v30 }
 0x499   :  { %13227 = vmatpush3.xpose.msk.msra.mxu1 %vm674_vm2, %v15356_v26  ;;  %13228 = vmatprep.mubr.msk.f32.mxu1 %vm14399_vm1, %v17758_v61 }
 0x49a   :  { %13236 = vmatprep.subr.mxu1 %v17758_v61  ;;  %v4267_v55 = vpop.permute.xlu1 %4266 }
 0x49c   :  { %13229 = vmatmul.mubr.msk.f32.vlgmr.msra.gmra.mrb[60].mxu1 %vm674_vm2, %v15362_v29 }
 0x49d   :  { %13237 = vmatpush3.xpose.msk.msra.mxu1 %vm674_vm2, %v15409_v7  ;;  %13238 = vmatprep.mubr.msk.f32.mxu1 %vm14399_vm1, %v17758_v61 }
 0x49e   :  { %13246 = vmatprep.subr.mxu1 %v17758_v61  ;;  %v4425_v26 = vpop.permute.xlu1 %4424 }
 0x4a0   :  { %13239 = vmatmul.mubr.msk.f32.vlgmr.msra.gmra.mrb[62].mxu1 %vm674_vm2, %v3799_v13 }
 0x4a1   :  { %13247 = vmatpush3.xpose.msk.msra.mxu1 %vm674_vm2, %v3957_v9  ;;  %13248 = vmatprep.mubr.msk.f32.mxu1 %vm14399_vm1, %v17758_v61 }
 0x4a2   :  { %13256 = vmatprep.subr.mxu1 %v17758_v61  ;;  %v4423_v29 = vpop.permute.xlu1 %4422 }
 0x4a4   :  { %13249 = vmatmul.mubr.msk.f32.vlgmr.msra.gmra.mrb[64].mxu1 %vm674_vm2, %v3955_v63 }
 0x4a5   :  { %13257 = vmatpush3.xpose.msk.msra.mxu1 %vm674_vm2, %v4113_v33  ;;  %13258 = vmatprep.mubr.msk.f32.mxu1 %vm14399_vm1, %v17758_v61 }
 0x4a6   :  { %13266 = vmatprep.subr.mxu1 %v17758_v61  ;;  %v4755_v7 = vpop.permute.xlu1 %4754 }
 0x4a8   :  { %13259 = vmatmul.mubr.msk.f32.vlgmr.msra.gmra.mrb[66].mxu1 %vm674_vm2, %v4111_v41 }
 0x4a9   :  { %13267 = vmatpush3.xpose.msk.msra.mxu1 %vm674_vm2, %v4269_v11  ;;  %13268 = vmatprep.mubr.msk.f32.mxu1 %vm14399_vm1, %v17758_v61 }
 0x4aa   :  { %13276 = vmatprep.subr.mxu1 %v17758_v61 }
 0x4ac   :  { %13269 = vmatmul.mubr.msk.f32.vlgmr.msra.gmra.mrb[68].mxu1 %vm674_vm2, %v4267_v55 }
 0x4ad   :  { %13277 = vmatpush3.xpose.msk.msra.mxu1 %vm674_vm2, %v4425_v26  ;;  %13278 = vmatprep.mubr.msk.f32.mxu1 %vm14399_vm1, %v17758_v61 }
 0x4ae   :  { %13286 = vmatprep.subr.mxu1 %v17758_v61 }
 0x4b0   :  { %13279 = vmatmul.mubr.msk.f32.vlgmr.msra.gmra.mrb[70].mxu1 %vm674_vm2, %v4423_v29 }
 0x4b1   :  { %13287 = vmatpush3.msra.mxu1 %v4755_v7  ;;  %13288 = vmatprep.mubr.msk.f32.mxu1 %vm14399_vm1, %v17758_v61 }
 0x4b2   :  { %13296 = vmatprep.subr.mxu1 %v17758_v61 }
 0x4f6   :  { %v2137_v45 = vpop.f32.mrb[40].mxu0 }
 0x4f7   :  { %3236 = vst.msk [vmem:[#allocation2] sm:$0xff] %vm674_vm2, %v2137_v45  ;;  %v13125_v31 = vpop.f32.mrb[41].mxu0 }
 0x4fb   :  { %v2210_v37 = vpop.f32.mrb[40].mxu1 }
 0x4fc   :  { %3237 = vst.msk [vmem:[#allocation2 + $0x8] sm:$0xff] %vm674_vm2, %v2210_v37  ;;  %v13130_v43 = vpop.f32.mrb[41].mxu1 }
 0x4ff   :  { %v2283_v13 = vpop.f32.mrb[42].mxu0 }
 0x500   :  { %3238 = vst.msk [vmem:[#allocation2 + $0x10] sm:$0xff] %vm674_vm2, %v2283_v13  ;;  %v13135_v12 = vpop.f32.mrb[43].mxu0 }
 0x503   :  { %v2356_v9 = vpop.f32.mrb[42].mxu1 }
 0x504   :  { %3239 = vst.msk [vmem:[#allocation2 + $0x18] sm:$0xff] %vm674_vm2, %v2356_v9  ;;  %v13140_v63 = vpop.f32.mrb[43].mxu1 }
 0x507   :  { %v2429_v24 = vpop.f32.mrb[44].mxu0 }
 0x508   :  { %3240 = vst.msk [vmem:[#allocation2 + $0x20] sm:$0xff] %vm674_vm2, %v2429_v24  ;;  %v13145_v33 = vpop.f32.mrb[45].mxu0 }
 0x50b   :  { %v2502_v22 = vpop.f32.mrb[44].mxu1 }
 0x50c   :  { %3241 = vst.msk [vmem:[#allocation2 + $0x28] sm:$0xff] %vm674_vm2, %v2502_v22  ;;  %v13150_v48 = vpop.f32.mrb[45].mxu1 }
 0x50f   :  { %v2575_v41 = vpop.f32.mrb[46].mxu0 }
 0x510   :  { %3242 = vst.msk [vmem:[#allocation2 + $0x30] sm:$0xff] %vm674_vm2, %v2575_v41  ;;  %v13155_v60 = vpop.f32.mrb[47].mxu0 }
 0x513   :  { %v2648_v51 = vpop.f32.mrb[46].mxu1 }
 0x514   :  { %3243 = vst.msk [vmem:[#allocation2 + $0x38] sm:$0xff] %vm674_vm2, %v2648_v51  ;;  %v13160_v11 = vpop.f32.mrb[47].mxu1 }
 0x516   :  { %v2721_v30 = vpop.f32.mrb[48].mxu0 }
 0x517   :  { %3244 = vst.msk [vmem:[#allocation2 + $0x40] sm:$0xff] %vm674_vm2, %v2721_v30  ;;  %v13165_v55 = vpop.f32.mrb[49].mxu0 }
 0x51a   :  { %v2794_v26 = vpop.f32.mrb[48].mxu1 }
 0x51b   :  { %3245 = vst.msk [vmem:[#allocation2 + $0x48] sm:$0xff] %vm674_vm2, %v2794_v26  ;;  %v13170_v29 = vpop.f32.mrb[49].mxu1 }
 0x51e   :  { %v2867_v7 = vpop.f32.mrb[50].mxu0 }
 0x51f   :  { %3246 = vst.msk [vmem:[#allocation2 + $0x50] sm:$0xff] %vm674_vm2, %v2867_v7  ;;  %v13175_v45 = vpop.f32.mrb[51].mxu0 }
 0x522   :  { %v2940_v31 = vpop.f32.mrb[50].mxu1 }
 0x523   :  { %3247 = vst.msk [vmem:[#allocation2 + $0x58] sm:$0xff] %vm674_vm2, %v2940_v31  ;;  %v13180_v37 = vpop.f32.mrb[51].mxu1 }
 0x526   :  { %v3013_v43 = vpop.f32.mrb[52].mxu0 }
 0x527   :  { %3248 = vst.msk [vmem:[#allocation2 + $0x60] sm:$0xff] %vm674_vm2, %v3013_v43  ;;  %v13185_v13 = vpop.f32.mrb[53].mxu0 }
 0x52a   :  { %v3086_v12 = vpop.f32.mrb[52].mxu1 }
 0x52b   :  { %3249 = vst.msk [vmem:[#allocation2 + $0x68] sm:$0xff] %vm674_vm2, %v3086_v12  ;;  %v13190_v9 = vpop.f32.mrb[53].mxu1 }
 0x52e   :  { %v3159_v63 = vpop.f32.mrb[54].mxu0 }
 0x52f   :  { %3250 = vst.msk [vmem:[#allocation2 + $0x70] sm:$0xff] %vm674_vm2, %v3159_v63  ;;  %v13195_v24 = vpop.f32.mrb[55].mxu0 }
 0x532   :  { %v15656_v33 = vpop.f32.mrb[56].mxu0 }
 0x533   :  { %v13205_v22 = vpop.f32.mrb[57].mxu0  ;;  %v4500_v48 = vsel %vm1891_vm3, %v15656_v33, -inf }
 0x534   :  { %4501 = vmax.xlane.f32.xlu0 %v4500_v48 }
 0x536   :  { %v15660_v41 = vpop.f32.mrb[58].mxu0 }
 0x537   :  { %v13215_v60 = vpop.f32.mrb[59].mxu0  ;;  %v4506_v51 = vsel %vm1891_vm3, %v15660_v41, -inf }
 0x538   :  { %4507 = vmax.xlane.f32.xlu0 %v4506_v51 }
 0x53a   :  { %v15664_v11 = vpop.f32.mrb[60].mxu0 }
 0x53b   :  { %v13225_v30 = vpop.f32.mrb[61].mxu0 }
 0x53e   :  { %v15666_v55 = vpop.f32.mrb[62].mxu0 }
 0x53f   :  { %v13235_v26 = vpop.f32.mrb[63].mxu0 }
 0x542   :  { %v15668_v29 = vpop.f32.mrb[64].mxu0 }
 0x543   :  { %v13245_v7 = vpop.f32.mrb[65].mxu0 }
 0x546   :  { %v15670_v45 = vpop.f32.mrb[66].mxu0 }
 0x547   :  { %v13255_v31 = vpop.f32.mrb[67].mxu0 }
 0x54a   :  { %v15672_v37 = vpop.f32.mrb[68].mxu0 }
 0x54b   :  { %v13265_v43 = vpop.f32.mrb[69].mxu0 }
 0x54c   :  { %v4512_v43 = vsel %vm1891_vm3, %v15664_v11, -inf }
 0x54e   :  { %v15674_v13 = vpop.f32.mrb[70].mxu0 }
 0x54f   :  { %v13275_v12 = vpop.f32.mrb[71].mxu0  ;;  %v4542_v16 = vsel %vm1891_vm3, %v15674_v13, -inf }
 0x563   :  { %v3232_v9 = vpop.f32.mrb[54].mxu1 }
 0x564   :  { %3251 = vst.msk [vmem:[#allocation2 + $0x78] sm:$0xff] %vm674_vm2, %v3232_v9  ;;  %v13200_v63 = vpop.f32.mrb[55].mxu1 }
 0x567   :  { %v15677_v24 = vpop.f32.mrb[56].mxu1 }
 0x568   :  { %v13210_v22 = vpop.f32.mrb[57].mxu1  ;;  %v4503_v48 = vsel %vm1891_vm3, %v15677_v24, -inf }
 0x569   :  { %4504 = vmax.xlane.f32.xlu1 %v4503_v48  ;;  %v4518_v22 = vsel %vm1891_vm3, %v15666_v55, -inf }
 0x56b   :  { %v15681_v60 = vpop.f32.mrb[58].mxu1 }
 0x56c   :  { %v13220_v51 = vpop.f32.mrb[59].mxu1  ;;  %v4509_v30 = vsel %vm1891_vm3, %v15681_v60, -inf }
 0x56d   :  { %4510 = vmax.xlane.f32.xlu0 %v4509_v30 }
 0x56f   :  { %v15685_v26 = vpop.f32.mrb[60].mxu1 }
 0x570   :  { %v13230_v7 = vpop.f32.mrb[61].mxu1  ;;  %v4515_v31 = vsel %vm1891_vm3, %v15685_v26, -inf }
 0x571   :  { %4516 = vmax.xlane.f32.xlu1 %v4515_v31  ;;  %4513 = vmax.xlane.f32.xlu0 %v4512_v43  ;;  %v4524_v7 = vsel %vm1891_vm3, %v15668_v29, -inf }
 0x573   :  { %v15691_v12 = vpop.f32.mrb[62].mxu1 }
 0x574   :  { %v13240_v9 = vpop.f32.mrb[63].mxu1  ;;  %v4521_v63 = vsel %vm1891_vm3, %v15691_v12, -inf }
 0x575   :  { %4522 = vmax.xlane.f32.xlu1 %v4521_v63  ;;  %4519 = vmax.xlane.f32.xlu0 %v4518_v22  ;;  %v4530_v63 = vsel %vm1891_vm3, %v15670_v45, -inf }
 0x577   :  { %v15697_v48 = vpop.f32.mrb[64].mxu1 }
 0x578   :  { %v13250_v51 = vpop.f32.mrb[65].mxu1  ;;  %v4527_v30 = vsel %vm1891_vm3, %v15697_v48, -inf }
 0x579   :  { %4528 = vmax.xlane.f32.xlu1 %v4527_v30  ;;  %4525 = vmax.xlane.f32.xlu0 %v4524_v7  ;;  %v4536_v30 = vsel %vm1891_vm3, %v15672_v37, -inf }
 0x57b   :  { %v15703_v31 = vpop.f32.mrb[66].mxu1 }
 0x57c   :  { %v13260_v43 = vpop.f32.mrb[67].mxu1  ;;  %v4533_v9 = vsel %vm1891_vm3, %v15703_v31, -inf }
 0x57d   :  { %4534 = vmax.xlane.f32.xlu1 %v4533_v9  ;;  %4531 = vmax.xlane.f32.xlu0 %v4530_v63  ;;  %v15719_v9 = vpop.permute.xlu0 %4831 }
 0x57f   :  { %v15709_v22 = vpop.f32.mrb[68].mxu1 }
 0x580   :  { %v13270_v51 = vpop.f32.mrb[69].mxu1  ;;  %v4539_v10 = vsel %vm1891_vm3, %v15709_v22, -inf }
 0x581   :  { %4540 = vmax.xlane.f32.xlu1 %v4539_v10  ;;  %4537 = vmax.xlane.f32.xlu0 %v4536_v30  ;;  %v15721_v63 = vpop.permute.xlu0 %4985  ;;  %v17774_v51 = vld [vmem:[#allocation16_spill] sm:$0xff]  ;;  %v17778_v30 = vld [vmem:[#allocation14_spill] sm:$0xff] }
 0x583   :  { %v15715_v7 = vpop.f32.mrb[70].mxu1 }
 0x584   :  { %v13280_v43 = vpop.f32.mrb[71].mxu1 }
 0x585   :  { %4543 = vmax.xlane.f32.xlu0 %v4542_v16  ;;  %v15725_v1 = vpop.permute.xlu0 %5293  ;;  %v17780_v16 = vld [vmem:[#allocation15_spill] sm:$0xff] }
 0x586   :  { %17775 = vst [vmem:[#allocation7_spill] sm:$0xff] %v15725_v1  ;;  %v15743_v1 = vpop.permute.xlu1 %4908 }
 0x587   :  { %17784 = vst [vmem:[#allocation29_spill] sm:$0xff] %v15743_v1 }
 0x589   :  { %v15729_v10 = vpop.permute.xlu0 %5447 }
 0x58a   :  { %17777 = vst [vmem:[#allocation6_spill] sm:$0xff] %v15729_v10  ;;  %v15747_v10 = vpop.permute.xlu1 %5062 }
 0x58b   :  { %17786 = vst [vmem:[#allocation33_spill] sm:$0xff] %v15747_v10 }
 0x58d   :  { %v15733_v43 = vpop.permute.xlu0 %5601 }
 0x58e   :  { %17779 = vst [vmem:[#allocation12_spill] sm:$0xff] %v15733_v43 }
 0x591   :  { %v15739_v49 = vpop.permute.xlu0 %5755 }
 0x592   :  { %6381 = vrot.lane.b32.xlu1 %v17774_v51, %s14401_s4  ;;  %17782 = vst [vmem:[#allocation11_spill] sm:$0xff] %v15739_v49 }
 0x595   :  { %v15741_v25 = vpop.permute.xlu0 %5991 }
 0x596   :  { %6379 = vrot.lane.b32.xlu1 %v17776_v35, %s14401_s4  ;;  %17783 = vst [vmem:[#allocation31_spill] sm:$0xff] %v15741_v25 }
 0x599   :  { %v15745_v21 = vpop.permute.xlu0 %5989 }
 0x59a   :  { %17785 = vst [vmem:[#allocation35_spill] sm:$0xff] %v15745_v21 }
 0x59b   :  { %6303 = vrot.lane.b32.xlu0 %v17778_v30, %s14401_s4  ;;  %v4545_v30 = vsel %vm1891_vm3, %v15715_v7, -inf }
 0x59d   :  { %v15749_v58 = vpop.permute.xlu0 %6147 }
 0x59e   :  { %17787 = vst [vmem:[#allocation32_spill] sm:$0xff] %v15749_v58 }
 0x59f   :  { %6301 = vrot.lane.b32.xlu0 %v17780_v16, %s14401_s4  ;;  %v15753_v16 = vpop.permute.xlu1 %5139 }
 0x5a0   :  { %17788 = vst [vmem:[#allocation30_spill] sm:$0xff] %v15753_v16 }
 0x5a1   :  { %v15755_v43 = vpop.permute.xlu0 %6145 }
 0x5a2   :  { %17789 = vst [vmem:[#allocation36_spill] sm:$0xff] %v15755_v43 }
 0x5a3   :  { %6459 = vrot.lane.b32.xlu0 %v17781_v44, %s14401_s4  ;;  %v15757_v49 = vpop.permute.xlu1 %5216 }
 0x5a4   :  { %17790 = vst [vmem:[#allocation34_spill] sm:$0xff] %v15757_v49 }
 0x5a7   :  { %v15761_v10 = vpop.permute.xlu1 %5370 }
 0x5a8   :  { %17791 = vst [vmem:[#allocation16_spill] sm:$0xff] %v15761_v10 }
 0x5ab   :  { %v15765_v16 = vpop.permute.xlu1 %5524 }
 0x5ac   :  { %17793 = vst [vmem:[#allocation37_spill] sm:$0xff] %v15765_v16 }
 0x5ba   :  { %4546 = vmax.xlane.f32.xlu1 %v4545_v30  ;;  %v17792_v30 = vld [vmem:[#allocation23_spill] sm:$0xff] }
 0x5c1   :  { %v4502_v44 = vpop.xlane.xlu0 %4501 }
 0x5c2   :  { %v4548_v25 = vsub.f32 %v15656_v33, %v4502_v44 }
 0x5c4   :  { %v4564_v1 = vmul.f32 1.442695, %v4548_v25 }
 0x5c5   :  { %v4508_v32 = vpop.xlane.xlu0 %4507 }
 0x5c6   :  { %14126 = vpow2.f32 %v4564_v1  ;;  %v4550_v21 = vsub.f32 %v15660_v41, %v4508_v32  ;;  %v15773_v1 = vpop.permute.xlu1 %5678 }
 0x5c7   :  { %17794 = vst [vmem:[#allocation38_spill] sm:$0xff] %v15773_v1 }
 0x5c8   :  { %v4568_v58 = vmul.f32 1.442695, %v4550_v21 }
 0x5ca   :  { %14128 = vpow2.f32 %v4568_v58  ;;  %v15777_v58 = vpop.permute.xlu1 %5832 }
 0x5cb   :  { %6537 = vrot.lane.b32.xlu1 %v17792_v30, %s14401_s4  ;;  %17795 = vst [vmem:[#allocation39_spill] sm:$0xff] %v15777_v58 }
 0x5ce   :  { %v15779_v21 = vpop.permute.xlu1 %6069 }
 0x5cf   :  { %17796 = vst [vmem:[#allocation40_spill] sm:$0xff] %v15779_v21 }
 0x5d0   :  { %v15767_v43 = vpop.eup %14126 }
 0x5d1   :  { %v4596_v49 = vsel %vm1891_vm3, %v15767_v43, 0.0 }
 0x5d2   :  { %4597 = vadd.xlane.f32.xlu0 %v4596_v49  ;;  %v15781_v44 = vpop.permute.xlu1 %6067 }
 0x5d3   :  { %17797 = vst [vmem:[#allocation41_spill] sm:$0xff] %v15781_v44 }
 0x5d4   :  { %v15771_v25 = vpop.eup %14128 }
 0x5d5   :  { %v4602_v32 = vsel %vm1891_vm3, %v15771_v25, 0.0 }
 0x5d6   :  { %4603 = vadd.xlane.f32.xlu0 %v4602_v32  ;;  %v15783_v33 = vpop.permute.xlu1 %6225 }
 0x5d7   :  { %17798 = vst [vmem:[#allocation42_spill] sm:$0xff] %v15783_v33 }
 0x5da   :  { %v15785_v41 = vpop.permute.xlu1 %6223 }
 0x5db   :  { %17799 = vst [vmem:[#allocation43_spill] sm:$0xff] %v15785_v41 }
 0x5f6   :  { %v4505_v30 = vpop.xlane.xlu1 %4504 }
 0x5f7   :  { %v4549_v49 = vsub.f32 %v15677_v24, %v4505_v30 }
 0x5f9   :  { %v4566_v16 = vmul.f32 1.442695, %v4549_v49 }
 0x5fa   :  { %v4511_v10 = vpop.xlane.xlu0 %4510 }
 0x5fb   :  { %14130 = vpow2.f32 %v4566_v16  ;;  %v4551_v1 = vsub.f32 %v15681_v60, %v4511_v10 }
 0x5fd   :  { %v4570_v53 = vmul.f32 1.442695, %v4551_v1 }
 0x5fe   :  { %v4517_v32 = vpop.xlane.xlu1 %4516  ;;  %v4514_v35 = vpop.xlane.xlu0 %4513 }
 0x5ff   :  { %14132 = vpow2.f32 %v4570_v53  ;;  %v4553_v21 = vsub.f32 %v15685_v26, %v4517_v32  ;;  %v4552_v44 = vsub.f32 %v15664_v11, %v4514_v35 }
 0x601   :  { %v4574_v58 = vmul.f32 1.442695, %v4553_v21  ;;  %v4572_v33 = vmul.f32 1.442695, %v4552_v44 }
 0x602   :  { %v4523_v14 = vpop.xlane.xlu1 %4522  ;;  %v4520_v41 = vpop.xlane.xlu0 %4519 }
 0x603   :  { %14134 = vpow2.f32 %v4574_v58  ;;  %v4555_v24 = vsub.f32 %v15691_v12, %v4523_v14  ;;  %v4554_v30 = vsub.f32 %v15666_v55, %v4520_v41 }
 0x604   :  { %14136 = vpow2.f32 %v4572_v33 }
 0x605   :  { %v15793_v16 = vpop.eup %14130  ;;  %v4578_v60 = vmul.f32 1.442695, %v4555_v24  ;;  %v4576_v10 = vmul.f32 1.442695, %v4554_v30 }
 0x606   :  { %v4529_v1 = vpop.xlane.xlu1 %4528  ;;  %v4526_v53 = vpop.xlane.xlu0 %4525  ;;  %v4599_v26 = vsel %vm1891_vm3, %v15793_v16, 0.0 }
 0x607   :  { %14138 = vpow2.f32 %v4578_v60  ;;  %v4557_v35 = vsub.f32 %v15697_v48, %v4529_v1  ;;  %v4556_v11 = vsub.f32 %v15668_v29, %v4526_v53  ;;  %4600 = vadd.xlane.f32.xlu1 %v4599_v26 }
 0x608   :  { %14140 = vpow2.f32 %v4576_v10 }
 0x609   :  { %v15799_v14 = vpop.eup %14132  ;;  %v4582_v55 = vmul.f32 1.442695, %v4557_v35  ;;  %v4580_v12 = vmul.f32 1.442695, %v4556_v11 }
 0x60a   :  { %v4535_v58 = vpop.xlane.xlu1 %4534  ;;  %v4532_v21 = vpop.xlane.xlu0 %4531  ;;  %v4605_v44 = vsel %vm1891_vm3, %v15799_v14, 0.0 }
 0x60b   :  { %14142 = vpow2.f32 %v4582_v55  ;;  %v4559_v33 = vsub.f32 %v15703_v31, %v4535_v58  ;;  %v4558_v41 = vsub.f32 %v15670_v45, %v4532_v21  ;;  %4606 = vadd.xlane.f32.xlu1 %v4605_v44 }
 0x60c   :  { %14144 = vpow2.f32 %v4580_v12 }
 0x60d   :  { %v15805_v48 = vpop.eup %14134  ;;  %v4586_v29 = vmul.f32 1.442695, %v4559_v33  ;;  %v4584_v49 = vmul.f32 1.442695, %v4558_v41 }
 0x60e   :  { %v15807_v32 = vpop.eup %14136  ;;  %v4541_v24 = vpop.xlane.xlu1 %4540  ;;  %v4611_v60 = vsel %vm1891_vm3, %v15805_v48, 0.0 }
 0x60f   :  { %v4538_v30 = vpop.xlane.xlu0 %4537  ;;  %14146 = vpow2.f32 %v4586_v29  ;;  %v4561_v10 = vsub.f32 %v15709_v22, %v4541_v24  ;;  %4612 = vadd.xlane.f32.xlu1 %v4611_v60  ;;  %v4608_v45 = vsel %vm1891_vm3, %v15807_v32, 0.0 }
 0x610   :  { %v4560_v31 = vsub.f32 %v15672_v37, %v4538_v30  ;;  %14148 = vpow2.f32 %v4584_v49  ;;  %4609 = vadd.xlane.f32.xlu0 %v4608_v45 }
 0x611   :  { %v15815_v1 = vpop.eup %14138  ;;  %v4590_v53 = vmul.f32 1.442695, %v4561_v10 }
 0x612   :  { %v4588_v26 = vmul.f32 1.442695, %v4560_v31  ;;  %v15817_v35 = vpop.eup %14140  ;;  %v4617_v55 = vsel %vm1891_vm3, %v15815_v1, 0.0 }
 0x613   :  { %v4544_v11 = vpop.xlane.xlu0 %4543  ;;  %14150 = vpow2.f32 %v4590_v53  ;;  %4618 = vadd.xlane.f32.xlu1 %v4617_v55  ;;  %v4614_v37 = vsel %vm1891_vm3, %v15817_v35, 0.0  ;;  %v15858_v53 = vpop.permute.xlu1 %6381 }
 0x614   :  { %v4562_v22 = vsub.f32 %v15674_v13, %v4544_v11  ;;  %14152 = vpow2.f32 %v4588_v26  ;;  %4615 = vadd.xlane.f32.xlu0 %v4614_v37 }
 0x615   :  { %v15824_v12 = vpop.eup %14142 }
 0x616   :  { %v4592_v58 = vmul.f32 1.442695, %v4562_v22  ;;  %v15826_v21 = vpop.eup %14144  ;;  %v4623_v44 = vsel %vm1891_vm3, %v15824_v12, 0.0 }
 0x617   :  { %4624 = vadd.xlane.f32.xlu1 %v4623_v44  ;;  %v4620_v33 = vsel %vm1891_vm3, %v15826_v21, 0.0  ;;  %v15862_v26 = vpop.permute.xlu1 %6379  ;;  %v15871_v37 = vpop.permute.xlu0 %6303 }
 0x618   :  { %14154 = vpow2.f32 %v4592_v58  ;;  %4621 = vadd.xlane.f32.xlu0 %v4620_v33 }
 0x619   :  { %v15832_v13 = vpop.eup %14146 }
 0x61a   :  { %v15834_v41 = vpop.eup %14148  ;;  %v4629_v29 = vsel %vm1891_vm3, %v15832_v13, 0.0 }
 0x61b   :  { %4630 = vadd.xlane.f32.xlu1 %v4629_v29  ;;  %v4626_v49 = vsel %vm1891_vm3, %v15834_v41, 0.0  ;;  %v15877_v58 = vpop.permute.xlu0 %6301 }
 0x61c   :  { %4627 = vadd.xlane.f32.xlu0 %v4626_v49 }
 0x61d   :  { %v15840_v24 = vpop.eup %14150 }
 0x61e   :  { %v15842_v30 = vpop.eup %14152  ;;  %v4635_v60 = vsel %vm1891_vm3, %v15840_v24, 0.0 }
 0x61f   :  { %4636 = vadd.xlane.f32.xlu1 %v4635_v60  ;;  %v4632_v10 = vsel %vm1891_vm3, %v15842_v30, 0.0  ;;  %v15885_v33 = vpop.permute.xlu0 %6459 }
 0x620   :  { %4633 = vadd.xlane.f32.xlu0 %v4632_v10 }
 0x622   :  { %v15848_v31 = vpop.eup %14154 }
 0x623   :  { %v4638_v45 = vsel %vm1891_vm3, %v15848_v31, 0.0 }
 0x624   :  { %4639 = vadd.xlane.f32.xlu1 %v4638_v45 }
 0x635   :  { %6535 = vrot.lane.b32.xlu1 %v15059_v38, %s14401_s4 }
 0x639   :  { %6693 = vrot.lane.b32.xlu1 %v15079_v50, %s14401_s4 }
 0x63d   :  { %6691 = vrot.lane.b32.xlu1 %v15088_v56, %s14401_s4 }
 0x641   :  { %6849 = vrot.lane.b32.xlu1 %v15105_v18, %s14401_s4 }
 0x645   :  { %6847 = vrot.lane.b32.xlu1 %v15114_v19, %s14401_s4 }
 0x647   :  { %v4547_v11 = vpop.xlane.xlu1 %4546 }
 0x648   :  { %v4563_v55 = vsub.f32 %v15715_v7, %v4547_v11 }
 0x649   :  { %7005 = vrot.lane.b32.xlu1 %v15131_v27, %s14401_s4 }
 0x64a   :  { %v4594_v22 = vmul.f32 1.442695, %v4563_v55 }
 0x64c   :  { %14156 = vpow2.f32 %v4594_v22  ;;  %v17805_v22 = vld [vmem:[#allocation17_spill] sm:$0xff] }
 0x64d   :  { %7003 = vrot.lane.b32.xlu1 %v15140_v28, %s14401_s4 }
 0x651   :  { %7161 = vrot.lane.b32.xlu1 %v15164_v6, %s14401_s4 }
 0x655   :  { %7159 = vrot.lane.b32.xlu1 %v15156_v4, %s14401_s4 }
 0x656   :  { %v15879_v44 = vpop.eup %14156 }
 0x657   :  { %v4641_v7 = vsel %vm1891_vm3, %v15879_v44, 0.0 }
 0x658   :  { %4642 = vadd.xlane.f32.xlu0 %v4641_v7 }
 0x659   :  { %7489 = vrot.lane.b32.xlu1 %v15176_v5, %s14401_s4 }
 0x65d   :  { %7641 = vrot.lane.b32.xlu1 %v14938_v47, %s14401_s4 }
 0x65f   :  { %v4598_v29 = vpop.xlane.xlu0 %4597 }
 0x660   :  { %14158 = vrcp.f32 %v4598_v29 }
 0x661   :  { %7793 = vrot.lane.b32.xlu1 %v14957_v52, %s14401_s4 }
 0x663   :  { %v4604_v49 = vpop.xlane.xlu0 %4603 }
 0x664   :  { %14160 = vrcp.f32 %v4604_v49 }
 0x665   :  { %7869 = vrot.lane.b32.xlu1 %v14987_v17, %s14401_s4 }
 0x669   :  { %7945 = vrot.lane.b32.xlu1 %v14977_v40, %s14401_s4 }
 0x66a   :  { %v14159_v60 = vpop.eup %14158 }
 0x66b   :  { %v4645_v10 = vmul.f32 %v14159_v60, %v15767_v43 }
 0x66d   :  { %8097 = vrot.lane.b32.xlu1 %v14995_v8, %s14401_s4  ;;  %13284 = vmatmul.mubr.msk.f32.vlgmr.msra.gmra.mrb[72].mxu0 %vm1891_vm3, %v4645_v10  ;;  %v17806_v10 = vld [vmem:[#allocation21_spill] sm:$0xff] }
 0x66e   :  { %v14161_v45 = vpop.eup %14160  ;;  %13292 = vmatpush3.msra.mxu0 %v15719_v9  ;;  %6457 = vrot.lane.b32.xlu0 %v15040_v46, %s14401_s4  ;;  %v17801_v9 = vld [vmem:[#allocation19_spill] sm:$0xff] }
 0x66f   :  { %13293 = vmatprep.mubr.msk.f32.mxu0 %vm14399_vm1, %v17758_v61  ;;  %13301 = vmatprep.subr.mxu0 %v17758_v61  ;;  %v4649_v11 = vmul.f32 %v14161_v45, %v15771_v25 }
 0x671   :  { %8249 = vrot.lane.b32.xlu1 %v17759_v20, %s14401_s4  ;;  %13294 = vmatmul.mubr.msk.f32.vlgmr.msra.gmra.mrb[74].mxu0 %vm1891_vm3, %v4649_v11  ;;  %v17807_v11 = vld [vmem:[#allocation29_spill] sm:$0xff] }
 0x672   :  { %13302 = vmatpush3.msra.mxu0 %v15721_v63  ;;  %6615 = vrot.lane.b32.xlu0 %v15062_v42, %s14401_s4 }
 0x673   :  { %13303 = vmatprep.mubr.msk.f32.mxu0 %vm14399_vm1, %v17758_v61  ;;  %13311 = vmatprep.subr.mxu0 %v17758_v61 }
 0x675   :  { %8401 = vrot.lane.b32.xlu1 %v17760_v54, %s14401_s4 }
 0x676   :  { %6613 = vrot.lane.b32.xlu0 %v15073_v15, %s14401_s4 }
 0x679   :  { %8553 = vrot.lane.b32.xlu1 %v17761_v57, %s14401_s4 }
 0x67a   :  { %6771 = vrot.lane.b32.xlu0 %v15092_v59, %s14401_s4 }
 0x67d   :  { %8790 = vrot.lane.b32.xlu1 %v17762_v23, %s14402_s21  ;;  %v17800_v23 = vld [vmem:[#allocation27_spill] sm:$0xff] }
 0x67e   :  { %6769 = vrot.lane.b32.xlu0 %v15101_v62, %s14401_s4 }
 0x681   :  { %8788 = vrot.lane.b32.xlu1 %v17763_v2, %s14402_s21  ;;  %v15943_v2 = vpop.permute.xlu1 %6537 }
 0x682   :  { %6927 = vrot.lane.b32.xlu0 %v15118_v0, %s14401_s4 }
 0x685   :  { %8946 = vrot.lane.b32.xlu1 %v17764_v36, %s14402_s21  ;;  %v17802_v36 = vld [vmem:[#allocation28_spill] sm:$0xff] }
 0x686   :  { %6925 = vrot.lane.b32.xlu0 %v15127_v3, %s14401_s4 }
 0x689   :  { %8944 = vrot.lane.b32.xlu1 %v17765_v39, %s14402_s21  ;;  %v17803_v39 = vld [vmem:[#allocation10_spill] sm:$0xff] }
 0x68a   :  { %7083 = vrot.lane.b32.xlu0 %v15144_v34, %s14401_s4 }
 0x68d   :  { %9102 = vrot.lane.b32.xlu1 %v17774_v51, %s14402_s21  ;;  %v17804_v51 = vld [vmem:[#allocation13_spill] sm:$0xff] }
 0x68e   :  { %7081 = vrot.lane.b32.xlu0 %v17800_v23, %s14401_s4 }
 0x691   :  { %9100 = vrot.lane.b32.xlu1 %v17801_v9, %s14402_s21 }
 0x692   :  { %7413 = vrot.lane.b32.xlu0 %v17802_v36, %s14401_s4 }
 0x694   :  { %v4601_v63 = vpop.xlane.xlu1 %4600 }
 0x695   :  { %14162 = vrcp.f32 %v4601_v63 }
 0x696   :  { %7565 = vrot.lane.b32.xlu0 %v17803_v39, %s14401_s4 }
 0x698   :  { %v4607_v43 = vpop.xlane.xlu1 %4606 }
 0x699   :  { %14164 = vrcp.f32 %v4607_v43  ;;  %v17808_v43 = vld [vmem:[#allocation24_spill] sm:$0xff] }
 0x69a   :  { %7717 = vrot.lane.b32.xlu0 %v17804_v51, %s14401_s4 }
 0x69c   :  { %v4613_v25 = vpop.xlane.xlu1 %4612 }
 0x69d   :  { %14166 = vrcp.f32 %v4613_v25  ;;  %v4610_v55 = vpop.xlane.xlu0 %4609 }
 0x69e   :  { %14168 = vrcp.f32 %v4610_v55  ;;  %8021 = vrot.lane.b32.xlu0 %v17805_v22, %s14401_s4  ;;  %v17809_v55 = vld [vmem:[#allocation33_spill] sm:$0xff] }
 0x69f   :  { %v14163_v7 = vpop.eup %14162 }
 0x6a0   :  { %v4619_v29 = vpop.xlane.xlu1 %4618  ;;  %v4647_v49 = vmul.f32 %v14163_v7, %v15793_v16 }
 0x6a1   :  { %14170 = vrcp.f32 %v4619_v29  ;;  %v4616_v60 = vpop.xlane.xlu0 %4615 }
 0x6a2   :  { %14172 = vrcp.f32 %v4616_v60  ;;  %13289 = vmatmul.mubr.msk.f32.vlgmr.msra.gmra.mrb[72].mxu1 %vm1891_vm3, %v4647_v49  ;;  %8173 = vrot.lane.b32.xlu0 %v17806_v10, %s14401_s4 }
 0x6a3   :  { %v14165_v45 = vpop.eup %14164  ;;  %13297 = vmatpush3.msra.mxu1 %v17807_v11  ;;  %13298 = vmatprep.mubr.msk.f32.mxu1 %vm14399_vm1, %v17758_v61 }
 0x6a4   :  { %v4625_v9 = vpop.xlane.xlu1 %4624  ;;  %13306 = vmatprep.subr.mxu1 %v17758_v61  ;;  %v4651_v63 = vmul.f32 %v14165_v45, %v15799_v14  ;;  %v17810_v45 = vld [vmem:[#allocation26_spill] sm:$0xff] }
 0x6a5   :  { %14174 = vrcp.f32 %v4625_v9  ;;  %v4622_v16 = vpop.xlane.xlu0 %4621  ;;  %v17811_v9 = vld [vmem:[#allocation34_spill] sm:$0xff] }
 0x6a6   :  { %14176 = vrcp.f32 %v4622_v16  ;;  %13299 = vmatmul.mubr.msk.f32.vlgmr.msra.gmra.mrb[74].mxu1 %vm1891_vm3, %v4651_v63  ;;  %8325 = vrot.lane.b32.xlu0 %v17808_v43, %s14401_s4  ;;  %v17812_v16 = vld [vmem:[#allocation30_spill] sm:$0xff] }
 0x6a7   :  { %v14167_v25 = vpop.eup %14166  ;;  %13307 = vmatpush3.msra.mxu1 %v17809_v55  ;;  %13308 = vmatprep.mubr.msk.f32.mxu1 %vm14399_vm1, %v17758_v61 }
 0x6a8   :  { %v14169_v7 = vpop.eup %14168  ;;  %v4631_v29 = vpop.xlane.xlu1 %4630  ;;  %13316 = vmatprep.subr.mxu1 %v17758_v61  ;;  %v4655_v14 = vmul.f32 %v14167_v25, %v15805_v48 }
 0x6a9   :  { %14178 = vrcp.f32 %v4631_v29  ;;  %v4628_v49 = vpop.xlane.xlu0 %4627  ;;  %v4653_v60 = vmul.f32 %v14169_v7, %v15807_v32  ;;  %v17813_v29 = vld [vmem:[#allocation16_spill] sm:$0xff] }
 0x6aa   :  { %14180 = vrcp.f32 %v4628_v49  ;;  %13309 = vmatmul.mubr.msk.f32.vlgmr.msra.gmra.mrb[76].mxu1 %vm1891_vm3, %v4655_v14  ;;  %8477 = vrot.lane.b32.xlu0 %v17810_v45, %s14401_s4  ;;  %v17814_v14 = vld [vmem:[#allocation5_spill] sm:$0xff] }
 0x6ab   :  { %v14171_v11 = vpop.eup %14170  ;;  %13317 = vmatpush3.msra.mxu1 %v17811_v9  ;;  %13304 = vmatmul.mubr.msk.f32.vlgmr.msra.gmra.mrb[76].mxu0 %vm1891_vm3, %v4653_v60  ;;  %v17815_v60 = vld [vmem:[#allocation7_spill] sm:$0xff] }
 0x6ac   :  { %v14173_v63 = vpop.eup %14172  ;;  %13312 = vmatpush3.msra.mxu0 %v17812_v16  ;;  %v4637_v55 = vpop.xlane.xlu1 %4636  ;;  %13313 = vmatprep.mubr.msk.f32.mxu0 %vm14399_vm1, %v17758_v61  ;;  %v4659_v48 = vmul.f32 %v14171_v11, %v15815_v1 }
 0x6ad   :  { %14182 = vrcp.f32 %v4637_v55  ;;  %v4634_v32 = vpop.xlane.xlu0 %4633  ;;  %13318 = vmatprep.mubr.msk.f32.mxu1 %vm14399_vm1, %v17758_v61  ;;  %13321 = vmatprep.subr.mxu0 %v17758_v61  ;;  %v4657_v25 = vmul.f32 %v14173_v63, %v15817_v35  ;;  %v17816_v63 = vld [vmem:[#allocation4_spill] sm:$0xff] }
 0x6ae   :  { %14184 = vrcp.f32 %v4634_v32  ;;  %13326 = vmatprep.subr.mxu1 %v17758_v61  ;;  %13319 = vmatmul.mubr.msk.f32.vlgmr.msra.gmra.mrb[78].mxu1 %vm1891_vm3, %v4659_v48  ;;  %v17818_v48 = vld [vmem:[#allocation6_spill] sm:$0xff] }
 0x6af   :  { %v14175_v7 = vpop.eup %14174  ;;  %13327 = vmatpush3.msra.mxu1 %v17813_v29  ;;  %8712 = vrot.lane.b32.xlu0 %v17814_v14, %s14402_s21  ;;  %v17821_v14 = vld [vmem:[#allocation12_spill] sm:$0xff] }
 0x6b0   :  { %v14177_v1 = vpop.eup %14176  ;;  %13314 = vmatmul.mubr.msk.f32.vlgmr.msra.gmra.mrb[78].mxu0 %vm1891_vm3, %v4657_v25  ;;  %13328 = vmatprep.mubr.msk.f32.mxu1 %vm14399_vm1, %v17758_v61  ;;  %v4663_v35 = vmul.f32 %v14175_v7, %v15824_v12  ;;  %v17817_v12 = vld [vmem:[#allocation37_spill] sm:$0xff]  ;;  %v17819_v7 = vld [vmem:[#allocation38_spill] sm:$0xff] }
 0x6b1   :  { %v4640_v49 = vpop.xlane.xlu1 %4639  ;;  %13322 = vmatpush3.msra.mxu0 %v17815_v60  ;;  %13323 = vmatprep.mubr.msk.f32.mxu0 %vm14399_vm1, %v17758_v61  ;;  %v4661_v11 = vmul.f32 %v14177_v1, %v15826_v21  ;;  %v17825_v60 = vld [vmem:[#allocation14_spill] sm:$0xff] }
 0x6b2   :  { %14186 = vrcp.f32 %v4640_v49  ;;  %13331 = vmatprep.subr.mxu0 %v17758_v61  ;;  %13336 = vmatprep.subr.mxu1 %v17758_v61  ;;  %v17823_v49 = vld [vmem:[#allocation39_spill] sm:$0xff] }
 0x6b3   :  { %v14179_v9 = vpop.eup %14178  ;;  %13329 = vmatmul.mubr.msk.f32.vlgmr.msra.gmra.mrb[80].mxu1 %vm1891_vm3, %v4663_v35  ;;  %8710 = vrot.lane.b32.xlu0 %v17816_v63, %s14402_s21  ;;  %v17824_v35 = vld [vmem:[#allocation11_spill] sm:$0xff]  ;;  %v17829_v63 = vld [vmem:[#allocation32_spill] sm:$0xff] }
 0x6b4   :  { %v14181_v16 = vpop.eup %14180  ;;  %13337 = vmatpush3.msra.mxu1 %v17817_v12  ;;  %13324 = vmatmul.mubr.msk.f32.vlgmr.msra.gmra.mrb[80].mxu0 %vm1891_vm3, %v4661_v11  ;;  %v4667_v55 = vmul.f32 %v14179_v9, %v15832_v13  ;;  %v17820_v13 = vld [vmem:[#allocation9_spill] sm:$0xff]  ;;  %v17827_v11 = vld [vmem:[#allocation31_spill] sm:$0xff] }
 0x6b5   :  { %13332 = vmatpush3.msra.mxu0 %v17818_v48  ;;  %13333 = vmatprep.mubr.msk.f32.mxu0 %vm14399_vm1, %v17758_v61  ;;  %v4665_v21 = vmul.f32 %v14181_v16, %v15834_v41  ;;  %v17828_v9 = vld [vmem:[#allocation35_spill] sm:$0xff]  ;;  %v17830_v16 = vld [vmem:[#allocation36_spill] sm:$0xff]  ;;  %v6536_v12 = vpop.permute.xlu1 %6535 }
 0x6b6   :  { %13338 = vmatprep.mubr.msk.f32.mxu1 %vm14399_vm1, %v17758_v61  ;;  %13341 = vmatprep.subr.mxu0 %v17758_v61 }
 0x6b7   :  { %v14183_v32 = vpop.eup %14182  ;;  %13346 = vmatprep.subr.mxu1 %v17758_v61  ;;  %13339 = vmatmul.mubr.msk.f32.vlgmr.msra.gmra.mrb[82].mxu1 %vm1891_vm3, %v4667_v55 }
 0x6b8   :  { %v14185_v25 = vpop.eup %14184  ;;  %13347 = vmatpush3.msra.mxu1 %v17819_v7  ;;  %8868 = vrot.lane.b32.xlu0 %v17820_v13, %s14402_s21  ;;  %v4671_v29 = vmul.f32 %v14183_v32, %v15840_v24  ;;  %v17822_v24 = vld [vmem:[#allocation8_spill] sm:$0xff] }
 0x6b9   :  { %13334 = vmatmul.mubr.msk.f32.vlgmr.msra.gmra.mrb[82].mxu0 %vm1891_vm3, %v4665_v21  ;;  %13348 = vmatprep.mubr.msk.f32.mxu1 %vm14399_vm1, %v17758_v61  ;;  %v4669_v41 = vmul.f32 %v14185_v25, %v15842_v30  ;;  %v6694_v55 = vpop.permute.xlu1 %6693  ;;  %v17831_v13 = vld [vmem:[#allocation40_spill] sm:$0xff] }
 0x6ba   :  { %13342 = vmatpush3.msra.mxu0 %v17821_v14  ;;  %13343 = vmatprep.mubr.msk.f32.mxu0 %vm14399_vm1, %v17758_v61  ;;  %v17833_v14 = vld [vmem:[#allocation42_spill] sm:$0xff] }
 0x6bb   :  { %13351 = vmatprep.subr.mxu0 %v17758_v61  ;;  %13356 = vmatprep.subr.mxu1 %v17758_v61 }
 0x6bc   :  { %v14187_v1 = vpop.eup %14186  ;;  %13349 = vmatmul.mubr.msk.f32.vlgmr.msra.gmra.mrb[84].mxu1 %vm1891_vm3, %v4671_v29  ;;  %8866 = vrot.lane.b32.xlu0 %v17822_v24, %s14402_s21 }
 0x6bd   :  { %13357 = vmatpush3.msra.mxu1 %v17823_v49  ;;  %13344 = vmatmul.mubr.msk.f32.vlgmr.msra.gmra.mrb[84].mxu0 %vm1891_vm3, %v4669_v41  ;;  %v4673_v30 = vmul.f32 %v14187_v1, %v15848_v31  ;;  %v17826_v31 = vld [vmem:[#allocation15_spill] sm:$0xff] }
 0x6be   :  { %13352 = vmatpush3.msra.mxu0 %v17824_v35  ;;  %13353 = vmatprep.mubr.msk.f32.mxu0 %vm14399_vm1, %v17758_v61  ;;  %v17834_v49 = vld [vmem:[#allocation43_spill] sm:$0xff] }
 0x6bf   :  { %13361 = vmatprep.subr.mxu0 %v17758_v61  ;;  %13358 = vmatprep.mubr.msk.f32.mxu1 %vm14399_vm1, %v17758_v61 }
 0x6c0   :  { %9024 = vrot.lane.b32.xlu0 %v17825_v60, %s14402_s21  ;;  %13366 = vmatprep.subr.mxu1 %v17758_v61 }
 0x6c1   :  { %13354 = vmatmul.mubr.msk.f32.vlgmr.msra.gmra.mrb[86].mxu0 %vm1891_vm3, %v4673_v30 }
 0x6c2   :  { %13363 = vmatprep.mubr.msk.f32.mxu0 %vm14399_vm1, %v17758_v61 }
 0x6c4   :  { %9022 = vrot.lane.b32.xlu0 %v17826_v31, %s14402_s21 }
 0x6c5   :  { %13362 = vmatpush3.xpose.msk.msra.mxu0 %vm674_vm2, %v17827_v11 }
 0x6c6   :  { %13371 = vmatprep.subr.mxu0 %v17758_v61 }
 0x6c8   :  { %13364 = vmatmul.mubr.msk.f32.vlgmr.msra.gmra.mrb[88].mxu0 %vm674_vm2, %v17828_v9 }
 0x6c9   :  { %13372 = vmatpush3.xpose.msk.msra.mxu0 %vm674_vm2, %v17829_v63  ;;  %13373 = vmatprep.mubr.msk.f32.mxu0 %vm14399_vm1, %v17758_v61 }
 0x6ca   :  { %13381 = vmatprep.subr.mxu0 %v17758_v61 }
 0x6cc   :  { %13374 = vmatmul.mubr.msk.f32.vlgmr.msra.gmra.mrb[90].mxu0 %vm674_vm2, %v17830_v16 }
 0x6cd   :  { %13382 = vmatpush3.xpose.msk.msra.mxu0 %vm674_vm2, %v15871_v37  ;;  %13383 = vmatprep.mubr.msk.f32.mxu0 %vm14399_vm1, %v17758_v61  ;;  %v6692_v37 = vpop.permute.xlu1 %6691 }
 0x6ce   :  { %13391 = vmatprep.subr.mxu0 %v17758_v61 }
 0x6d0   :  { %13384 = vmatmul.mubr.msk.f32.vlgmr.msra.gmra.mrb[92].mxu0 %vm674_vm2, %v15877_v58 }
 0x6d1   :  { %13392 = vmatpush3.xpose.msk.msra.mxu0 %vm674_vm2, %v15885_v33  ;;  %13393 = vmatprep.mubr.msk.f32.mxu0 %vm14399_vm1, %v17758_v61  ;;  %v6850_v33 = vpop.permute.xlu1 %6849 }
 0x6d2   :  { %13401 = vmatprep.subr.mxu0 %v17758_v61 }
 0x6d5   :  { %v6848_v29 = vpop.permute.xlu1 %6847 }
 0x6d9   :  { %v7006_v24 = vpop.permute.xlu1 %7005 }
 0x6e5   :  { %v4643_v48 = vpop.xlane.xlu0 %4642 }
 0x6e6   :  { %14188 = vrcp.f32 %v4643_v48 }
 0x6e9   :  { %v6458_v21 = vpop.permute.xlu0 %6457 }
 0x6ea   :  { %13394 = vmatmul.mubr.msk.f32.vlgmr.msra.gmra.mrb[94].mxu0 %vm674_vm2, %v6458_v21 }
 0x6eb   :  { %13403 = vmatprep.mubr.msk.f32.mxu0 %vm14399_vm1, %v17758_v61 }
 0x6ed   :  { %v6616_v58 = vpop.permute.xlu0 %6615 }
 0x6ee   :  { %13402 = vmatpush3.xpose.msk.msra.mxu0 %vm674_vm2, %v6616_v58 }
 0x6ef   :  { %13411 = vmatprep.subr.mxu0 %v17758_v61 }
 0x6f0   :  { %v14189_v32 = vpop.eup %14188 }
 0x6f1   :  { %v6614_v25 = vpop.permute.xlu0 %6613  ;;  %v4675_v7 = vmul.f32 %v14189_v32, %v15879_v44  ;;  %v17832_v44 = vld [vmem:[#allocation41_spill] sm:$0xff] }
 0x6f2   :  { %13404 = vmatmul.mubr.msk.f32.vlgmr.msra.gmra.mrb[96].mxu0 %vm674_vm2, %v6614_v25 }
 0x6f3   :  { %13359 = vmatmul.mubr.msk.f32.vlgmr.msra.gmra.mrb[86].mxu1 %vm1891_vm3, %v4675_v7  ;;  %13413 = vmatprep.mubr.msk.f32.mxu0 %vm14399_vm1, %v17758_v61 }
 0x6f4   :  { %13367 = vmatpush3.xpose.msk.msra.mxu1 %vm674_vm2, %v17831_v13  ;;  %13368 = vmatprep.mubr.msk.f32.mxu1 %vm14399_vm1, %v17758_v61 }
 0x6f5   :  { %v6772_v41 = vpop.permute.xlu0 %6771  ;;  %13376 = vmatprep.subr.mxu1 %v17758_v61 }
 0x6f6   :  { %13412 = vmatpush3.xpose.msk.msra.mxu0 %vm674_vm2, %v6772_v41 }
 0x6f7   :  { %13369 = vmatmul.mubr.msk.f32.vlgmr.msra.gmra.mrb[88].mxu1 %vm674_vm2, %v17832_v44  ;;  %13421 = vmatprep.subr.mxu0 %v17758_v61 }
 0x6f8   :  { %13377 = vmatpush3.xpose.msk.msra.mxu1 %vm674_vm2, %v17833_v14  ;;  %13378 = vmatprep.mubr.msk.f32.mxu1 %vm14399_vm1, %v17758_v61 }
 0x6f9   :  { %v6770_v1 = vpop.permute.xlu0 %6769  ;;  %13386 = vmatprep.subr.mxu1 %v17758_v61 }
 0x6fa   :  { %13414 = vmatmul.mubr.msk.f32.vlgmr.msra.gmra.mrb[98].mxu0 %vm674_vm2, %v6770_v1 }
 0x6fb   :  { %13379 = vmatmul.mubr.msk.f32.vlgmr.msra.gmra.mrb[90].mxu1 %vm674_vm2, %v17834_v49  ;;  %13423 = vmatprep.mubr.msk.f32.mxu0 %vm14399_vm1, %v17758_v61 }
 0x6fc   :  { %13387 = vmatpush3.xpose.msk.msra.mxu1 %vm674_vm2, %v15858_v53  ;;  %13388 = vmatprep.mubr.msk.f32.mxu1 %vm14399_vm1, %v17758_v61  ;;  %v7004_v53 = vpop.permute.xlu1 %7003 }
 0x6fd   :  { %v6928_v30 = vpop.permute.xlu0 %6927  ;;  %13396 = vmatprep.subr.mxu1 %v17758_v61 }
 0x6fe   :  { %13422 = vmatpush3.xpose.msk.msra.mxu0 %vm674_vm2, %v6928_v30 }
 0x6ff   :  { %13389 = vmatmul.mubr.msk.f32.vlgmr.msra.gmra.mrb[92].mxu1 %vm674_vm2, %v15862_v26  ;;  %13431 = vmatprep.subr.mxu0 %v17758_v61 }
 0x700   :  { %13397 = vmatpush3.xpose.msk.msra.mxu1 %vm674_vm2, %v15943_v2  ;;  %13398 = vmatprep.mubr.msk.f32.mxu1 %vm14399_vm1, %v17758_v61  ;;  %v7162_v2 = vpop.permute.xlu1 %7161 }
 0x701   :  { %v6926_v35 = vpop.permute.xlu0 %6925  ;;  %13406 = vmatprep.subr.mxu1 %v17758_v61 }
 0x702   :  { %13424 = vmatmul.mubr.msk.f32.vlgmr.msra.gmra.mrb[100].mxu0 %vm674_vm2, %v6926_v35 }
 0x703   :  { %13399 = vmatmul.mubr.msk.f32.vlgmr.msra.gmra.mrb[94].mxu1 %vm674_vm2, %v6536_v12  ;;  %13433 = vmatprep.mubr.msk.f32.mxu0 %vm14399_vm1, %v17758_v61 }
 0x704   :  { %13407 = vmatpush3.xpose.msk.msra.mxu1 %vm674_vm2, %v6694_v55  ;;  %13408 = vmatprep.mubr.msk.f32.mxu1 %vm14399_vm1, %v17758_v61  ;;  %v7160_v31 = vpop.permute.xlu1 %7159 }
 0x705   :  { %v7084_v26 = vpop.permute.xlu0 %7083  ;;  %13416 = vmatprep.subr.mxu1 %v17758_v61 }
 0x706   :  { %13432 = vmatpush3.xpose.msk.msra.mxu0 %vm674_vm2, %v7084_v26 }
 0x707   :  { %13409 = vmatmul.mubr.msk.f32.vlgmr.msra.gmra.mrb[96].mxu1 %vm674_vm2, %v6692_v37  ;;  %13441 = vmatprep.subr.mxu0 %v17758_v61 }
 0x708   :  { %13417 = vmatpush3.xpose.msk.msra.mxu1 %vm674_vm2, %v6850_v33  ;;  %13418 = vmatprep.mubr.msk.f32.mxu1 %vm14399_vm1, %v17758_v61  ;;  %v7490_v9 = vpop.permute.xlu1 %7489 }
 0x709   :  { %v7082_v60 = vpop.permute.xlu0 %7081  ;;  %13426 = vmatprep.subr.mxu1 %v17758_v61 }
 0x70a   :  { %13434 = vmatmul.mubr.msk.f32.vlgmr.msra.gmra.mrb[102].mxu0 %vm674_vm2, %v7082_v60 }
 0x70b   :  { %13419 = vmatmul.mubr.msk.f32.vlgmr.msra.gmra.mrb[98].mxu1 %vm674_vm2, %v6848_v29  ;;  %13443 = vmatprep.mubr.msk.f32.mxu0 %vm14399_vm1, %v17758_v61 }
 0x70c   :  { %13427 = vmatpush3.xpose.msk.msra.mxu1 %vm674_vm2, %v7006_v24  ;;  %13428 = vmatprep.mubr.msk.f32.mxu1 %vm14399_vm1, %v17758_v61 }
 0x70d   :  { %v7414_v11 = vpop.permute.xlu0 %7413  ;;  %13436 = vmatprep.subr.mxu1 %v17758_v61 }
 0x70e   :  { %13442 = vmatpush3.msra.mxu0 %v7414_v11 }
 0x70f   :  { %13429 = vmatmul.mubr.msk.f32.vlgmr.msra.gmra.mrb[100].mxu1 %vm674_vm2, %v7004_v53  ;;  %13451 = vmatprep.subr.mxu0 %v17758_v61 }
 0x710   :  { %13437 = vmatpush3.xpose.msk.msra.mxu1 %vm674_vm2, %v7162_v2  ;;  %13438 = vmatprep.mubr.msk.f32.mxu1 %vm14399_vm1, %v17758_v61 }
 0x711   :  { %13446 = vmatprep.subr.mxu1 %v17758_v61  ;;  %v16239_v45 = vpop.permute.xlu0 %7565 }
 0x713   :  { %13439 = vmatmul.mubr.msk.f32.vlgmr.msra.gmra.mrb[102].mxu1 %vm674_vm2, %v7160_v31 }
 0x714   :  { %13447 = vmatpush3.msra.mxu1 %v7490_v9  ;;  %13448 = vmatprep.mubr.msk.f32.mxu1 %vm14399_vm1, %v17758_v61 }
 0x715   :  { %13456 = vmatprep.subr.mxu1 %v17758_v61 }
 0x740   :  { %v16149_v63 = vpop.f32.mrb[72].mxu0 }
 0x741   :  { %17835 = vst [vmem:[#allocation27_spill] sm:$0xff] %v16149_v63  ;;  %v13285_v16 = vpop.f32.mrb[73].mxu0 }
 0x744   :  { %v16151_v12 = vpop.f32.mrb[74].mxu0 }
 0x745   :  { %17836 = vst [vmem:[#allocation19_spill] sm:$0xff] %v16151_v12  ;;  %v13295_v55 = vpop.f32.mrb[75].mxu0 }
 0x775   :  { %v16153_v48 = vpop.f32.mrb[72].mxu1 }
 0x776   :  { %17837 = vst [vmem:[#allocation28_spill] sm:$0xff] %v16153_v48  ;;  %v13290_v37 = vpop.f32.mrb[73].mxu1 }
 0x779   :  { %v16155_v21 = vpop.f32.mrb[74].mxu1 }
 0x77a   :  { %17838 = vst [vmem:[#allocation10_spill] sm:$0xff] %v16155_v21  ;;  %v13300_v58 = vpop.f32.mrb[75].mxu1 }
 0x77d   :  { %v16157_v33 = vpop.f32.mrb[76].mxu1 }
 0x77e   :  { %17839 = vst [vmem:[#allocation13_spill] sm:$0xff] %v16157_v33  ;;  %v16159_v32 = vpop.f32.mrb[76].mxu0  ;;  %v13310_v25 = vpop.f32.mrb[77].mxu1 }
 0x77f   :  { %17840 = vst [vmem:[#allocation17_spill] sm:$0xff] %v16159_v32  ;;  %v13305_v7 = vpop.f32.mrb[77].mxu0 }
 0x781   :  { %v16161_v13 = vpop.f32.mrb[78].mxu1 }
 0x782   :  { %17841 = vst [vmem:[#allocation29_spill] sm:$0xff] %v16161_v13  ;;  %v13320_v29 = vpop.f32.mrb[79].mxu1  ;;  %v16261_v13 = vpop.permute.xlu1 %7641 }
 0x783   :  { %v16163_v41 = vpop.f32.mrb[78].mxu0 }
 0x784   :  { %17842 = vst [vmem:[#allocation33_spill] sm:$0xff] %v16163_v41  ;;  %v13315_v44 = vpop.f32.mrb[79].mxu0 }
 0x786   :  { %v16165_v14 = vpop.f32.mrb[80].mxu1 }
 0x787   :  { %17843 = vst [vmem:[#allocation34_spill] sm:$0xff] %v16165_v14  ;;  %v16167_v1 = vpop.f32.mrb[80].mxu0  ;;  %v13330_v24 = vpop.f32.mrb[81].mxu1 }
 0x788   :  { %17844 = vst [vmem:[#allocation30_spill] sm:$0xff] %v16167_v1  ;;  %v13325_v49 = vpop.f32.mrb[81].mxu0 }
 0x78a   :  { %v16169_v30 = vpop.f32.mrb[82].mxu1 }
 0x78b   :  { %17845 = vst [vmem:[#allocation16_spill] sm:$0xff] %v16169_v30  ;;  %v13340_v53 = vpop.f32.mrb[83].mxu1 }
 0x78c   :  { %v16171_v35 = vpop.f32.mrb[82].mxu0 }
 0x78d   :  { %17846 = vst [vmem:[#allocation5_spill] sm:$0xff] %v16171_v35  ;;  %v13335_v26 = vpop.f32.mrb[83].mxu0 }
 0x78f   :  { %v16173_v2 = vpop.f32.mrb[84].mxu1 }
 0x790   :  { %17847 = vst [vmem:[#allocation7_spill] sm:$0xff] %v16173_v2  ;;  %v16175_v60 = vpop.f32.mrb[84].mxu0  ;;  %v13350_v31 = vpop.f32.mrb[85].mxu1 }
 0x791   :  { %17848 = vst [vmem:[#allocation4_spill] sm:$0xff] %v16175_v60  ;;  %v13345_v11 = vpop.f32.mrb[85].mxu0 }
 0x794   :  { %v16177_v9 = vpop.f32.mrb[86].mxu0 }
 0x795   :  { %17849 = vst [vmem:[#allocation37_spill] sm:$0xff] %v16177_v9  ;;  %v13355_v16 = vpop.f32.mrb[87].mxu0 }
 0x79b   :  { %v16179_v55 = vpop.f32.mrb[88].mxu0 }
 0x79c   :  { %v13365_v37 = vpop.f32.mrb[89].mxu0  ;;  %v7237_v58 = vsel %vm1891_vm3, %v16179_v55, -inf }
 0x79d   :  { %7238 = vmax.xlane.f32.xlu0 %v7237_v58 }
 0x79f   :  { %v16183_v25 = vpop.f32.mrb[90].mxu0 }
 0x7a0   :  { %v13375_v7 = vpop.f32.mrb[91].mxu0  ;;  %v7243_v29 = vsel %vm1891_vm3, %v16183_v25, -inf }
 0x7a1   :  { %7244 = vmax.xlane.f32.xlu0 %v7243_v29 }
 0x7a3   :  { %v16187_v44 = vpop.f32.mrb[92].mxu0 }
 0x7a4   :  { %v13385_v24 = vpop.f32.mrb[93].mxu0 }
 0x7bd   :  { %v16189_v49 = vpop.f32.mrb[94].mxu0 }
 0x7be   :  { %v13395_v53 = vpop.f32.mrb[95].mxu0 }
 0x7c5   :  { %v16191_v26 = vpop.f32.mrb[96].mxu0 }
 0x7c6   :  { %v16193_v31 = vpop.f32.mrb[86].mxu1  ;;  %v13405_v11 = vpop.f32.mrb[97].mxu0 }
 0x7c7   :  { %17850 = vst [vmem:[#allocation6_spill] sm:$0xff] %v16193_v31  ;;  %v13360_v16 = vpop.f32.mrb[87].mxu1 }
 0x7c8   :  { %v7249_v16 = vsel %vm1891_vm3, %v16187_v44, -inf }
 0x7ca   :  { %v16195_v37 = vpop.f32.mrb[88].mxu1 }
 0x7cb   :  { %v13370_v58 = vpop.f32.mrb[89].mxu1  ;;  %v7240_v7 = vsel %vm1891_vm3, %v16195_v37, -inf }
 0x7cc   :  { %7241 = vmax.xlane.f32.xlu1 %v7240_v7 }
 0x7cd   :  { %v16199_v29 = vpop.f32.mrb[98].mxu0 }
 0x7ce   :  { %v16201_v9 = vpop.f32.mrb[90].mxu1  ;;  %v13415_v24 = vpop.f32.mrb[99].mxu0 }
 0x7cf   :  { %v13380_v60 = vpop.f32.mrb[91].mxu1  ;;  %v7246_v53 = vsel %vm1891_vm3, %v16201_v9, -inf }
 0x7d0   :  { %7247 = vmax.xlane.f32.xlu0 %v7246_v53 }
 0x7d2   :  { %v16205_v35 = vpop.f32.mrb[92].mxu1 }
 0x7d3   :  { %v13390_v11 = vpop.f32.mrb[93].mxu1  ;;  %v7252_v58 = vsel %vm1891_vm3, %v16205_v35, -inf }
 0x7d4   :  { %7250 = vmax.xlane.f32.xlu0 %v7249_v16  ;;  %7253 = vmax.xlane.f32.xlu1 %v7252_v58  ;;  %v7255_v11 = vsel %vm1891_vm3, %v16189_v49, -inf  ;;  %v7261_v58 = vsel %vm1891_vm3, %v16191_v26, -inf }
 0x7d5   :  { %v16211_v7 = vpop.f32.mrb[100].mxu0 }
 0x7d6   :  { %v16213_v1 = vpop.f32.mrb[94].mxu1  ;;  %v13425_v60 = vpop.f32.mrb[101].mxu0 }
 0x7d7   :  { %v13400_v24 = vpop.f32.mrb[95].mxu1  ;;  %v7258_v53 = vsel %vm1891_vm3, %v16213_v1, -inf }
 0x7d8   :  { %7259 = vmax.xlane.f32.xlu1 %v7258_v53  ;;  %7256 = vmax.xlane.f32.xlu0 %v7255_v11 }
 0x7da   :  { %v16219_v41 = vpop.f32.mrb[96].mxu1 }
 0x7db   :  { %v13410_v32 = vpop.f32.mrb[97].mxu1  ;;  %v7264_v16 = vsel %vm1891_vm3, %v16219_v41, -inf }
 0x7dc   :  { %7265 = vmax.xlane.f32.xlu1 %v7264_v16  ;;  %7262 = vmax.xlane.f32.xlu0 %v7261_v58  ;;  %v7267_v32 = vsel %vm1891_vm3, %v16199_v29, -inf  ;;  %v7273_v58 = vsel %vm1891_vm3, %v16211_v7, -inf }
 0x7dd   :  { %v16225_v60 = vpop.f32.mrb[102].mxu0 }
 0x7de   :  { %v16227_v24 = vpop.f32.mrb[98].mxu1  ;;  %v13435_v12 = vpop.f32.mrb[103].mxu0 }
 0x7df   :  { %v13420_v31 = vpop.f32.mrb[99].mxu1  ;;  %v7270_v53 = vsel %vm1891_vm3, %v16227_v24, -inf }
 0x7e0   :  { %7271 = vmax.xlane.f32.xlu1 %v7270_v53  ;;  %7268 = vmax.xlane.f32.xlu0 %v7267_v32  ;;  %v7279_v32 = vsel %vm1891_vm3, %v16225_v60, -inf }
 0x7e2   :  { %v16233_v11 = vpop.f32.mrb[100].mxu1 }
 0x7e3   :  { %v13430_v63 = vpop.f32.mrb[101].mxu1  ;;  %v7276_v16 = vsel %vm1891_vm3, %v16233_v11, -inf }
 0x7e4   :  { %7277 = vmax.xlane.f32.xlu1 %v7276_v16  ;;  %7274 = vmax.xlane.f32.xlu0 %v7273_v58  ;;  %v16247_v63 = vpop.permute.xlu0 %7717  ;;  %v17853_v16 = vld [vmem:[#allocation23_spill] sm:$0xff] }
 0x7e6   :  { %v16241_v12 = vpop.f32.mrb[102].mxu1 }
 0x7e7   :  { %v13440_v31 = vpop.f32.mrb[103].mxu1  ;;  %v7282_v53 = vsel %vm1891_vm3, %v16241_v12, -inf }
 0x7e8   :  { %7283 = vmax.xlane.f32.xlu1 %v7282_v53  ;;  %7280 = vmax.xlane.f32.xlu0 %v7279_v32  ;;  %v16249_v2 = vpop.permute.xlu0 %8021  ;;  %v17855_v31 = vld [vmem:[#allocation20_spill] sm:$0xff]  ;;  %v16265_v32 = vpop.permute.xlu1 %7793 }
 0x7e9   :  { %17851 = vst [vmem:[#allocation38_spill] sm:$0xff] %v16249_v2 }
 0x7ec   :  { %v16251_v30 = vpop.permute.xlu0 %8173  ;;  %v16269_v21 = vpop.permute.xlu1 %7869 }
 0x7ed   :  { %17852 = vst [vmem:[#allocation9_spill] sm:$0xff] %v16251_v30  ;;  %17859 = vst [vmem:[#allocation14_spill] sm:$0xff] %v16269_v21 }
 0x7f0   :  { %v16255_v58 = vpop.permute.xlu0 %8325 }
 0x7f1   :  { %17854 = vst [vmem:[#allocation12_spill] sm:$0xff] %v16255_v58 }
 0x7f4   :  { %v16259_v14 = vpop.permute.xlu0 %8477 }
 0x7f5   :  { %17856 = vst [vmem:[#allocation8_spill] sm:$0xff] %v16259_v14 }
 0x7f8   :  { %v16263_v53 = vpop.permute.xlu0 %8712 }
 0x7f9   :  { %9258 = vrot.lane.b32.xlu1 %v17853_v16, %s14402_s21  ;;  %17857 = vst [vmem:[#allocation39_spill] sm:$0xff] %v16263_v53  ;;  %v16273_v16 = vpop.permute.xlu1 %7945 }
 0x7fc   :  { %v16267_v33 = vpop.permute.xlu0 %8710 }
 0x7fd   :  { %17858 = vst [vmem:[#allocation11_spill] sm:$0xff] %v16267_v33  ;;  %v16277_v54 = vpop.permute.xlu1 %8097 }
 0x7fe   :  { %9180 = vrot.lane.b32.xlu0 %v17855_v31, %s14402_s21  ;;  %17862 = vst [vmem:[#allocation35_spill] sm:$0xff] %v16277_v54 }
 0x800   :  { %v16271_v48 = vpop.permute.xlu0 %8868 }
 0x801   :  { %17860 = vst [vmem:[#allocation15_spill] sm:$0xff] %v16271_v48  ;;  %v16281_v43 = vpop.permute.xlu1 %8249 }
 0x802   :  { %17864 = vst [vmem:[#allocation36_spill] sm:$0xff] %v16281_v43 }
 0x804   :  { %v16275_v57 = vpop.permute.xlu0 %8866 }
 0x805   :  { %17861 = vst [vmem:[#allocation31_spill] sm:$0xff] %v16275_v57  ;;  %v16285_v53 = vpop.permute.xlu1 %8401 }
 0x806   :  { %17866 = vst [vmem:[#allocation41_spill] sm:$0xff] %v16285_v53 }
 0x808   :  { %v16279_v31 = vpop.permute.xlu0 %9024 }
 0x809   :  { %17863 = vst [vmem:[#allocation32_spill] sm:$0xff] %v16279_v31  ;;  %v16289_v30 = vpop.permute.xlu1 %8553 }
 0x80a   :  { %17867 = vst [vmem:[#allocation42_spill] sm:$0xff] %v16289_v30 }
 0x80c   :  { %v16283_v10 = vpop.permute.xlu0 %9022 }
 0x80d   :  { %17865 = vst [vmem:[#allocation40_spill] sm:$0xff] %v16283_v10  ;;  %v16291_v2 = vpop.permute.xlu1 %8790 }
 0x80e   :  { %17868 = vst [vmem:[#allocation43_spill] sm:$0xff] %v16291_v2 }
 0x82a   :  { %v7239_v20 = vpop.xlane.xlu0 %7238 }
 0x82b   :  { %v7285_v33 = vsub.f32 %v16179_v55, %v7239_v20  ;;  %v16299_v20 = vpop.permute.xlu1 %8788 }
 0x82c   :  { %17869 = vst [vmem:[#allocation23_spill] sm:$0xff] %v16299_v20 }
 0x82d   :  { %v7301_v14 = vmul.f32 1.442695, %v7285_v33 }
 0x82e   :  { %v7245_v58 = vpop.xlane.xlu0 %7244 }
 0x82f   :  { %14190 = vpow2.f32 %v7301_v14  ;;  %v7287_v48 = vsub.f32 %v16183_v25, %v7245_v58  ;;  %v16303_v14 = vpop.permute.xlu1 %8946 }
 0x830   :  { %17870 = vst [vmem:[#allocation20_spill] sm:$0xff] %v16303_v14 }
 0x831   :  { %v7305_v57 = vmul.f32 1.442695, %v7287_v48 }
 0x833   :  { %14192 = vpow2.f32 %v7305_v57  ;;  %v16305_v48 = vpop.permute.xlu1 %8944 }
 0x834   :  { %17871 = vst [vmem:[#allocation44_spill] sm:$0xff] %v16305_v48 }
 0x837   :  { %v16307_v57 = vpop.permute.xlu1 %9102 }
 0x838   :  { %17872 = vst [vmem:[#allocation45_spill] sm:$0xff] %v16307_v57 }
 0x839   :  { %v16293_v31 = vpop.eup %14190 }
 0x83a   :  { %v7333_v10 = vsel %vm1891_vm3, %v16293_v31, 0.0 }
 0x83b   :  { %7334 = vadd.xlane.f32.xlu0 %v7333_v10  ;;  %v16309_v55 = vpop.permute.xlu1 %9100 }
 0x83c   :  { %17873 = vst [vmem:[#allocation46_spill] sm:$0xff] %v16309_v55 }
 0x83d   :  { %v16297_v53 = vpop.eup %14192 }
 0x83e   :  { %v7339_v33 = vsel %vm1891_vm3, %v16297_v53, 0.0 }
 0x83f   :  { %7340 = vadd.xlane.f32.xlu0 %v7339_v33 }
 0x859   :  { %v7242_v25 = vpop.xlane.xlu1 %7241 }
 0x85a   :  { %v7286_v58 = vsub.f32 %v16195_v37, %v7242_v25 }
 0x85c   :  { %v7303_v10 = vmul.f32 1.442695, %v7286_v58 }
 0x85d   :  { %v7248_v2 = vpop.xlane.xlu0 %7247 }
 0x85e   :  { %14194 = vpow2.f32 %v7303_v10  ;;  %v7288_v20 = vsub.f32 %v16201_v9, %v7248_v2 }
 0x860   :  { %v7307_v30 = vmul.f32 1.442695, %v7288_v20 }
 0x861   :  { %v7254_v43 = vpop.xlane.xlu1 %7253  ;;  %v7251_v54 = vpop.xlane.xlu0 %7250 }
 0x862   :  { %14196 = vpow2.f32 %v7307_v30  ;;  %v7290_v33 = vsub.f32 %v16205_v35, %v7254_v43  ;;  %v7289_v48 = vsub.f32 %v16187_v44, %v7251_v54 }
 0x864   :  { %v7311_v14 = vmul.f32 1.442695, %v7290_v33  ;;  %v7309_v57 = vmul.f32 1.442695, %v7289_v48 }
 0x865   :  { %v7260_v21 = vpop.xlane.xlu1 %7259  ;;  %v7257_v55 = vpop.xlane.xlu0 %7256 }
 0x866   :  { %14198 = vpow2.f32 %v7311_v14  ;;  %v7292_v37 = vsub.f32 %v16213_v1, %v7260_v21  ;;  %v7291_v25 = vsub.f32 %v16189_v49, %v7257_v55 }
 0x867   :  { %14200 = vpow2.f32 %v7309_v57 }
 0x868   :  { %v16317_v58 = vpop.eup %14194  ;;  %v7315_v2 = vmul.f32 1.442695, %v7292_v37  ;;  %v7313_v9 = vmul.f32 1.442695, %v7291_v25 }
 0x869   :  { %v7266_v20 = vpop.xlane.xlu1 %7265  ;;  %v7263_v30 = vpop.xlane.xlu0 %7262  ;;  %v7336_v43 = vsel %vm1891_vm3, %v16317_v58, 0.0 }
 0x86a   :  { %14202 = vpow2.f32 %v7315_v2  ;;  %v7294_v54 = vsub.f32 %v16219_v41, %v7266_v20  ;;  %v7293_v35 = vsub.f32 %v16191_v26, %v7263_v30  ;;  %7337 = vadd.xlane.f32.xlu1 %v7336_v43 }
 0x86b   :  { %14204 = vpow2.f32 %v7313_v9 }
 0x86c   :  { %v16323_v21 = vpop.eup %14196  ;;  %v7319_v1 = vmul.f32 1.442695, %v7294_v54  ;;  %v7317_v44 = vmul.f32 1.442695, %v7293_v35 }
 0x86d   :  { %v7272_v49 = vpop.xlane.xlu1 %7271  ;;  %v7269_v14 = vpop.xlane.xlu0 %7268  ;;  %v7342_v48 = vsel %vm1891_vm3, %v16323_v21, 0.0 }
 0x86e   :  { %14206 = vpow2.f32 %v7319_v1  ;;  %v7296_v57 = vsub.f32 %v16227_v24, %v7272_v49  ;;  %v7295_v55 = vsub.f32 %v16199_v29, %v7269_v14  ;;  %7343 = vadd.xlane.f32.xlu1 %v7342_v48 }
 0x86f   :  { %14208 = vpow2.f32 %v7317_v44 }
 0x870   :  { %v16329_v41 = vpop.eup %14198  ;;  %v7323_v26 = vmul.f32 1.442695, %v7296_v57  ;;  %v7321_v10 = vmul.f32 1.442695, %v7295_v55 }
 0x871   :  { %v16331_v33 = vpop.eup %14200  ;;  %v7275_v37 = vpop.xlane.xlu0 %7274  ;;  %v7348_v25 = vsel %vm1891_vm3, %v16329_v41, 0.0 }
 0x872   :  { %14210 = vpow2.f32 %v7323_v26  ;;  %v7297_v2 = vsub.f32 %v16211_v7, %v7275_v37  ;;  %7349 = vadd.xlane.f32.xlu1 %v7348_v25  ;;  %v7345_v24 = vsel %vm1891_vm3, %v16331_v33, 0.0  ;;  %v7278_v26 = vpop.xlane.xlu1 %7277 }
 0x873   :  { %14212 = vpow2.f32 %v7321_v10  ;;  %7346 = vadd.xlane.f32.xlu0 %v7345_v24  ;;  %v7298_v10 = vsub.f32 %v16233_v11, %v7278_v26 }
 0x874   :  { %v16338_v29 = vpop.eup %14202  ;;  %v7325_v9 = vmul.f32 1.442695, %v7297_v2 }
 0x875   :  { %v16340_v20 = vpop.eup %14204  ;;  %v7354_v30 = vsel %vm1891_vm3, %v16338_v29, 0.0  ;;  %v7281_v37 = vpop.xlane.xlu0 %7280  ;;  %v7327_v2 = vmul.f32 1.442695, %v7298_v10  ;;  %v17880_v10 = vld [vmem:[#allocation12_spill] sm:$0xff] }
 0x876   :  { %7355 = vadd.xlane.f32.xlu1 %v7354_v30  ;;  %v7351_v43 = vsel %vm1891_vm3, %v16340_v20, 0.0  ;;  %14214 = vpow2.f32 %v7325_v9  ;;  %v7284_v25 = vpop.xlane.xlu1 %7283  ;;  %v7299_v24 = vsub.f32 %v16225_v60, %v7281_v37 }
 0x877   :  { %7352 = vadd.xlane.f32.xlu0 %v7351_v43  ;;  %v7300_v9 = vsub.f32 %v16241_v12, %v7284_v25  ;;  %14216 = vpow2.f32 %v7327_v2 }
 0x878   :  { %v16346_v7 = vpop.eup %14206  ;;  %v7329_v30 = vmul.f32 1.442695, %v7299_v24 }
 0x879   :  { %v16348_v54 = vpop.eup %14208  ;;  %v7360_v35 = vsel %vm1891_vm3, %v16346_v7, 0.0  ;;  %v7331_v43 = vmul.f32 1.442695, %v7300_v9 }
 0x87a   :  { %7361 = vadd.xlane.f32.xlu1 %v7360_v35  ;;  %v7357_v1 = vsel %vm1891_vm3, %v16348_v54, 0.0  ;;  %14218 = vpow2.f32 %v7329_v30 }
 0x87b   :  { %7358 = vadd.xlane.f32.xlu0 %v7357_v1  ;;  %14220 = vpow2.f32 %v7331_v43  ;;  %v16385_v1 = vpop.permute.xlu0 %9180 }
 0x87c   :  { %v16354_v44 = vpop.eup %14210 }
 0x87d   :  { %v16356_v49 = vpop.eup %14212  ;;  %v7366_v14 = vsel %vm1891_vm3, %v16354_v44, 0.0 }
 0x87e   :  { %7367 = vadd.xlane.f32.xlu1 %v7366_v14  ;;  %v7363_v48 = vsel %vm1891_vm3, %v16356_v49, 0.0 }
 0x87f   :  { %7364 = vadd.xlane.f32.xlu0 %v7363_v48 }
 0x880   :  { %v16362_v57 = vpop.eup %14214 }
 0x881   :  { %v7369_v55 = vsel %vm1891_vm3, %v16362_v57, 0.0  ;;  %v16373_v35 = vpop.eup %14216 }
 0x883   :  { %7370 = vadd.xlane.f32.xlu0 %v7369_v55 }
 0x88f   :  { %9256 = vrot.lane.b32.xlu1 %v15059_v38, %s14402_s21  ;;  %v7372_v38 = vsel %vm1891_vm3, %v16373_v35, 0.0 }
 0x899   :  { %9178 = vrot.lane.b32.xlu0 %v15040_v46, %s14402_s21  ;;  %v16377_v46 = vpop.eup %14218 }
 0x89a   :  { %v16379_v11 = vpop.eup %14220  ;;  %v7375_v60 = vsel %vm1891_vm3, %v16377_v46, 0.0 }
 0x89b   :  { %v7378_v12 = vsel %vm1891_vm3, %v16379_v11, 0.0 }
 0x8b3   :  { %7373 = vadd.xlane.f32.xlu1 %v7372_v38 }
 0x8b7   :  { %7376 = vadd.xlane.f32.xlu1 %v7375_v60 }
 0x8b8   :  { %7379 = vadd.xlane.f32.xlu0 %v7378_v12 }
 0x8c8   :  { %v7335_v14 = vpop.xlane.xlu0 %7334  ;;  %9414 = vrot.lane.b32.xlu1 %v15079_v50, %s14402_s21 }
 0x8c9   :  { %14222 = vrcp.f32 %v7335_v14 }
 0x8cc   :  { %v7341_v48 = vpop.xlane.xlu0 %7340  ;;  %9412 = vrot.lane.b32.xlu1 %v15088_v56, %s14402_s21 }
 0x8cd   :  { %14224 = vrcp.f32 %v7341_v48  ;;  %v17882_v48 = vld [vmem:[#allocation42_spill] sm:$0xff] }
 0x8ce   :  { %9336 = vrot.lane.b32.xlu0 %v15062_v42, %s14402_s21 }
 0x8d0   :  { %9570 = vrot.lane.b32.xlu1 %v15105_v18, %s14402_s21 }
 0x8d2   :  { %9334 = vrot.lane.b32.xlu0 %v15073_v15, %s14402_s21  ;;  %v16441_v15 = vpop.permute.xlu1 %9258 }
 0x8d3   :  { %v14223_v55 = vpop.eup %14222 }
 0x8d4   :  { %v7382_v26 = vmul.f32 %v14223_v55, %v16293_v31  ;;  %9568 = vrot.lane.b32.xlu1 %v15114_v19, %s14402_s21 }
 0x8d6   :  { %13444 = vmatmul.mubr.msk.f32.vlgmr.msra.gmra.mrb[104].mxu0 %vm1891_vm3, %v7382_v26  ;;  %9492 = vrot.lane.b32.xlu0 %v15092_v59, %s14402_s21 }
 0x8d7   :  { %v14225_v50 = vpop.eup %14224  ;;  %13452 = vmatpush3.msra.mxu0 %v16239_v45  ;;  %13453 = vmatprep.mubr.msk.f32.mxu0 %vm14399_vm1, %v17758_v61 }
 0x8d8   :  { %13461 = vmatprep.subr.mxu0 %v17758_v61  ;;  %v7386_v42 = vmul.f32 %v14225_v50, %v16297_v53  ;;  %9726 = vrot.lane.b32.xlu1 %v15131_v27, %s14402_s21 }
 0x8da   :  { %13454 = vmatmul.mubr.msk.f32.vlgmr.msra.gmra.mrb[106].mxu0 %vm1891_vm3, %v7386_v42  ;;  %9490 = vrot.lane.b32.xlu0 %v15101_v62, %s14402_s21 }
 0x8db   :  { %13462 = vmatpush3.msra.mxu0 %v16247_v63  ;;  %13463 = vmatprep.mubr.msk.f32.mxu0 %vm14399_vm1, %v17758_v61  ;;  %v17875_v63 = vld [vmem:[#allocation35_spill] sm:$0xff] }
 0x8dc   :  { %9724 = vrot.lane.b32.xlu1 %v15140_v28, %s14402_s21  ;;  %13471 = vmatprep.subr.mxu0 %v17758_v61 }
 0x8de   :  { %9648 = vrot.lane.b32.xlu0 %v15118_v0, %s14402_s21 }
 0x8e0   :  { %9882 = vrot.lane.b32.xlu1 %v15164_v6, %s14402_s21 }
 0x8e2   :  { %9646 = vrot.lane.b32.xlu0 %v15127_v3, %s14402_s21 }
 0x8e4   :  { %9880 = vrot.lane.b32.xlu1 %v15156_v4, %s14402_s21 }
 0x8e6   :  { %9804 = vrot.lane.b32.xlu0 %v15144_v34, %s14402_s21 }
 0x8e8   :  { %10210 = vrot.lane.b32.xlu1 %v15176_v5, %s14402_s21 }
 0x8ea   :  { %9802 = vrot.lane.b32.xlu0 %v17800_v23, %s14402_s21 }
 0x8ec   :  { %10362 = vrot.lane.b32.xlu1 %v14938_v47, %s14402_s21 }
 0x8ee   :  { %10134 = vrot.lane.b32.xlu0 %v17802_v36, %s14402_s21 }
 0x8f0   :  { %10438 = vrot.lane.b32.xlu1 %v17804_v51, %s14402_s21 }
 0x8f2   :  { %10286 = vrot.lane.b32.xlu0 %v17803_v39, %s14402_s21  ;;  %v17874_v39 = vld [vmem:[#allocation14_spill] sm:$0xff] }
 0x8f4   :  { %10514 = vrot.lane.b32.xlu1 %v14957_v52, %s14402_s21 }
 0x8f6   :  { %10590 = vrot.lane.b32.xlu0 %v14987_v17, %s14402_s21 }
 0x8f7   :  { %v7338_v56 = vpop.xlane.xlu1 %7337 }
 0x8f8   :  { %14226 = vrcp.f32 %v7338_v56  ;;  %10666 = vrot.lane.b32.xlu1 %v14977_v40, %s14402_s21 }
 0x8fa   :  { %10742 = vrot.lane.b32.xlu0 %v17805_v22, %s14402_s21 }
 0x8fb   :  { %v7344_v47 = vpop.xlane.xlu1 %7343 }
 0x8fc   :  { %14228 = vrcp.f32 %v7344_v47  ;;  %10818 = vrot.lane.b32.xlu1 %v14995_v8, %s14402_s21 }
 0x8ff   :  { %v7350_v59 = vpop.xlane.xlu1 %7349 }
 0x900   :  { %14230 = vrcp.f32 %v7350_v59  ;;  %v7347_v62 = vpop.xlane.xlu0 %7346 }
 0x901   :  { %14232 = vrcp.f32 %v7347_v62  ;;  %v17886_v62 = vld [vmem:[#allocation15_spill] sm:$0xff] }
 0x902   :  { %v14227_v52 = vpop.eup %14226 }
 0x903   :  { %v7356_v18 = vpop.xlane.xlu1 %7355  ;;  %v7384_v17 = vmul.f32 %v14227_v52, %v16317_v58  ;;  %v17887_v52 = vld [vmem:[#allocation23_spill] sm:$0xff] }
 0x904   :  { %14234 = vrcp.f32 %v7356_v18  ;;  %v7353_v19 = vpop.xlane.xlu0 %7352 }
 0x905   :  { %14236 = vrcp.f32 %v7353_v19  ;;  %13449 = vmatmul.mubr.msk.f32.vlgmr.msra.gmra.mrb[104].mxu1 %vm1891_vm3, %v7384_v17  ;;  %v17888_v17 = vld [vmem:[#allocation20_spill] sm:$0xff]  ;;  %v17889_v19 = vld [vmem:[#allocation31_spill] sm:$0xff] }
 0x906   :  { %v14229_v40 = vpop.eup %14228  ;;  %13457 = vmatpush3.msra.mxu1 %v16261_v13  ;;  %13458 = vmatprep.mubr.msk.f32.mxu1 %vm14399_vm1, %v17758_v61 }
 0x907   :  { %v7362_v8 = vpop.xlane.xlu1 %7361  ;;  %13466 = vmatprep.subr.mxu1 %v17758_v61  ;;  %v7388_v0 = vmul.f32 %v14229_v40, %v16323_v21  ;;  %v17877_v21 = vld [vmem:[#allocation36_spill] sm:$0xff] }
 0x908   :  { %14238 = vrcp.f32 %v7362_v8  ;;  %v7359_v3 = vpop.xlane.xlu0 %7358  ;;  %v17890_v40 = vld [vmem:[#allocation32_spill] sm:$0xff] }
 0x909   :  { %14240 = vrcp.f32 %v7359_v3  ;;  %13459 = vmatmul.mubr.msk.f32.vlgmr.msra.gmra.mrb[106].mxu1 %vm1891_vm3, %v7388_v0  ;;  %v17891_v0 = vld [vmem:[#allocation44_spill] sm:$0xff]  ;;  %v17892_v3 = vld [vmem:[#allocation45_spill] sm:$0xff] }
 0x90a   :  { %v14231_v27 = vpop.eup %14230  ;;  %13467 = vmatpush3.msra.mxu1 %v16265_v32  ;;  %13468 = vmatprep.mubr.msk.f32.mxu1 %vm14399_vm1, %v17758_v61  ;;  %v17876_v32 = vld [vmem:[#allocation38_spill] sm:$0xff] }
 0x90b   :  { %v14233_v28 = vpop.eup %14232  ;;  %v7368_v34 = vpop.xlane.xlu1 %7367  ;;  %13476 = vmatprep.subr.mxu1 %v17758_v61  ;;  %v7392_v4 = vmul.f32 %v14231_v27, %v16329_v41  ;;  %v17893_v27 = vld [vmem:[#allocation40_spill] sm:$0xff] }
 0x90c   :  { %14242 = vrcp.f32 %v7368_v34  ;;  %v7365_v6 = vpop.xlane.xlu0 %7364  ;;  %v7390_v5 = vmul.f32 %v14233_v28, %v16331_v33  ;;  %v17878_v33 = vld [vmem:[#allocation9_spill] sm:$0xff]  ;;  %v17894_v34 = vld [vmem:[#allocation46_spill] sm:$0xff] }
 0x90d   :  { %14244 = vrcp.f32 %v7365_v6  ;;  %13469 = vmatmul.mubr.msk.f32.vlgmr.msra.gmra.mrb[108].mxu1 %vm1891_vm3, %v7392_v4 }
 0x90e   :  { %v14235_v23 = vpop.eup %14234  ;;  %13464 = vmatmul.mubr.msk.f32.vlgmr.msra.gmra.mrb[108].mxu0 %vm1891_vm3, %v7390_v5  ;;  %13477 = vmatpush3.msra.mxu1 %v16273_v16 }
 0x90f   :  { %v14237_v36 = vpop.eup %14236  ;;  %13472 = vmatpush3.msra.mxu0 %v17874_v39  ;;  %13473 = vmatprep.mubr.msk.f32.mxu0 %vm14399_vm1, %v17758_v61  ;;  %v7396_v51 = vmul.f32 %v14235_v23, %v16338_v29  ;;  %v16519_v37 = vpop.permute.xlu1 %9256 }
 0x910   :  { %v7371_v22 = vpop.xlane.xlu0 %7370  ;;  %13478 = vmatprep.mubr.msk.f32.mxu1 %vm14399_vm1, %v17758_v61  ;;  %13481 = vmatprep.subr.mxu0 %v17758_v61  ;;  %v7394_v45 = vmul.f32 %v14237_v36, %v16340_v20 }
 0x911   :  { %14246 = vrcp.f32 %v7371_v22  ;;  %13486 = vmatprep.subr.mxu1 %v17758_v61  ;;  %13479 = vmatmul.mubr.msk.f32.vlgmr.msra.gmra.mrb[110].mxu1 %vm1891_vm3, %v7396_v51 }
 0x912   :  { %v14239_v13 = vpop.eup %14238  ;;  %13474 = vmatmul.mubr.msk.f32.vlgmr.msra.gmra.mrb[110].mxu0 %vm1891_vm3, %v7394_v45  ;;  %13487 = vmatpush3.msra.mxu1 %v17875_v63 }
 0x913   :  { %v14241_v53 = vpop.eup %14240  ;;  %13482 = vmatpush3.msra.mxu0 %v17876_v32  ;;  %13483 = vmatprep.mubr.msk.f32.mxu0 %vm14399_vm1, %v17758_v61  ;;  %v7400_v16 = vmul.f32 %v14239_v13, %v16346_v7  ;;  %v17879_v7 = vld [vmem:[#allocation41_spill] sm:$0xff] }
 0x914   :  { %13488 = vmatprep.mubr.msk.f32.mxu1 %vm14399_vm1, %v17758_v61  ;;  %13491 = vmatprep.subr.mxu0 %v17758_v61  ;;  %v7398_v31 = vmul.f32 %v14241_v53, %v16348_v54  ;;  %v9179_v2 = vpop.permute.xlu0 %9178 }
 0x915   :  { %13496 = vmatprep.subr.mxu1 %v17758_v61  ;;  %13489 = vmatmul.mubr.msk.f32.vlgmr.msra.gmra.mrb[112].mxu1 %vm1891_vm3, %v7400_v16 }
 0x916   :  { %v14243_v58 = vpop.eup %14242  ;;  %13484 = vmatmul.mubr.msk.f32.vlgmr.msra.gmra.mrb[112].mxu0 %vm1891_vm3, %v7398_v31  ;;  %13497 = vmatpush3.msra.mxu1 %v17877_v21 }
 0x917   :  { %v14245_v41 = vpop.eup %14244  ;;  %13492 = vmatpush3.msra.mxu0 %v17878_v33  ;;  %13493 = vmatprep.mubr.msk.f32.mxu0 %vm14399_vm1, %v17758_v61  ;;  %v7404_v29 = vmul.f32 %v14243_v58, %v16354_v44 }
 0x918   :  { %13498 = vmatprep.mubr.msk.f32.mxu1 %vm14399_vm1, %v17758_v61  ;;  %13501 = vmatprep.subr.mxu0 %v17758_v61  ;;  %v7402_v20 = vmul.f32 %v14245_v41, %v16356_v49  ;;  %v17881_v49 = vld [vmem:[#allocation8_spill] sm:$0xff] }
 0x919   :  { %13506 = vmatprep.subr.mxu1 %v17758_v61  ;;  %13499 = vmatmul.mubr.msk.f32.vlgmr.msra.gmra.mrb[114].mxu1 %vm1891_vm3, %v7404_v29 }
 0x91a   :  { %13494 = vmatmul.mubr.msk.f32.vlgmr.msra.gmra.mrb[114].mxu0 %vm1891_vm3, %v7402_v20  ;;  %13507 = vmatpush3.msra.mxu1 %v17879_v7 }
 0x91b   :  { %v14247_v54 = vpop.eup %14246  ;;  %13502 = vmatpush3.msra.mxu0 %v17880_v10  ;;  %13503 = vmatprep.mubr.msk.f32.mxu0 %vm14399_vm1, %v17758_v61 }
 0x91c   :  { %13511 = vmatprep.subr.mxu0 %v17758_v61  ;;  %v7406_v44 = vmul.f32 %v14247_v54, %v16362_v57  ;;  %13508 = vmatprep.mubr.msk.f32.mxu1 %vm14399_vm1, %v17758_v61 }
 0x91d   :  { %13516 = vmatprep.subr.mxu1 %v17758_v61 }
 0x91e   :  { %13504 = vmatmul.mubr.msk.f32.vlgmr.msra.gmra.mrb[116].mxu0 %vm1891_vm3, %v7406_v44 }
 0x91f   :  { %13512 = vmatpush3.msra.mxu0 %v17881_v49  ;;  %13513 = vmatprep.mubr.msk.f32.mxu0 %vm14399_vm1, %v17758_v61 }
 0x920   :  { %13521 = vmatprep.subr.mxu0 %v17758_v61 }
 0x940   :  { %v7374_v25 = vpop.xlane.xlu1 %7373 }
 0x941   :  { %14248 = vrcp.f32 %v7374_v25 }
 0x944   :  { %v7377_v57 = vpop.xlane.xlu1 %7376 }
 0x945   :  { %14250 = vrcp.f32 %v7377_v57  ;;  %v7380_v24 = vpop.xlane.xlu0 %7379 }
 0x946   :  { %14252 = vrcp.f32 %v7380_v24 }
 0x948   :  { %v9415_v9 = vpop.permute.xlu1 %9414 }
 0x949   :  { %v9337_v30 = vpop.permute.xlu0 %9336 }
 0x94b   :  { %v14249_v43 = vpop.eup %14248 }
 0x94c   :  { %v16521_v38 = vpop.permute.xlu1 %9412  ;;  %v7408_v60 = vmul.f32 %v14249_v43, %v16373_v35  ;;  %v17883_v35 = vld [vmem:[#allocation39_spill] sm:$0xff] }
 0x94d   :  { %v9335_v12 = vpop.permute.xlu0 %9334 }
 0x94e   :  { %13509 = vmatmul.mubr.msk.f32.vlgmr.msra.gmra.mrb[116].mxu1 %vm1891_vm3, %v7408_v60 }
 0x94f   :  { %v14251_v14 = vpop.eup %14250  ;;  %13517 = vmatpush3.msra.mxu1 %v17882_v48  ;;  %13518 = vmatprep.mubr.msk.f32.mxu1 %vm14399_vm1, %v17758_v61 }
 0x950   :  { %v14253_v55 = vpop.eup %14252  ;;  %v7410_v26 = vmul.f32 %v14251_v14, %v16377_v46  ;;  %13526 = vmatprep.subr.mxu1 %v17758_v61  ;;  %v9571_v50 = vpop.permute.xlu1 %9570  ;;  %v17884_v46 = vld [vmem:[#allocation43_spill] sm:$0xff] }
 0x951   :  { %v9493_v42 = vpop.permute.xlu0 %9492  ;;  %v7412_v56 = vmul.f32 %v14253_v55, %v16379_v11  ;;  %v17885_v11 = vld [vmem:[#allocation11_spill] sm:$0xff] }
 0x952   :  { %13514 = vmatmul.mubr.msk.f32.vlgmr.msra.gmra.mrb[118].mxu0 %vm1891_vm3, %v7410_v26 }
 0x953   :  { %13519 = vmatmul.mubr.msk.f32.vlgmr.msra.gmra.mrb[118].mxu1 %vm1891_vm3, %v7412_v56  ;;  %13522 = vmatpush3.xpose.msk.msra.mxu0 %vm674_vm2, %v17883_v35 }
 0x954   :  { %13523 = vmatprep.mubr.msk.f32.mxu0 %vm14399_vm1, %v17758_v61  ;;  %13531 = vmatprep.subr.mxu0 %v17758_v61  ;;  %v9569_v59 = vpop.permute.xlu1 %9568 }
 0x955   :  { %v9491_v47 = vpop.permute.xlu0 %9490  ;;  %13528 = vmatprep.mubr.msk.f32.mxu1 %vm14399_vm1, %v17758_v61 }
 0x956   :  { %13527 = vmatpush3.xpose.msk.msra.mxu1 %vm674_vm2, %v17884_v46  ;;  %13524 = vmatmul.mubr.msk.f32.vlgmr.msra.gmra.mrb[120].mxu0 %vm674_vm2, %v17885_v11 }
 0x957   :  { %13532 = vmatpush3.xpose.msk.msra.mxu0 %vm674_vm2, %v17886_v62  ;;  %13536 = vmatprep.subr.mxu1 %v17758_v61 }
 0x958   :  { %13533 = vmatprep.mubr.msk.f32.mxu0 %vm14399_vm1, %v17758_v61  ;;  %13541 = vmatprep.subr.mxu0 %v17758_v61  ;;  %v9727_v8 = vpop.permute.xlu1 %9726 }
 0x959   :  { %13529 = vmatmul.mubr.msk.f32.vlgmr.msra.gmra.mrb[120].mxu1 %vm674_vm2, %v17887_v52  ;;  %v9649_v18 = vpop.permute.xlu0 %9648 }
 0x95a   :  { %13537 = vmatpush3.xpose.msk.msra.mxu1 %vm674_vm2, %v17888_v17  ;;  %13534 = vmatmul.mubr.msk.f32.vlgmr.msra.gmra.mrb[122].mxu0 %vm674_vm2, %v17889_v19 }
 0x95b   :  { %13542 = vmatpush3.xpose.msk.msra.mxu0 %vm674_vm2, %v17890_v40  ;;  %13538 = vmatprep.mubr.msk.f32.mxu1 %vm14399_vm1, %v17758_v61 }
 0x95c   :  { %13546 = vmatprep.subr.mxu1 %v17758_v61  ;;  %13543 = vmatprep.mubr.msk.f32.mxu0 %vm14399_vm1, %v17758_v61 }
 0x95d   :  { %13539 = vmatmul.mubr.msk.f32.vlgmr.msra.gmra.mrb[122].mxu1 %vm674_vm2, %v17891_v0  ;;  %13551 = vmatprep.subr.mxu0 %v17758_v61  ;;  %v9647_v28 = vpop.permute.xlu0 %9646 }
 0x95e   :  { %13547 = vmatpush3.xpose.msk.msra.mxu1 %vm674_vm2, %v17892_v3  ;;  %13544 = vmatmul.mubr.msk.f32.vlgmr.msra.gmra.mrb[124].mxu0 %vm674_vm2, %v17893_v27 }
 0x95f   :  { %13552 = vmatpush3.xpose.msk.msra.mxu0 %vm674_vm2, %v16385_v1  ;;  %13548 = vmatprep.mubr.msk.f32.mxu1 %vm14399_vm1, %v17758_v61  ;;  %v9725_v1 = vpop.permute.xlu1 %9724 }
 0x960   :  { %13556 = vmatprep.subr.mxu1 %v17758_v61  ;;  %13553 = vmatprep.mubr.msk.f32.mxu0 %vm14399_vm1, %v17758_v61 }
 0x961   :  { %13549 = vmatmul.mubr.msk.f32.vlgmr.msra.gmra.mrb[124].mxu1 %vm674_vm2, %v17894_v34  ;;  %13561 = vmatprep.subr.mxu0 %v17758_v61  ;;  %v9805_v4 = vpop.permute.xlu0 %9804 }
 0x962   :  { %13557 = vmatpush3.xpose.msk.msra.mxu1 %vm674_vm2, %v16441_v15  ;;  %13554 = vmatmul.mubr.msk.f32.vlgmr.msra.gmra.mrb[126].mxu0 %vm674_vm2, %v9179_v2 }
 0x963   :  { %13562 = vmatpush3.xpose.msk.msra.mxu0 %vm674_vm2, %v9337_v30  ;;  %13558 = vmatprep.mubr.msk.f32.mxu1 %vm14399_vm1, %v17758_v61  ;;  %v9883_v15 = vpop.permute.xlu1 %9882 }
 0x964   :  { %13566 = vmatprep.subr.mxu1 %v17758_v61  ;;  %13563 = vmatprep.mubr.msk.f32.mxu0 %vm14399_vm1, %v17758_v61 }
 0x965   :  { %13559 = vmatmul.mubr.msk.f32.vlgmr.msra.gmra.mrb[126].mxu1 %vm674_vm2, %v16519_v37  ;;  %13571 = vmatprep.subr.mxu0 %v17758_v61  ;;  %v9803_v6 = vpop.permute.xlu0 %9802 }
 0x966   :  { %13567 = vmatpush3.xpose.msk.msra.mxu1 %vm674_vm2, %v9415_v9  ;;  %13564 = vmatmul.mubr.msk.f32.vlgmr.msra.gmra.mrb[128].mxu0 %vm674_vm2, %v9335_v12 }
 0x967   :  { %13572 = vmatpush3.xpose.msk.msra.mxu0 %vm674_vm2, %v9493_v42  ;;  %13568 = vmatprep.mubr.msk.f32.mxu1 %vm14399_vm1, %v17758_v61  ;;  %v9881_v5 = vpop.permute.xlu1 %9880 }
 0x968   :  { %13576 = vmatprep.subr.mxu1 %v17758_v61  ;;  %13573 = vmatprep.mubr.msk.f32.mxu0 %vm14399_vm1, %v17758_v61 }
 0x969   :  { %13569 = vmatmul.mubr.msk.f32.vlgmr.msra.gmra.mrb[128].mxu1 %vm674_vm2, %v16521_v38  ;;  %13581 = vmatprep.subr.mxu0 %v17758_v61  ;;  %v10135_v23 = vpop.permute.xlu0 %10134 }
 0x96a   :  { %13577 = vmatpush3.xpose.msk.msra.mxu1 %vm674_vm2, %v9571_v50  ;;  %13574 = vmatmul.mubr.msk.f32.vlgmr.msra.gmra.mrb[130].mxu0 %vm674_vm2, %v9491_v47 }
 0x96b   :  { %13582 = vmatpush3.xpose.msk.msra.mxu0 %vm674_vm2, %v9649_v18  ;;  %13578 = vmatprep.mubr.msk.f32.mxu1 %vm14399_vm1, %v17758_v61  ;;  %v10211_v36 = vpop.permute.xlu1 %10210 }
 0x96c   :  { %13586 = vmatprep.subr.mxu1 %v17758_v61  ;;  %13583 = vmatprep.mubr.msk.f32.mxu0 %vm14399_vm1, %v17758_v61 }
 0x96d   :  { %13579 = vmatmul.mubr.msk.f32.vlgmr.msra.gmra.mrb[130].mxu1 %vm674_vm2, %v9569_v59  ;;  %13591 = vmatprep.subr.mxu0 %v17758_v61 }
 0x96e   :  { %13587 = vmatpush3.xpose.msk.msra.mxu1 %vm674_vm2, %v9727_v8  ;;  %13584 = vmatmul.mubr.msk.f32.vlgmr.msra.gmra.mrb[132].mxu0 %vm674_vm2, %v9647_v28 }
 0x96f   :  { %13592 = vmatpush3.xpose.msk.msra.mxu0 %vm674_vm2, %v9805_v4  ;;  %13588 = vmatprep.mubr.msk.f32.mxu1 %vm14399_vm1, %v17758_v61 }
 0x970   :  { %13596 = vmatprep.subr.mxu1 %v17758_v61  ;;  %13593 = vmatprep.mubr.msk.f32.mxu0 %vm14399_vm1, %v17758_v61 }
 0x971   :  { %13589 = vmatmul.mubr.msk.f32.vlgmr.msra.gmra.mrb[132].mxu1 %vm674_vm2, %v9725_v1  ;;  %13601 = vmatprep.subr.mxu0 %v17758_v61 }
 0x972   :  { %13597 = vmatpush3.xpose.msk.msra.mxu1 %vm674_vm2, %v9883_v15  ;;  %13594 = vmatmul.mubr.msk.f32.vlgmr.msra.gmra.mrb[134].mxu0 %vm674_vm2, %v9803_v6 }
 0x973   :  { %13602 = vmatpush3.msra.mxu0 %v10135_v23  ;;  %13598 = vmatprep.mubr.msk.f32.mxu1 %vm14399_vm1, %v17758_v61 }
 0x974   :  { %13606 = vmatprep.subr.mxu1 %v17758_v61  ;;  %13603 = vmatprep.mubr.msk.f32.mxu0 %vm14399_vm1, %v17758_v61 }
 0x975   :  { %13599 = vmatmul.mubr.msk.f32.vlgmr.msra.gmra.mrb[134].mxu1 %vm674_vm2, %v9881_v5  ;;  %13611 = vmatprep.subr.mxu0 %v17758_v61 }
 0x976   :  { %13607 = vmatpush3.msra.mxu1 %v10211_v36  ;;  %13608 = vmatprep.mubr.msk.f32.mxu1 %vm14399_vm1, %v17758_v61 }
 0x977   :  { %13616 = vmatprep.subr.mxu1 %v17758_v61 }
 0x9a9   :  { %v16635_v39 = vpop.f32.mrb[104].mxu0 }
 0x9aa   :  { %v13445_v51 = vpop.f32.mrb[105].mxu0 }
 0x9ad   :  { %v16637_v22 = vpop.f32.mrb[106].mxu0 }
 0x9ae   :  { %v13455_v45 = vpop.f32.mrb[107].mxu0 }
 0x9d8   :  { %v16639_v13 = vpop.f32.mrb[104].mxu1 }
 0x9d9   :  { %v13450_v63 = vpop.f32.mrb[105].mxu1 }
 0x9dc   :  { %v16641_v53 = vpop.f32.mrb[106].mxu1 }
 0x9dd   :  { %v13460_v32 = vpop.f32.mrb[107].mxu1 }
 0x9e0   :  { %v16643_v16 = vpop.f32.mrb[108].mxu1 }
 0x9e1   :  { %v16645_v31 = vpop.f32.mrb[108].mxu0  ;;  %v13470_v58 = vpop.f32.mrb[109].mxu1 }
 0x9e2   :  { %v13465_v21 = vpop.f32.mrb[109].mxu0 }
 0x9e4   :  { %v16647_v41 = vpop.f32.mrb[110].mxu1 }
 0x9e5   :  { %v16649_v33 = vpop.f32.mrb[110].mxu0  ;;  %v13480_v29 = vpop.f32.mrb[111].mxu1 }
 0x9e6   :  { %v13475_v20 = vpop.f32.mrb[111].mxu0 }
 0x9e8   :  { %v16651_v7 = vpop.f32.mrb[112].mxu1 }
 0x9e9   :  { %v16653_v54 = vpop.f32.mrb[112].mxu0  ;;  %v13490_v10 = vpop.f32.mrb[113].mxu1 }
 0x9ea   :  { %v13485_v44 = vpop.f32.mrb[113].mxu0 }
 0x9ec   :  { %v16655_v49 = vpop.f32.mrb[114].mxu1 }
 0x9ed   :  { %v16657_v37 = vpop.f32.mrb[114].mxu0  ;;  %v13500_v25 = vpop.f32.mrb[115].mxu1 }
 0x9ee   :  { %v13495_v2 = vpop.f32.mrb[115].mxu0 }
 0x9f1   :  { %v16659_v57 = vpop.f32.mrb[116].mxu0 }
 0x9f2   :  { %v13505_v24 = vpop.f32.mrb[117].mxu0 }
 0xa21   :  { %v16661_v9 = vpop.f32.mrb[116].mxu1 }
 0xa22   :  { %v13510_v30 = vpop.f32.mrb[117].mxu1 }
 0xa25   :  { %v16663_v43 = vpop.f32.mrb[118].mxu0 }
 0xa26   :  { %v16665_v38 = vpop.f32.mrb[118].mxu1  ;;  %v13515_v60 = vpop.f32.mrb[119].mxu0 }
 0xa27   :  { %v13520_v12 = vpop.f32.mrb[119].mxu1 }
 0xa29   :  { %v16667_v14 = vpop.f32.mrb[120].mxu0 }
 0xa2a   :  { %v13525_v48 = vpop.f32.mrb[121].mxu0  ;;  %v9958_v55 = vsel %vm1891_vm3, %v16667_v14, -inf }
 0xa2b   :  { %9959 = vmax.xlane.f32.xlu0 %v9958_v55  ;;  %v17895_v48 = vld [vmem:[#allocation18_spill] sm:$0xff]  ;;  %v17896_v55 = vld [vmem:[#allocation21_spill] sm:$0xff] }
 0xa2c   :  { %v16671_v26 = vpop.f32.mrb[120].mxu1 }
 0xa2d   :  { %v13530_v50 = vpop.f32.mrb[121].mxu1  ;;  %v16673_v42 = vpop.f32.mrb[122].mxu0  ;;  %v9961_v56 = vsel %vm1891_vm3, %v16671_v26, -inf }
 0xa2e   :  { %9962 = vmax.xlane.f32.xlu1 %v9961_v56  ;;  %v13535_v35 = vpop.f32.mrb[123].mxu0  ;;  %v9964_v47 = vsel %vm1891_vm3, %v16673_v42, -inf  ;;  %v17897_v50 = vld [vmem:[#allocation24_spill] sm:$0xff] }
 0xa2f   :  { %9965 = vmax.xlane.f32.xlu0 %v9964_v47  ;;  %v17898_v35 = vld [vmem:[#allocation22_spill] sm:$0xff]  ;;  %v16739_v47 = vpop.permute.xlu1 %10362 }
 0xa30   :  { %v16679_v46 = vpop.f32.mrb[122].mxu1 }
 0xa31   :  { %v13540_v11 = vpop.f32.mrb[123].mxu1  ;;  %v16681_v59 = vpop.f32.mrb[124].mxu0  ;;  %v9967_v52 = vsel %vm1891_vm3, %v16679_v46, -inf }
 0xa32   :  { %v13545_v62 = vpop.f32.mrb[125].mxu0  ;;  %v9970_v0 = vsel %vm1891_vm3, %v16681_v59, -inf }
 0xa33   :  { %9968 = vmax.xlane.f32.xlu0 %v9967_v52  ;;  %v16741_v11 = vpop.permute.xlu1 %10438  ;;  %v16743_v62 = vpop.permute.xlu0 %10286 }
 0xa34   :  { %v16685_v18 = vpop.f32.mrb[124].mxu1 }
 0xa35   :  { %v13550_v17 = vpop.f32.mrb[125].mxu1  ;;  %v16687_v19 = vpop.f32.mrb[126].mxu0  ;;  %v9973_v40 = vsel %vm1891_vm3, %v16685_v18, -inf }
 0xa36   :  { %9974 = vmax.xlane.f32.xlu1 %v9973_v40  ;;  %v13555_v8 = vpop.f32.mrb[127].mxu0  ;;  %v9976_v4 = vsel %vm1891_vm3, %v16687_v19, -inf }
 0xa37   :  { %9971 = vmax.xlane.f32.xlu0 %v9970_v0  ;;  %v16745_v52 = vpop.permute.xlu1 %10514  ;;  %v16747_v17 = vpop.permute.xlu0 %10590 }
 0xa38   :  { %v16693_v3 = vpop.f32.mrb[126].mxu1 }
 0xa39   :  { %v13560_v27 = vpop.f32.mrb[127].mxu1  ;;  %v9979_v28 = vsel %vm1891_vm3, %v16693_v3, -inf  ;;  %v16697_v34 = vpop.f32.mrb[128].mxu0 }
 0xa3a   :  { %9980 = vmax.xlane.f32.xlu1 %v9979_v28  ;;  %v13565_v1 = vpop.f32.mrb[129].mxu0  ;;  %v9982_v51 = vsel %vm1891_vm3, %v16697_v34, -inf }
 0xa3b   :  { %9977 = vmax.xlane.f32.xlu0 %v9976_v4  ;;  %v16749_v40 = vpop.permute.xlu1 %10666  ;;  %v16751_v8 = vpop.permute.xlu0 %10742 }
 0xa3c   :  { %v16701_v15 = vpop.f32.mrb[128].mxu1 }
 0xa3d   :  { %v13570_v6 = vpop.f32.mrb[129].mxu1  ;;  %v9985_v5 = vsel %vm1891_vm3, %v16701_v15, -inf  ;;  %v16705_v23 = vpop.f32.mrb[130].mxu0 }
 0xa3e   :  { %9986 = vmax.xlane.f32.xlu1 %v9985_v5  ;;  %v13575_v36 = vpop.f32.mrb[131].mxu0  ;;  %v9988_v29 = vsel %vm1891_vm3, %v16705_v23, -inf }
 0xa3f   :  { %9983 = vmax.xlane.f32.xlu0 %v9982_v51  ;;  %v16753_v0 = vpop.permute.xlu1 %10818 }
 0xa40   :  { %v16709_v45 = vpop.f32.mrb[130].mxu1 }
 0xa41   :  { %v13580_v63 = vpop.f32.mrb[131].mxu1  ;;  %v9991_v32 = vsel %vm1891_vm3, %v16709_v45, -inf  ;;  %v16713_v58 = vpop.f32.mrb[132].mxu0 }
 0xa42   :  { %9992 = vmax.xlane.f32.xlu1 %v9991_v32  ;;  %v13585_v21 = vpop.f32.mrb[133].mxu0  ;;  %v9994_v24 = vsel %vm1891_vm3, %v16713_v58, -inf }
 0xa43   :  { %9989 = vmax.xlane.f32.xlu0 %v9988_v29 }
 0xa44   :  { %v16717_v20 = vpop.f32.mrb[132].mxu1 }
 0xa45   :  { %v13590_v10 = vpop.f32.mrb[133].mxu1  ;;  %v9997_v44 = vsel %vm1891_vm3, %v16717_v20, -inf  ;;  %v16721_v25 = vpop.f32.mrb[134].mxu0 }
 0xa46   :  { %9998 = vmax.xlane.f32.xlu1 %v9997_v44  ;;  %v13595_v2 = vpop.f32.mrb[135].mxu0  ;;  %v10000_v12 = vsel %vm1891_vm3, %v16721_v25, -inf }
 0xa47   :  { %9995 = vmax.xlane.f32.xlu0 %v9994_v24 }
 0xa48   :  { %v16725_v30 = vpop.f32.mrb[134].mxu1 }
 0xa49   :  { %v13600_v60 = vpop.f32.mrb[135].mxu1  ;;  %v10003_v56 = vsel %vm1891_vm3, %v16725_v30, -inf }
 0xa4b   :  { %10001 = vmax.xlane.f32.xlu0 %v10000_v12 }
 0xa57   :  { %10970 = vrot.lane.b32.xlu1 %v17895_v48, %s14402_s21 }
 0xa61   :  { %10894 = vrot.lane.b32.xlu0 %v17896_v55, %s14402_s21 }
 0xa65   :  { %11046 = vrot.lane.b32.xlu0 %v17897_v50, %s14402_s21 }
 0xa7b   :  { %10004 = vmax.xlane.f32.xlu1 %v10003_v56 }
 0xa8c   :  { %11122 = vrot.lane.b32.xlu1 %v17898_v35, %s14402_s21 }
 0xab8   :  { %v9960_v27 = vpop.xlane.xlu0 %9959 }
 0xab9   :  { %v10006_v28 = vsub.f32 %v16667_v14, %v9960_v27 }
 0xabb   :  { %v10022_v1 = vmul.f32 1.442695, %v10006_v28  ;;  %v9963_v4 = vpop.xlane.xlu1 %9962 }
 0xabc   :  { %v10007_v6 = vsub.f32 %v16671_v26, %v9963_v4  ;;  %v9966_v5 = vpop.xlane.xlu0 %9965 }
 0xabd   :  { %14254 = vpow2.f32 %v10022_v1  ;;  %v10008_v36 = vsub.f32 %v16673_v42, %v9966_v5 }
 0xabe   :  { %v10024_v51 = vmul.f32 1.442695, %v10007_v6 }
 0xabf   :  { %v10026_v63 = vmul.f32 1.442695, %v10008_v36 }
 0xac0   :  { %14256 = vpow2.f32 %v10024_v51  ;;  %v9969_v32 = vpop.xlane.xlu0 %9968 }
 0xac1   :  { %14258 = vpow2.f32 %v10026_v63  ;;  %v10009_v21 = vsub.f32 %v16679_v46, %v9969_v32 }
 0xac3   :  { %v10028_v29 = vmul.f32 1.442695, %v10009_v21  ;;  %v9975_v10 = vpop.xlane.xlu1 %9974 }
 0xac4   :  { %v10011_v44 = vsub.f32 %v16685_v18, %v9975_v10  ;;  %v9972_v14 = vpop.xlane.xlu0 %9971 }
 0xac5   :  { %14260 = vpow2.f32 %v10028_v29  ;;  %v10010_v2 = vsub.f32 %v16681_v59, %v9972_v14 }
 0xac6   :  { %v10032_v26 = vmul.f32 1.442695, %v10011_v44 }
 0xac7   :  { %v16761_v24 = vpop.eup %14254  ;;  %v10030_v60 = vmul.f32 1.442695, %v10010_v2  ;;  %v9981_v42 = vpop.xlane.xlu1 %9980 }
 0xac8   :  { %14262 = vpow2.f32 %v10032_v26  ;;  %v10013_v12 = vsub.f32 %v16693_v3, %v9981_v42  ;;  %v9978_v48 = vpop.xlane.xlu0 %9977  ;;  %v10054_v46 = vsel %vm1891_vm3, %v16761_v24, 0.0 }
 0xac9   :  { %14264 = vpow2.f32 %v10030_v60  ;;  %v10012_v55 = vsub.f32 %v16687_v19, %v9978_v48  ;;  %10055 = vadd.xlane.f32.xlu0 %v10054_v46 }
 0xaca   :  { %v16767_v18 = vpop.eup %14256  ;;  %v10036_v50 = vmul.f32 1.442695, %v10013_v12 }
 0xacb   :  { %v16769_v59 = vpop.eup %14258  ;;  %v10034_v56 = vmul.f32 1.442695, %v10012_v55  ;;  %v9987_v35 = vpop.xlane.xlu1 %9986  ;;  %v10057_v27 = vsel %vm1891_vm3, %v16767_v18, 0.0 }
 0xacc   :  { %14266 = vpow2.f32 %v10036_v50  ;;  %v10015_v3 = vsub.f32 %v16701_v15, %v9987_v35  ;;  %10058 = vadd.xlane.f32.xlu1 %v10057_v27  ;;  %v9984_v28 = vpop.xlane.xlu0 %9983  ;;  %v10060_v1 = vsel %vm1891_vm3, %v16769_v59, 0.0 }
 0xacd   :  { %14268 = vpow2.f32 %v10034_v56  ;;  %v10014_v19 = vsub.f32 %v16697_v34, %v9984_v28  ;;  %10061 = vadd.xlane.f32.xlu0 %v10060_v1 }
 0xace   :  { %v10040_v4 = vmul.f32 1.442695, %v10015_v3 }
 0xacf   :  { %v16777_v6 = vpop.eup %14260  ;;  %v10038_v5 = vmul.f32 1.442695, %v10014_v19  ;;  %v9993_v36 = vpop.xlane.xlu1 %9992 }
 0xad0   :  { %14270 = vpow2.f32 %v10040_v4  ;;  %v10017_v51 = vsub.f32 %v16709_v45, %v9993_v36  ;;  %v9990_v63 = vpop.xlane.xlu0 %9989  ;;  %v10063_v15 = vsel %vm1891_vm3, %v16777_v6, 0.0 }
 0xad1   :  { %14272 = vpow2.f32 %v10038_v5  ;;  %v10016_v32 = vsub.f32 %v16705_v23, %v9990_v63  ;;  %10064 = vadd.xlane.f32.xlu1 %v10063_v15 }
 0xad2   :  { %v16783_v21 = vpop.eup %14262  ;;  %v10044_v34 = vmul.f32 1.442695, %v10017_v51 }
 0xad3   :  { %v16785_v29 = vpop.eup %14264  ;;  %v10042_v10 = vmul.f32 1.442695, %v10016_v32  ;;  %v9999_v44 = vpop.xlane.xlu1 %9998  ;;  %v10069_v45 = vsel %vm1891_vm3, %v16783_v21, 0.0  ;;  %v17899_v32 = vld [vmem:[#allocation25_spill] sm:$0xff] }
 0xad4   :  { %14274 = vpow2.f32 %v10044_v34  ;;  %v10019_v14 = vsub.f32 %v16717_v20, %v9999_v44  ;;  %v9996_v2 = vpop.xlane.xlu0 %9995  ;;  %v10066_v26 = vsel %vm1891_vm3, %v16785_v29, 0.0  ;;  %v17900_v34 = vld [vmem:[#allocation28_spill] sm:$0xff]  ;;  %v17901_v44 = vld [vmem:[#allocation10_spill] sm:$0xff] }
 0xad5   :  { %14276 = vpow2.f32 %v10042_v10  ;;  %v10018_v23 = vsub.f32 %v16713_v58, %v9996_v2  ;;  %10070 = vadd.xlane.f32.xlu1 %v10069_v45  ;;  %10067 = vadd.xlane.f32.xlu0 %v10066_v26  ;;  %v17902_v26 = vld [vmem:[#allocation13_spill] sm:$0xff] }
 0xad6   :  { %v16793_v60 = vpop.eup %14266  ;;  %v10048_v42 = vmul.f32 1.442695, %v10019_v14 }
 0xad7   :  { %v16795_v12 = vpop.eup %14268  ;;  %v10046_v48 = vmul.f32 1.442695, %v10018_v23  ;;  %v10075_v46 = vsel %vm1891_vm3, %v16793_v60, 0.0  ;;  %v16836_v10 = vpop.permute.xlu1 %10970 }
 0xad8   :  { %14278 = vpow2.f32 %v10048_v42  ;;  %v10002_v20 = vpop.xlane.xlu0 %10001  ;;  %v10072_v55 = vsel %vm1891_vm3, %v16795_v12, 0.0 }
 0xad9   :  { %14280 = vpow2.f32 %v10046_v48  ;;  %v10020_v50 = vsub.f32 %v16721_v25, %v10002_v20  ;;  %10076 = vadd.xlane.f32.xlu1 %v10075_v46  ;;  %10073 = vadd.xlane.f32.xlu0 %v10072_v55  ;;  %v17907_v48 = vld [vmem:[#allocation26_spill] sm:$0xff]  ;;  %v17912_v20 = vld [vmem:[#allocation33_spill] sm:$0xff] }
 0xada   :  { %v16802_v58 = vpop.eup %14270 }
 0xadb   :  { %v16804_v56 = vpop.eup %14272  ;;  %v10050_v35 = vmul.f32 1.442695, %v10020_v50  ;;  %v10081_v27 = vsel %vm1891_vm3, %v16802_v58, 0.0 }
 0xadc   :  { %v10078_v3 = vsel %vm1891_vm3, %v16804_v56, 0.0  ;;  %v16887_v46 = vpop.permute.xlu0 %10894 }
 0xadd   :  { %14282 = vpow2.f32 %v10050_v35  ;;  %10082 = vadd.xlane.f32.xlu1 %v10081_v27  ;;  %10079 = vadd.xlane.f32.xlu0 %v10078_v3  ;;  %v17914_v35 = vld [vmem:[#allocation5_spill] sm:$0xff] }
 0xade   :  { %v16810_v28 = vpop.eup %14274 }
 0xadf   :  { %v16812_v1 = vpop.eup %14276  ;;  %v10087_v25 = vsel %vm1891_vm3, %v16810_v28, 0.0 }
 0xae0   :  { %v10084_v19 = vsel %vm1891_vm3, %v16812_v1, 0.0 }
 0xae1   :  { %10088 = vadd.xlane.f32.xlu1 %v10087_v25  ;;  %10085 = vadd.xlane.f32.xlu0 %v10084_v19 }
 0xae2   :  { %v16818_v4 = vpop.eup %14278 }
 0xae3   :  { %v16820_v5 = vpop.eup %14280  ;;  %v10093_v36 = vsel %vm1891_vm3, %v16818_v4, 0.0 }
 0xae4   :  { %v10090_v51 = vsel %vm1891_vm3, %v16820_v5, 0.0 }
 0xae5   :  { %10094 = vadd.xlane.f32.xlu1 %v10093_v36  ;;  %10091 = vadd.xlane.f32.xlu0 %v10090_v51 }
 0xae7   :  { %v16826_v63 = vpop.eup %14282 }
 0xae8   :  { %v10096_v15 = vsel %vm1891_vm3, %v16826_v63, 0.0 }
 0xae9   :  { %10097 = vadd.xlane.f32.xlu1 %v10096_v15 }
 0xafa   :  { %11274 = vrot.lane.b32.xlu1 %v17899_v32, %s14402_s21 }
 0xafe   :  { %5926 = vrot.lane.b32.xlu1 %v17900_v34, %s14402_s21 }
 0xb02   :  { %8647 = vrot.lane.b32.xlu1 %v16639_v13, %s14401_s4  ;;  %v17903_v13 = vld [vmem:[#allocation29_spill] sm:$0xff] }
 0xb06   :  { %5930 = vrot.lane.b32.xlu1 %v17901_v44, %s14402_s21 }
 0xb08   :  { %v10005_v14 = vpop.xlane.xlu1 %10004 }
 0xb09   :  { %v10021_v2 = vsub.f32 %v16725_v30, %v10005_v14  ;;  %v17906_v30 = vld [vmem:[#allocation7_spill] sm:$0xff] }
 0xb0a   :  { %8651 = vrot.lane.b32.xlu1 %v16641_v53, %s14401_s4  ;;  %v17904_v53 = vld [vmem:[#allocation34_spill] sm:$0xff] }
 0xb0b   :  { %v10052_v45 = vmul.f32 1.442695, %v10021_v2 }
 0xb0d   :  { %14284 = vpow2.f32 %v10052_v45 }
 0xb0e   :  { %5934 = vrot.lane.b32.xlu1 %v17902_v26, %s14402_s21 }
 0xb12   :  { %8655 = vrot.lane.b32.xlu1 %v16643_v16, %s14401_s4  ;;  %v17905_v16 = vld [vmem:[#allocation16_spill] sm:$0xff] }
 0xb16   :  { %5938 = vrot.lane.b32.xlu1 %v17903_v13, %s14402_s21 }
 0xb17   :  { %v16849_v23 = vpop.eup %14284 }
 0xb18   :  { %v10099_v42 = vsel %vm1891_vm3, %v16849_v23, 0.0 }
 0xb19   :  { %10100 = vadd.xlane.f32.xlu0 %v10099_v42 }
 0xb1a   :  { %8659 = vrot.lane.b32.xlu1 %v16647_v41, %s14401_s4  ;;  %v17908_v41 = vld [vmem:[#allocation27_spill] sm:$0xff] }
 0xb1e   :  { %5942 = vrot.lane.b32.xlu1 %v17904_v53, %s14402_s21 }
 0xb22   :  { %8663 = vrot.lane.b32.xlu1 %v16651_v7, %s14401_s4  ;;  %v17909_v7 = vld [vmem:[#allocation6_spill] sm:$0xff] }
 0xb26   :  { %5946 = vrot.lane.b32.xlu1 %v17905_v16, %s14402_s21 }
 0xb2a   :  { %8667 = vrot.lane.b32.xlu1 %v16655_v49, %s14401_s4  ;;  %v17910_v49 = vld [vmem:[#allocation19_spill] sm:$0xff] }
 0xb2e   :  { %5950 = vrot.lane.b32.xlu1 %v17906_v30, %s14402_s21 }
 0xb2f   :  { %11198 = vrot.lane.b32.xlu0 %v17907_v48, %s14402_s21 }
 0xb32   :  { %8671 = vrot.lane.b32.xlu1 %v16661_v9, %s14401_s4  ;;  %v17911_v9 = vld [vmem:[#allocation17_spill] sm:$0xff] }
 0xb33   :  { %5924 = vrot.lane.b32.xlu0 %v17908_v41, %s14402_s21 }
 0xb36   :  { %5954 = vrot.lane.b32.xlu1 %v17909_v7, %s14402_s21 }
 0xb37   :  { %8645 = vrot.lane.b32.xlu0 %v16635_v39, %s14401_s4  ;;  %v16891_v39 = vpop.permute.xlu0 %11046 }
 0xb3a   :  { %8675 = vrot.lane.b32.xlu1 %v16665_v38, %s14401_s4  ;;  %v17913_v38 = vld [vmem:[#allocation30_spill] sm:$0xff] }
 0xb3b   :  { %5928 = vrot.lane.b32.xlu0 %v17910_v49, %s14402_s21 }
 0xb3f   :  { %8649 = vrot.lane.b32.xlu0 %v16637_v22, %s14401_s4  ;;  %v16895_v22 = vpop.permute.xlu1 %11122 }
 0xb43   :  { %5932 = vrot.lane.b32.xlu0 %v17911_v9, %s14402_s21 }
 0xb47   :  { %8653 = vrot.lane.b32.xlu0 %v16645_v31, %s14401_s4 }
 0xb4b   :  { %5936 = vrot.lane.b32.xlu0 %v17912_v20, %s14402_s21 }
 0xb4f   :  { %8657 = vrot.lane.b32.xlu0 %v16649_v33, %s14401_s4 }
 0xb53   :  { %5940 = vrot.lane.b32.xlu0 %v17913_v38, %s14402_s21 }
 0xb56   :  { %v10056_v55 = vpop.xlane.xlu0 %10055 }
 0xb57   :  { %8661 = vrot.lane.b32.xlu0 %v16653_v54, %s14401_s4  ;;  %14286 = vrcp.f32 %v10056_v55  ;;  %v17915_v54 = vld [vmem:[#allocation4_spill] sm:$0xff] }
 0xb59   :  { %v10059_v31 = vpop.xlane.xlu1 %10058 }
 0xb5a   :  { %14288 = vrcp.f32 %v10059_v31  ;;  %v10062_v50 = vpop.xlane.xlu0 %10061 }
 0xb5b   :  { %5944 = vrot.lane.b32.xlu0 %v17914_v35, %s14402_s21  ;;  %14290 = vrcp.f32 %v10062_v50 }
 0xb5e   :  { %v10065_v33 = vpop.xlane.xlu1 %10064 }
 0xb5f   :  { %14292 = vrcp.f32 %v10065_v33  ;;  %8665 = vrot.lane.b32.xlu0 %v16657_v37, %s14401_s4 }
 0xb61   :  { %v14287_v27 = vpop.eup %14286 }
 0xb62   :  { %v10071_v3 = vpop.xlane.xlu1 %10070  ;;  %v10068_v25 = vpop.xlane.xlu0 %10067  ;;  %v10103_v19 = vmul.f32 %v14287_v27, %v16761_v24 }
 0xb63   :  { %14294 = vrcp.f32 %v10071_v3  ;;  %5948 = vrot.lane.b32.xlu0 %v17915_v54, %s14402_s21 }
 0xb64   :  { %v14289_v36 = vpop.eup %14288  ;;  %14296 = vrcp.f32 %v10068_v25  ;;  %13604 = vmatmul.mubr.msk.f32.vlgmr.msra.gmra.mrb[136].mxu0 %vm1891_vm3, %v10103_v19 }
 0xb65   :  { %v14291_v51 = vpop.eup %14290  ;;  %v10105_v15 = vmul.f32 %v14289_v36, %v16767_v18  ;;  %13612 = vmatpush3.msra.mxu0 %v16743_v62  ;;  %13613 = vmatprep.mubr.msk.f32.mxu0 %vm14399_vm1, %v17758_v61 }
 0xb66   :  { %v10107_v37 = vmul.f32 %v14291_v51, %v16769_v59  ;;  %v10077_v32 = vpop.xlane.xlu1 %10076  ;;  %v10074_v24 = vpop.xlane.xlu0 %10073  ;;  %13621 = vmatprep.subr.mxu0 %v17758_v61 }
 0xb67   :  { %13609 = vmatmul.mubr.msk.f32.vlgmr.msra.gmra.mrb[136].mxu1 %vm1891_vm3, %v10105_v15  ;;  %14298 = vrcp.f32 %v10077_v32  ;;  %8669 = vrot.lane.b32.xlu0 %v16659_v57, %s14401_s4  ;;  %v17916_v57 = vld [vmem:[#allocation37_spill] sm:$0xff] }
 0xb68   :  { %13617 = vmatpush3.msra.mxu1 %v16739_v47  ;;  %14300 = vrcp.f32 %v10074_v24  ;;  %13614 = vmatmul.mubr.msk.f32.vlgmr.msra.gmra.mrb[138].mxu0 %vm1891_vm3, %v10107_v37 }
 0xb69   :  { %v14293_v62 = vpop.eup %14292  ;;  %13622 = vmatpush3.msra.mxu0 %v16741_v11  ;;  %13618 = vmatprep.mubr.msk.f32.mxu1 %vm14399_vm1, %v17758_v61 }
 0xb6a   :  { %v10109_v18 = vmul.f32 %v14293_v62, %v16777_v6  ;;  %v10083_v59 = vpop.xlane.xlu1 %10082  ;;  %v10080_v34 = vpop.xlane.xlu0 %10079  ;;  %13626 = vmatprep.subr.mxu1 %v17758_v61  ;;  %13623 = vmatprep.mubr.msk.f32.mxu0 %vm14399_vm1, %v17758_v61 }
 0xb6b   :  { %14302 = vrcp.f32 %v10083_v59  ;;  %5952 = vrot.lane.b32.xlu0 %v17916_v57, %s14402_s21  ;;  %13631 = vmatprep.subr.mxu0 %v17758_v61 }
 0xb6c   :  { %14304 = vrcp.f32 %v10080_v34  ;;  %13619 = vmatmul.mubr.msk.f32.vlgmr.msra.gmra.mrb[138].mxu1 %vm1891_vm3, %v10109_v18 }
 0xb6d   :  { %v14295_v47 = vpop.eup %14294  ;;  %13627 = vmatpush3.msra.mxu1 %v16745_v52  ;;  %13628 = vmatprep.mubr.msk.f32.mxu1 %vm14399_vm1, %v17758_v61 }
 0xb6e   :  { %v14297_v11 = vpop.eup %14296  ;;  %v10113_v6 = vmul.f32 %v14295_v47, %v16783_v21  ;;  %v10089_v44 = vpop.xlane.xlu1 %10088  ;;  %13636 = vmatprep.subr.mxu1 %v17758_v61  ;;  %v11447_v47 = vld [vmem:[%s17665_s5] sm:$0xff] }
 0xb6f   :  { %v10086_v14 = vpop.xlane.xlu0 %10085  ;;  %v10111_v2 = vmul.f32 %v14297_v11, %v16785_v29  ;;  %14306 = vrcp.f32 %v10089_v44  ;;  %8673 = vrot.lane.b32.xlu0 %v16663_v43, %s14401_s4  ;;  %v11448_v11 = vld [vmem:[%s17665_s5 + $0x8] sm:$0xff] }
 0xb70   :  { %14308 = vrcp.f32 %v10086_v14  ;;  %13629 = vmatmul.mubr.msk.f32.vlgmr.msra.gmra.mrb[140].mxu1 %vm1891_vm3, %v10113_v6  ;;  %v11449_v6 = vld [vmem:[%s17665_s5 + $0x10] sm:$0xff]  ;;  %v13913_v44 = vpack.c.bf16 %v11448_v11, %v11447_v47  ;;  %v11450_v14 = vld [vmem:[%s17665_s5 + $0x18] sm:$0xff] }
 0xb71   :  { %v14299_v52 = vpop.eup %14298  ;;  %13624 = vmatmul.mubr.msk.f32.vlgmr.msra.gmra.mrb[140].mxu0 %vm1891_vm3, %v10111_v2  ;;  %13637 = vmatpush3.msra.mxu1 %v16749_v40  ;;  %v13917_v2 = vpack.c.bf16 %v11450_v14, %v11449_v6 }
 0xb72   :  { %v14301_v45 = vpop.eup %14300  ;;  %v10117_v21 = vmul.f32 %v14299_v52, %v16793_v60  ;;  %13632 = vmatpush3.msra.mxu0 %v16747_v17  ;;  %v10095_v26 = vpop.xlane.xlu1 %10094  ;;  %13633 = vmatprep.mubr.msk.f32.mxu0 %vm14399_vm1, %v17758_v61  ;;  %v11451_v52 = vld [vmem:[%s17665_s5 + $0x20] sm:$0xff] }
 0xb73   :  { %v10092_v13 = vpop.xlane.xlu0 %10091  ;;  %v10115_v43 = vmul.f32 %v14301_v45, %v16795_v12  ;;  %14310 = vrcp.f32 %v10095_v26  ;;  %13638 = vmatprep.mubr.msk.f32.mxu1 %vm14399_vm1, %v17758_v61  ;;  %13641 = vmatprep.subr.mxu0 %v17758_v61  ;;  %v11452_v45 = vld [vmem:[%s17665_s5 + $0x28] sm:$0xff]  ;;  %v11453_v26 = vld [vmem:[%s17665_s5 + $0x30] sm:$0xff] }
 0xb74   :  { %14312 = vrcp.f32 %v10092_v13  ;;  %13646 = vmatprep.subr.mxu1 %v17758_v61  ;;  %13639 = vmatmul.mubr.msk.f32.vlgmr.msra.gmra.mrb[142].mxu1 %vm1891_vm3, %v10117_v21  ;;  %v13921_v21 = vpack.c.bf16 %v11452_v45, %v11451_v52  ;;  %v11454_v13 = vld [vmem:[%s17665_s5 + $0x38] sm:$0xff] }
 0xb75   :  { %v14303_v40 = vpop.eup %14302  ;;  %13634 = vmatmul.mubr.msk.f32.vlgmr.msra.gmra.mrb[142].mxu0 %vm1891_vm3, %v10115_v43  ;;  %13647 = vmatpush3.msra.mxu1 %v16753_v0  ;;  %v13925_v43 = vpack.c.bf16 %v11454_v13, %v11453_v26 }
 0xb76   :  { %v14305_v17 = vpop.eup %14304  ;;  %v10121_v29 = vmul.f32 %v14303_v40, %v16802_v58  ;;  %13642 = vmatpush3.msra.mxu0 %v16751_v8  ;;  %v10098_v60 = vpop.xlane.xlu1 %10097  ;;  %13643 = vmatprep.mubr.msk.f32.mxu0 %vm14399_vm1, %v17758_v61  ;;  %v11455_v40 = vld [vmem:[%s17665_s5 + $0x40] sm:$0xff] }
 0xb77   :  { %v10119_v12 = vmul.f32 %v14305_v17, %v16804_v56  ;;  %13648 = vmatprep.mubr.msk.f32.mxu1 %vm14399_vm1, %v17758_v61  ;;  %13651 = vmatprep.subr.mxu0 %v17758_v61  ;;  %14314 = vrcp.f32 %v10098_v60  ;;  %v11456_v17 = vld [vmem:[%s17665_s5 + $0x48] sm:$0xff]  ;;  %v11457_v60 = vld [vmem:[%s17665_s5 + $0x50] sm:$0xff] }
 0xb78   :  { %13656 = vmatprep.subr.mxu1 %v17758_v61  ;;  %13649 = vmatmul.mubr.msk.f32.vlgmr.msra.gmra.mrb[144].mxu1 %vm1891_vm3, %v10121_v29  ;;  %v13929_v29 = vpack.c.bf16 %v11456_v17, %v11455_v40 }
 0xb79   :  { %v14307_v0 = vpop.eup %14306  ;;  %13644 = vmatmul.mubr.msk.f32.vlgmr.msra.gmra.mrb[144].mxu0 %vm1891_vm3, %v10119_v12  ;;  %13657 = vmatpush3.msra.mxu1 %v16836_v10  ;;  %v11458_v12 = vld [vmem:[%s17665_s5 + $0x58] sm:$0xff] }
 0xb7a   :  { %v14309_v8 = vpop.eup %14308  ;;  %v10125_v58 = vmul.f32 %v14307_v0, %v16810_v28  ;;  %13652 = vmatpush3.msra.mxu0 %v16887_v46  ;;  %v11275_v56 = vpop.permute.xlu1 %11274  ;;  %13653 = vmatprep.mubr.msk.f32.mxu0 %vm14399_vm1, %v17758_v61  ;;  %v13933_v0 = vpack.c.bf16 %v11458_v12, %v11457_v60 }
 0xb7b   :  { %v10123_v42 = vmul.f32 %v14309_v8, %v16812_v1  ;;  %13658 = vmatprep.mubr.msk.f32.mxu1 %vm14399_vm1, %v17758_v61  ;;  %13661 = vmatprep.subr.mxu0 %v17758_v61  ;;  %v11459_v8 = vld [vmem:[%s17665_s5 + $0x60] sm:$0xff] }
 0xb7c   :  { %13666 = vmatprep.subr.mxu1 %v17758_v61  ;;  %13659 = vmatmul.mubr.msk.f32.vlgmr.msra.gmra.mrb[146].mxu1 %vm1891_vm3, %v10125_v58  ;;  %v11460_v58 = vld [vmem:[%s17665_s5 + $0x68] sm:$0xff] }
 0xb7d   :  { %v14311_v10 = vpop.eup %14310  ;;  %13654 = vmatmul.mubr.msk.f32.vlgmr.msra.gmra.mrb[146].mxu0 %vm1891_vm3, %v10123_v42  ;;  %13667 = vmatpush3.msra.mxu1 %v16895_v22  ;;  %v11461_v42 = vld [vmem:[%s17665_s5 + $0x70] sm:$0xff] }
 0xb7e   :  { %v14313_v28 = vpop.eup %14312  ;;  %v10129_v53 = vmul.f32 %v14311_v10, %v16818_v4  ;;  %13662 = vmatpush3.msra.mxu0 %v16891_v39  ;;  %v5927_v1 = vpop.permute.xlu1 %5926  ;;  %13663 = vmatprep.mubr.msk.f32.mxu0 %vm14399_vm1, %v17758_v61  ;;  %v11462_v10 = vld [vmem:[%s17665_s5 + $0x78] sm:$0xff] }
 0xb7f   :  { %v10127_v16 = vmul.f32 %v14313_v28, %v16820_v5  ;;  %5974 = vst.msk [vmem:[#allocation2 + $0x8] sm:$0xff] %vm5972_vm4, %v5927_v1  ;;  %13668 = vmatprep.mubr.msk.f32.mxu1 %vm14399_vm1, %v17758_v61  ;;  %13676 = vmatprep.subr.mxu1 %v17758_v61  ;;  %v13941_v28 = vpack.c.bf16 %v11462_v10, %v11461_v42 }
 0xb80   :  { %13669 = vmatmul.mubr.msk.f32.vlgmr.msra.gmra.mrb[148].mxu1 %vm1891_vm3, %v10129_v53  ;;  %13671 = vmatprep.subr.mxu0 %v17758_v61 }
 0xb81   :  { %13664 = vmatmul.mubr.msk.f32.vlgmr.msra.gmra.mrb[148].mxu0 %vm1891_vm3, %v10127_v16  ;;  %13677 = vmatpush3.msra.mxu1 %v11275_v56  ;;  %v14315_v39 = vpop.eup %14314  ;;  %v13937_v56 = vpack.c.bf16 %v11460_v58, %v11459_v8 }
 0xb82   :  { %v8648_v4 = vpop.permute.xlu1 %8647  ;;  %13673 = vmatprep.mubr.msk.f32.mxu0 %vm14399_vm1, %v17758_v61  ;;  %13678 = vmatprep.mubr.msk.f32.mxu1 %vm14399_vm1, %v17758_v61  ;;  %v10131_v38 = vmul.f32 %v14315_v39, %v16826_v63 }
 0xb83   :  { %8695 = vst.msk [vmem:[#allocation2 + $0x8] sm:$0xff] %vm8693_vm5, %v8648_v4 }
 0xb86   :  { %v5931_v5 = vpop.permute.xlu1 %5930 }
 0xb87   :  { %5976 = vst.msk [vmem:[#allocation2 + $0x18] sm:$0xff] %vm5972_vm4, %v5931_v5 }
 0xb8a   :  { %v8652_v30 = vpop.permute.xlu1 %8651 }
 0xb8b   :  { %8697 = vst.msk [vmem:[#allocation2 + $0x18] sm:$0xff] %vm8693_vm5, %v8652_v30 }
 0xb8e   :  { %v5935_v48 = vpop.permute.xlu1 %5934 }
 0xb8f   :  { %5978 = vst.msk [vmem:[#allocation2 + $0x28] sm:$0xff] %vm5972_vm4, %v5935_v48 }
 0xb92   :  { %v8656_v41 = vpop.permute.xlu1 %8655 }
 0xb93   :  { %8699 = vst.msk [vmem:[#allocation2 + $0x28] sm:$0xff] %vm8693_vm5, %v8656_v41 }
 0xb96   :  { %v5939_v7 = vpop.permute.xlu1 %5938 }
 0xb97   :  { %5980 = vst.msk [vmem:[#allocation2 + $0x38] sm:$0xff] %vm5972_vm4, %v5939_v7 }
 0xb9a   :  { %v8660_v49 = vpop.permute.xlu1 %8659 }
 0xb9b   :  { %8701 = vst.msk [vmem:[#allocation2 + $0x38] sm:$0xff] %vm8693_vm5, %v8660_v49 }
 0xb9e   :  { %v5943_v61 = vpop.permute.xlu1 %5942 }
 0xb9f   :  { %5982 = vst.msk [vmem:[#allocation2 + $0x48] sm:$0xff] %vm5972_vm4, %v5943_v61 }
 0xba2   :  { %v8664_v9 = vpop.permute.xlu1 %8663 }
 0xba3   :  { %8703 = vst.msk [vmem:[#allocation2 + $0x48] sm:$0xff] %vm8693_vm5, %v8664_v9 }
 0xba6   :  { %v10101_v20 = vpop.xlane.xlu0 %10100  ;;  %v5947_v46 = vpop.permute.xlu1 %5946 }
 0xba7   :  { %14316 = vrcp.f32 %v10101_v20  ;;  %5984 = vst.msk [vmem:[#allocation2 + $0x58] sm:$0xff] %vm5972_vm4, %v5947_v46 }
 0xbaa   :  { %v11199_v22 = vpop.permute.xlu0 %11198  ;;  %v8668_v55 = vpop.permute.xlu1 %8667 }
 0xbab   :  { %8705 = vst.msk [vmem:[#allocation2 + $0x58] sm:$0xff] %vm8693_vm5, %v8668_v55  ;;  %13672 = vmatpush3.msra.mxu0 %v11199_v22 }
 0xbac   :  { %13674 = vmatmul.mubr.msk.f32.vlgmr.msra.gmra.mrb[150].mxu0 %vm1891_vm3, %v10131_v38  ;;  %13914 = vmatprep.subr.bf16.mxu0 %v13913_v44 }
 0xbad   :  { %13916 = vmatpush3.bf16.msra.mxu0 %v13913_v44 }
 0xbae   :  { %v5925_v31 = vpop.permute.xlu0 %5924  ;;  %v5951_v50 = vpop.permute.xlu1 %5950  ;;  %13918 = vmatprep.subr.bf16.mxu0 %v13917_v2 }
 0xbaf   :  { %5973 = vst.msk [vmem:[#allocation2] sm:$0xff] %vm5972_vm4, %v5925_v31  ;;  %5986 = vst.msk [vmem:[#allocation2 + $0x68] sm:$0xff] %vm5972_vm4, %v5951_v50 }
 0xbb1   :  { %v14317_v35 = vpop.eup %14316  ;;  %13920 = vmatpush3.bf16.msra.mxu0 %v13917_v2 }
 0xbb2   :  { %v10133_v33 = vmul.f32 %v14317_v35, %v16849_v23  ;;  %v8646_v27 = vpop.permute.xlu0 %8645  ;;  %v8672_v3 = vpop.permute.xlu1 %8671  ;;  %13922 = vmatprep.subr.bf16.mxu0 %v13921_v21 }
 0xbb3   :  { %8694 = vst.msk [vmem:[#allocation2] sm:$0xff] %vm8693_vm5, %v8646_v27  ;;  %8707 = vst.msk [vmem:[#allocation2 + $0x68] sm:$0xff] %vm8693_vm5, %v8672_v3 }
 0xbb4   :  { %13679 = vmatmul.mubr.msk.f32.vlgmr.msra.gmra.mrb[150].mxu1 %vm1891_vm3, %v10133_v33 }
 0xbb5   :  { %13924 = vmatpush3.bf16.msra.mxu0 %v13921_v21 }
 0xbb6   :  { %v5929_v63 = vpop.permute.xlu0 %5928  ;;  %v5955_v25 = vpop.permute.xlu1 %5954  ;;  %13926 = vmatprep.subr.bf16.mxu0 %v13925_v43 }
 0xbb7   :  { %5975 = vst.msk [vmem:[#allocation2 + $0x10] sm:$0xff] %vm5972_vm4, %v5929_v63  ;;  %5988 = vst.msk [vmem:[#allocation2 + $0x78] sm:$0xff] %vm5972_vm4, %v5955_v25 }
 0xbb9   :  { %13928 = vmatpush3.bf16.msra.mxu0 %v13925_v43 }
 0xbba   :  { %v8650_v19 = vpop.permute.xlu0 %8649  ;;  %v8676_v54 = vpop.permute.xlu1 %8675  ;;  %13930 = vmatprep.subr.bf16.mxu0 %v13929_v29 }
 0xbbb   :  { %8696 = vst.msk [vmem:[#allocation2 + $0x10] sm:$0xff] %vm8693_vm5, %v8650_v19  ;;  %8709 = vst.msk [vmem:[#allocation2 + $0x78] sm:$0xff] %vm8693_vm5, %v8676_v54 }
 0xbbd   :  { %13932 = vmatpush3.bf16.msra.mxu0 %v13929_v29 }
 0xbbe   :  { %v5933_v23 = vpop.permute.xlu0 %5932  ;;  %13934 = vmatprep.subr.bf16.mxu0 %v13933_v0 }
 0xbbf   :  { %5977 = vst.msk [vmem:[#allocation2 + $0x20] sm:$0xff] %vm5972_vm4, %v5933_v23 }
 0xbc1   :  { %13936 = vmatpush3.bf16.msra.mxu0 %v13933_v0 }
 0xbc2   :  { %v8654_v36 = vpop.permute.xlu0 %8653  ;;  %13938 = vmatprep.subr.bf16.mxu0 %v13937_v56 }
 0xbc3   :  { %8698 = vst.msk [vmem:[#allocation2 + $0x20] sm:$0xff] %vm8693_vm5, %v8654_v36 }
 0xbc5   :  { %13940 = vmatpush3.bf16.msra.mxu0 %v13937_v56 }
 0xbc6   :  { %v5937_v51 = vpop.permute.xlu0 %5936  ;;  %13942 = vmatprep.subr.bf16.mxu0 %v13941_v28 }
 0xbc7   :  { %5979 = vst.msk [vmem:[#allocation2 + $0x30] sm:$0xff] %vm5972_vm4, %v5937_v51 }
 0xbc9   :  { %13944 = vmatpush3.bf16.msra.mxu0 %v13941_v28 }
 0xbca   :  { %v8658_v15 = vpop.permute.xlu0 %8657 }
 0xbcb   :  { %8700 = vst.msk [vmem:[#allocation2 + $0x30] sm:$0xff] %vm8693_vm5, %v8658_v15 }
 0xbce   :  { %v5941_v37 = vpop.permute.xlu0 %5940 }
 0xbcf   :  { %5981 = vst.msk [vmem:[#allocation2 + $0x40] sm:$0xff] %vm5972_vm4, %v5941_v37 }
 0xbd2   :  { %v8662_v32 = vpop.permute.xlu0 %8661 }
 0xbd3   :  { %8702 = vst.msk [vmem:[#allocation2 + $0x40] sm:$0xff] %vm8693_vm5, %v8662_v32 }
 0xbd6   :  { %v5945_v24 = vpop.permute.xlu0 %5944 }
 0xbd7   :  { %5983 = vst.msk [vmem:[#allocation2 + $0x50] sm:$0xff] %vm5972_vm4, %v5945_v24 }
 0xbda   :  { %v8666_v62 = vpop.permute.xlu0 %8665 }
 0xbdb   :  { %8704 = vst.msk [vmem:[#allocation2 + $0x50] sm:$0xff] %vm8693_vm5, %v8666_v62 }
 0xbde   :  { %v5949_v18 = vpop.permute.xlu0 %5948 }
 0xbdf   :  { %5985 = vst.msk [vmem:[#allocation2 + $0x60] sm:$0xff] %vm5972_vm4, %v5949_v18 }
 0xbe2   :  { %v8670_v59 = vpop.permute.xlu0 %8669 }
 0xbe3   :  { %8706 = vst.msk [vmem:[#allocation2 + $0x60] sm:$0xff] %vm8693_vm5, %v8670_v59 }
 0xbe6   :  { %v5953_v34 = vpop.permute.xlu0 %5952 }
 0xbe7   :  { %5987 = vst.msk [vmem:[#allocation2 + $0x70] sm:$0xff] %vm5972_vm4, %v5953_v34 }
 0xbea   :  { %v8674_v57 = vpop.permute.xlu0 %8673 }
 0xbeb   :  { %8708 = vst.msk [vmem:[#allocation2 + $0x70] sm:$0xff] %vm8693_vm5, %v8674_v57 }
 0xc37   :  { %v10206_v53 = vpop.f32.mrb[136].mxu0 }
 0xc38   :  { %11366 = vrot.lane.b32.xlu0 %v10206_v53, %s14400_s20  ;;  %v13605_v1 = vpop.f32.mrb[137].mxu0 }
 0xc39   :  { %v17110_v1 = vld [vmem:[%s17666_s6] ss:$0 sm:$0xff] }
 0xc3a   :  { %v10282_v16 = vpop.f32.mrb[136].mxu1 }
 0xc3b   :  { %v13610_v4 = vpop.f32.mrb[137].mxu1  ;;  %11368 = vrot.lane.b32.xlu1 %v10282_v16, %s14400_s20  ;;  %v10358_v5 = vpop.f32.mrb[138].mxu0  ;;  %v14382_v16 = vld [vmem:[%s17660_s0 + $0x8] sm:$0xff] }
 0xc3c   :  { %11370 = vrot.lane.b32.xlu0 %v10358_v5, %s14400_s20  ;;  %v13615_v30 = vpop.f32.mrb[139].mxu0 }
 0xc3d   :  { %v14383_v30 = vld [vmem:[%s17660_s0] sm:$0xff] }
 0xc3f   :  { %v10434_v48 = vpop.f32.mrb[138].mxu1 }
 0xc40   :  { %v13620_v41 = vpop.f32.mrb[139].mxu1  ;;  %11372 = vrot.lane.b32.xlu1 %v10434_v48, %s14400_s20 }
 0xc43   :  { %v10586_v7 = vpop.f32.mrb[140].mxu1 }
 0xc44   :  { %v10510_v49 = vpop.f32.mrb[140].mxu0  ;;  %v13630_v61 = vpop.f32.mrb[141].mxu1  ;;  %11376 = vrot.lane.b32.xlu1 %v10586_v7, %s14400_s20 }
 0xc45   :  { %11374 = vrot.lane.b32.xlu0 %v10510_v49, %s14400_s20  ;;  %v13625_v9 = vpop.f32.mrb[141].mxu0  ;;  %v14384_v61 = vld [vmem:[%s17660_s0 + $0x18] sm:$0xff] }
 0xc47   :  { %v10738_v20 = vpop.f32.mrb[142].mxu1 }
 0xc48   :  { %v10662_v46 = vpop.f32.mrb[142].mxu0  ;;  %v13640_v39 = vpop.f32.mrb[143].mxu1  ;;  %11380 = vrot.lane.b32.xlu1 %v10738_v20, %s14400_s20 }
 0xc49   :  { %11378 = vrot.lane.b32.xlu0 %v10662_v46, %s14400_s20  ;;  %v13635_v38 = vpop.f32.mrb[143].mxu0  ;;  %v14385_v39 = vld [vmem:[%s17660_s0 + $0x10] sm:$0xff] }
 0xc4b   :  { %v10890_v22 = vpop.f32.mrb[144].mxu1 }
 0xc4c   :  { %v10814_v55 = vpop.f32.mrb[144].mxu0  ;;  %v13650_v31 = vpop.f32.mrb[145].mxu1  ;;  %11384 = vrot.lane.b32.xlu1 %v10890_v22, %s14400_s20 }
 0xc4d   :  { %11382 = vrot.lane.b32.xlu0 %v10814_v55, %s14400_s20  ;;  %v13645_v50 = vpop.f32.mrb[145].mxu0  ;;  %v14386_v31 = vld [vmem:[%s17660_s0 + $0x28] sm:$0xff] }
 0xc4f   :  { %v11042_v35 = vpop.f32.mrb[146].mxu1 }
 0xc50   :  { %v10966_v33 = vpop.f32.mrb[146].mxu0  ;;  %v13660_v27 = vpop.f32.mrb[147].mxu1  ;;  %11388 = vrot.lane.b32.xlu1 %v11042_v35, %s14400_s20 }
 0xc51   :  { %11386 = vrot.lane.b32.xlu0 %v10966_v33, %s14400_s20  ;;  %v13655_v3 = vpop.f32.mrb[147].mxu0  ;;  %v14387_v33 = vld [vmem:[%s17660_s0 + $0x20] sm:$0xff] }
 0xc53   :  { %v11194_v63 = vpop.f32.mrb[148].mxu1 }
 0xc54   :  { %v11118_v25 = vpop.f32.mrb[148].mxu0  ;;  %v13670_v19 = vpop.f32.mrb[149].mxu1  ;;  %11392 = vrot.lane.b32.xlu1 %v11194_v63, %s14400_s20 }
 0xc55   :  { %11390 = vrot.lane.b32.xlu0 %v11118_v25, %s14400_s20  ;;  %v13665_v54 = vpop.f32.mrb[149].mxu0  ;;  %v14388_v19 = vld [vmem:[%s17660_s0 + $0x38] sm:$0xff] }
 0xc7f   :  { %v11270_v23 = vpop.f32.mrb[150].mxu0 }
 0xc80   :  { %11394 = vrot.lane.b32.xlu0 %v11270_v23, %s14400_s20  ;;  %v13675_v36 = vpop.f32.mrb[151].mxu0 }
 0xc81   :  { %v14389_v36 = vld [vmem:[%s17660_s0 + $0x30] sm:$0xff] }
 0xc87   :  { %v11346_v51 = vpop.f32.mrb[150].mxu1 }
 0xc88   :  { %11396 = vrot.lane.b32.xlu1 %v11346_v51, %s14400_s20  ;;  %v13680_v15 = vpop.f32.mrb[151].mxu1 }
 0xcaa   :  { %v11367_v37 = vpop.permute.xlu0 %11366 }
 0xcab   :  { %11415 = vst.msk [vmem:[#allocation2] sm:$0xff] %vm11414_vm6, %v11367_v37 }
 0xcad   :  { %v11369_v32 = vpop.permute.xlu1 %11368 }
 0xcae   :  { %11416 = vst.msk [vmem:[#allocation2 + $0x8] sm:$0xff] %vm11414_vm6, %v11369_v32  ;;  %v11371_v24 = vpop.permute.xlu0 %11370 }
 0xcaf   :  { %11417 = vst.msk [vmem:[#allocation2 + $0x10] sm:$0xff] %vm11414_vm6, %v11371_v24  ;;  %v14390_v24 = vld [vmem:[%s17660_s0 + $0x48] sm:$0xff] }
 0xcb2   :  { %v11373_v62 = vpop.permute.xlu1 %11372  ;;  %v11431_v18 = vld [vmem:[#allocation2] sm:$0xff] }
 0xcb3   :  { %11418 = vst.msk [vmem:[#allocation2 + $0x18] sm:$0xff] %vm11414_vm6, %v11373_v62  ;;  %13713 = vmatprep.mubr.f32.mxu0 %v11431_v18 }
 0xcb5   :  { %v11432_v59 = vld [vmem:[#allocation2 + $0x8] sm:$0xff] }
 0xcb6   :  { %13714 = vmatmul.mubr.f32.vlgmr.msra.gmra.mrb[152].mxu0 %v11432_v59  ;;  %v11377_v34 = vpop.permute.xlu1 %11376  ;;  %v11433_v57 = vld [vmem:[#allocation2 + $0x10] sm:$0xff]  ;;  %v14391_v59 = vld [vmem:[%s17660_s0 + $0x40] sm:$0xff] }
 0xcb7   :  { %11420 = vst.msk [vmem:[#allocation2 + $0x28] sm:$0xff] %vm11414_vm6, %v11377_v34  ;;  %v11375_v47 = vpop.permute.xlu0 %11374  ;;  %13716 = vmatprep.mubr.f32.mxu0 %v11433_v57 }
 0xcb8   :  { %11419 = vst.msk [vmem:[#allocation2 + $0x20] sm:$0xff] %vm11414_vm6, %v11375_v47 }
 0xcba   :  { %v11381_v11 = vpop.permute.xlu1 %11380  ;;  %v11434_v6 = vld [vmem:[#allocation2 + $0x18] sm:$0xff] }
 0xcbb   :  { %11422 = vst.msk [vmem:[#allocation2 + $0x38] sm:$0xff] %vm11414_vm6, %v11381_v11  ;;  %v11379_v44 = vpop.permute.xlu0 %11378  ;;  %13717 = vmatmul.mubr.f32.gmra.mrb[154].mxu0 %v11434_v6  ;;  %v14392_v6 = vld [vmem:[%s17660_s0 + $0x58] sm:$0xff] }
 0xcbc   :  { %11421 = vst.msk [vmem:[#allocation2 + $0x30] sm:$0xff] %vm11414_vm6, %v11379_v44 }
 0xcbe   :  { %v11385_v14 = vpop.permute.xlu1 %11384  ;;  %v11436_v2 = vld [vmem:[#allocation2 + $0x28] sm:$0xff] }
 0xcbf   :  { %11424 = vst.msk [vmem:[#allocation2 + $0x48] sm:$0xff] %vm11414_vm6, %v11385_v14  ;;  %v11383_v52 = vpop.permute.xlu0 %11382  ;;  %v11435_v45 = vld [vmem:[#allocation2 + $0x20] sm:$0xff] }
 0xcc0   :  { %11423 = vst.msk [vmem:[#allocation2 + $0x40] sm:$0xff] %vm11414_vm6, %v11383_v52  ;;  %13719 = vmatprep.mubr.f32.mxu0 %v11435_v45 }
 0xcc1   :  { %13720 = vmatmul.mubr.f32.gmra.mrb[156].mxu0 %v11436_v2  ;;  %v14393_v2 = vld [vmem:[%s17660_s0 + $0x50] sm:$0xff] }
 0xcc2   :  { %v11389_v21 = vpop.permute.xlu1 %11388  ;;  %v11438_v26 = vld [vmem:[#allocation2 + $0x38] sm:$0xff] }
 0xcc3   :  { %11426 = vst.msk [vmem:[#allocation2 + $0x58] sm:$0xff] %vm11414_vm6, %v11389_v21  ;;  %v11387_v13 = vpop.permute.xlu0 %11386  ;;  %v11437_v43 = vld [vmem:[#allocation2 + $0x30] sm:$0xff] }
 0xcc4   :  { %11425 = vst.msk [vmem:[#allocation2 + $0x50] sm:$0xff] %vm11414_vm6, %v11387_v13  ;;  %13722 = vmatprep.mubr.f32.mxu0 %v11437_v43  ;;  %v14394_v13 = vld [vmem:[%s17660_s0 + $0x68] sm:$0xff] }
 0xcc5   :  { %13723 = vmatmul.mubr.f32.gmra.mrb[158].mxu0 %v11438_v26 }
 0xcc6   :  { %v11393_v40 = vpop.permute.xlu1 %11392  ;;  %v11440_v17 = vld [vmem:[#allocation2 + $0x48] sm:$0xff] }
 0xcc7   :  { %11428 = vst.msk [vmem:[#allocation2 + $0x68] sm:$0xff] %vm11414_vm6, %v11393_v40  ;;  %v11391_v29 = vpop.permute.xlu0 %11390  ;;  %v11439_v60 = vld [vmem:[#allocation2 + $0x40] sm:$0xff] }
 0xcc8   :  { %11427 = vst.msk [vmem:[#allocation2 + $0x60] sm:$0xff] %vm11414_vm6, %v11391_v29  ;;  %13725 = vmatprep.mubr.f32.mxu0 %v11439_v60 }
 0xcc9   :  { %13726 = vmatmul.mubr.f32.gmra.mrb[160].mxu0 %v11440_v17  ;;  %v14395_v17 = vld [vmem:[%s17660_s0 + $0x60] sm:$0xff] }
 0xcca   :  { %v11442_v12 = vld [vmem:[#allocation2 + $0x58] sm:$0xff] }
 0xccb   :  { %v11441_v0 = vld [vmem:[#allocation2 + $0x50] sm:$0xff] }
 0xccc   :  { %13728 = vmatprep.mubr.f32.mxu0 %v11441_v0 }
 0xccd   :  { %13729 = vmatmul.mubr.f32.gmra.mrb[162].mxu0 %v11442_v12 }
 0xcce   :  { %v11444_v8 = vld [vmem:[#allocation2 + $0x68] sm:$0xff] }
 0xccf   :  { %v11443_v58 = vld [vmem:[#allocation2 + $0x60] sm:$0xff] }
 0xcd0   :  { %13731 = vmatprep.mubr.f32.mxu0 %v11443_v58 }
 0xcd1   :  { %13732 = vmatmul.mubr.f32.gmra.mrb[164].mxu0 %v11444_v8  ;;  %v14396_v8 = vld [vmem:[%s17660_s0 + $0x78] sm:$0xff] }
 0xcf2   :  { %v11395_v56 = vpop.permute.xlu0 %11394 }
 0xcf3   :  { %11429 = vst.msk [vmem:[#allocation2 + $0x70] sm:$0xff] %vm11414_vm6, %v11395_v56 }
 0xcfa   :  { %v11397_v42 = vpop.permute.xlu1 %11396  ;;  %v11445_v10 = vld [vmem:[#allocation2 + $0x70] sm:$0xff] }
 0xcfb   :  { %11430 = vst.msk [vmem:[#allocation2 + $0x78] sm:$0xff] %vm11414_vm6, %v11397_v42  ;;  %13734 = vmatprep.mubr.f32.mxu0 %v11445_v10  ;;  %v14397_v42 = vld [vmem:[%s17660_s0 + $0x70] sm:$0xff] }
 0xd02   :  { %v11446_v28 = vld [vmem:[#allocation2 + $0x78] sm:$0xff] }
 0xd03   :  { %13735 = vmatmul.mubr.f32.gmra.mrb[166].mxu0 %v11446_v28 }
 0xd89   :  { %v13715_v53 = vpop.f32.mrb[152].mxu0 }
 0xd8a   :  { %v11609_v4 = vadd.f32 %v14382_v16, %v13715_v53  ;;  %v11529_v5 = vpop.f32.mrb[153].mxu0  ;;  %v11885_v16 = vld [vmem:[%s17667_s9] sm:$0xff] }
 0xd8b   :  { %v11608_v48 = vadd.f32 %v14383_v30, %v11529_v5  ;;  %v11887_v5 = vld [vmem:[%s17667_s9 + $0x10] sm:$0xff] }
 0xd8c   :  { %v17119_v41 = vadd.f32 %v17110_v1, %v11609_v4  ;;  %v11886_v4 = vld [vmem:[%s17667_s9 + $0x8] sm:$0xff] }
 0xd8d   :  { %v17122_v7 = vadd.f32 %v17110_v1, %v11608_v48  ;;  %v13945_v30 = vpack.c.bf16 %v11886_v4, %v11885_v16 }
 0xd8e   :  { %11649 = vadd.xlane.f32.xlu1 %v17119_v41  ;;  %v13718_v49 = vpop.f32.mrb[154].mxu0 }
 0xd8f   :  { %11647 = vadd.xlane.f32.xlu0 %v17122_v7  ;;  %v11611_v9 = vadd.f32 %v14384_v61, %v13718_v49  ;;  %v11539_v20 = vpop.f32.mrb[155].mxu0  ;;  %v11889_v49 = vld [vmem:[%s17667_s9 + $0x20] sm:$0xff]  ;;  %v11890_v61 = vld [vmem:[%s17667_s9 + $0x28] sm:$0xff]  ;;  %13946 = vmatprep.subr.bf16.mxu1 %v13945_v30 }
 0xd90   :  { %v11610_v38 = vadd.f32 %v14385_v39, %v11539_v20  ;;  %13948 = vmatpush3.bf16.msra.mxu1 %v13945_v30 }
 0xd91   :  { %v17130_v46 = vadd.f32 %v17110_v1, %v11611_v9  ;;  %v13953_v9 = vpack.c.bf16 %v11890_v61, %v11889_v49 }
 0xd92   :  { %v17137_v55 = vadd.f32 %v17110_v1, %v11610_v38 }
 0xd93   :  { %11653 = vadd.xlane.f32.xlu0 %v17130_v46 }
 0xd94   :  { %v13721_v22 = vpop.f32.mrb[156].mxu0 }
 0xd95   :  { %v11613_v50 = vadd.f32 %v14386_v31, %v13721_v22  ;;  %v11549_v35 = vpop.f32.mrb[157].mxu0  ;;  %v17917_v31 = vld [vmem:[#allocation3_spill] sm:$0xff] }
 0xd96   :  { %v11612_v27 = vadd.f32 %v14387_v33, %v11549_v35 }
 0xd97   :  { %v17146_v3 = vadd.f32 %v17110_v1, %v11613_v50  ;;  %11651 = vadd.xlane.f32.xlu0 %v17137_v55 }
 0xd98   :  { %v13724_v63 = vpop.f32.mrb[158].mxu0  ;;  %v17150_v25 = vadd.f32 %v17110_v1, %v11612_v27 }
 0xd99   :  { %v11615_v54 = vadd.f32 %v14388_v19, %v13724_v63  ;;  %11657 = vadd.xlane.f32.xlu1 %v17146_v3  ;;  %v11559_v23 = vpop.f32.mrb[159].mxu0 }
 0xd9a   :  { %v11614_v51 = vadd.f32 %v14389_v36, %v11559_v23 }
 0xd9b   :  { %v17160_v15 = vadd.f32 %v17110_v1, %v11615_v54  ;;  %11655 = vadd.xlane.f32.xlu0 %v17150_v25 }
 0xd9c   :  { %v13727_v37 = vpop.f32.mrb[160].mxu0  ;;  %v17164_v32 = vadd.f32 %v17110_v1, %v11614_v51 }
 0xd9d   :  { %v11617_v62 = vadd.f32 %v14390_v24, %v13727_v37  ;;  %11661 = vadd.xlane.f32.xlu1 %v17160_v15  ;;  %v11569_v18 = vpop.f32.mrb[161].mxu0 }
 0xd9e   :  { %v11616_v34 = vadd.f32 %v14391_v59, %v11569_v18 }
 0xd9f   :  { %v17174_v57 = vadd.f32 %v17110_v1, %v11617_v62  ;;  %11659 = vadd.xlane.f32.xlu0 %v17164_v32 }
 0xda0   :  { %v13730_v47 = vpop.f32.mrb[162].mxu0  ;;  %v17178_v11 = vadd.f32 %v17110_v1, %v11616_v34 }
 0xda1   :  { %v11619_v44 = vadd.f32 %v14392_v6, %v13730_v47  ;;  %11665 = vadd.xlane.f32.xlu1 %v17174_v57  ;;  %v11579_v14 = vpop.f32.mrb[163].mxu0 }
 0xda2   :  { %v11618_v52 = vadd.f32 %v14393_v2, %v11579_v14 }
 0xda3   :  { %v17188_v45 = vadd.f32 %v17110_v1, %v11619_v44  ;;  %11663 = vadd.xlane.f32.xlu0 %v17178_v11 }
 0xda4   :  { %v13733_v21 = vpop.f32.mrb[164].mxu0  ;;  %v17192_v26 = vadd.f32 %v17110_v1, %v11618_v52 }
 0xda5   :  { %v11621_v43 = vadd.f32 %v14394_v13, %v13733_v21  ;;  %11669 = vadd.xlane.f32.xlu1 %v17188_v45  ;;  %v11589_v40 = vpop.f32.mrb[165].mxu0 }
 0xda6   :  { %v11620_v29 = vadd.f32 %v14395_v17, %v11589_v40 }
 0xda7   :  { %v17202_v60 = vadd.f32 %v17110_v1, %v11621_v43  ;;  %11667 = vadd.xlane.f32.xlu0 %v17192_v26 }
 0xda8   :  { %v17206_v12 = vadd.f32 %v17110_v1, %v11620_v29 }
 0xda9   :  { %11673 = vadd.xlane.f32.xlu1 %v17202_v60 }
 0xdab   :  { %11671 = vadd.xlane.f32.xlu0 %v17206_v12 }
 0xdd6   :  { %v13736_v0 = vpop.f32.mrb[166].mxu0 }
 0xdd7   :  { %v11623_v58 = vadd.f32 %v14396_v8, %v13736_v0  ;;  %v11599_v56 = vpop.f32.mrb[167].mxu0 }
 0xdd8   :  { %v11622_v10 = vadd.f32 %v14397_v42, %v11599_v56 }
 0xdd9   :  { %v17217_v28 = vadd.f32 %v17110_v1, %v11623_v58 }
 0xdda   :  { %v17220_v53 = vadd.f32 %v17110_v1, %v11622_v10  ;;  %v11888_v1 = vld [vmem:[%s17667_s9 + $0x18] sm:$0xff] }
 0xddb   :  { %11677 = vadd.xlane.f32.xlu1 %v17217_v28  ;;  %v13949_v48 = vpack.c.bf16 %v11888_v1, %v11887_v5 }
 0xddc   :  { %11675 = vadd.xlane.f32.xlu0 %v17220_v53 }
 0xddd   :  { %13950 = vmatprep.subr.bf16.mxu1 %v13949_v48 }
 0xdde   :  { %13952 = vmatpush3.bf16.msra.mxu1 %v13949_v48 }
 0xddf   :  { %13954 = vmatprep.subr.bf16.mxu1 %v13953_v9 }
 0xde2   :  { %13956 = vmatpush3.bf16.msra.mxu1 %v13953_v9 }
 0xe1b   :  { %v11650_v20 = vpop.xlane.xlu1 %11649 }
 0xe1c   :  { %v11680_v39 = vmul.f32 0.03125, %v11650_v20  ;;  %v11648_v38 = vpop.xlane.xlu0 %11647 }
 0xe1d   :  { %v11679_v22 = vmul.f32 0.03125, %v11648_v38 }
 0xe1e   :  { %v11696_v50 = vmul.f32 %v17917_v31, %v11680_v39 }
 0xe1f   :  { %v11695_v35 = vmul.f32 %v17917_v31, %v11679_v22 }
 0xe20   :  { %v17245_v33 = vsub.f32 %v17119_v41, %v11696_v50  ;;  %v11654_v27 = vpop.xlane.xlu0 %11653 }
 0xe21   :  { %v17248_v63 = vsub.f32 %v17122_v7, %v11695_v35  ;;  %v11682_v19 = vmul.f32 0.03125, %v11654_v27 }
 0xe22   :  { %v11728_v54 = vmul.f32 %v17245_v33, %v17245_v33 }
 0xe23   :  { %v11698_v23 = vmul.f32 %v17917_v31, %v11682_v19  ;;  %v11727_v36 = vmul.f32 %v17248_v63, %v17248_v63 }
 0xe24   :  { %11745 = vadd.xlane.f32.xlu1 %v11728_v54  ;;  %v11652_v51 = vpop.xlane.xlu0 %11651  ;;  %v11891_v54 = vld [vmem:[%s17667_s9 + $0x30] sm:$0xff] }
 0xe25   :  { %v17256_v37 = vsub.f32 %v17130_v46, %v11698_v23  ;;  %11743 = vadd.xlane.f32.xlu0 %v11727_v36  ;;  %v11681_v24 = vmul.f32 0.03125, %v11652_v51  ;;  %v11892_v23 = vld [vmem:[%s17667_s9 + $0x38] sm:$0xff] }
 0xe26   :  { %v11658_v62 = vpop.xlane.xlu1 %11657 }
 0xe27   :  { %v11697_v18 = vmul.f32 %v17917_v31, %v11681_v24  ;;  %v11684_v59 = vmul.f32 0.03125, %v11658_v62  ;;  %v11730_v34 = vmul.f32 %v17256_v37, %v17256_v37 }
 0xe28   :  { %v11656_v47 = vpop.xlane.xlu0 %11655 }
 0xe29   :  { %v17262_v6 = vsub.f32 %v17137_v55, %v11697_v18  ;;  %v11700_v44 = vmul.f32 %v17917_v31, %v11684_v59  ;;  %v11683_v14 = vmul.f32 0.03125, %v11656_v47  ;;  %11749 = vadd.xlane.f32.xlu1 %v11730_v34  ;;  %v13957_v59 = vpack.c.bf16 %v11892_v23, %v11891_v54 }
 0xe2a   :  { %v11662_v2 = vpop.xlane.xlu1 %11661 }
 0xe2b   :  { %v17266_v52 = vsub.f32 %v17146_v3, %v11700_v44  ;;  %v11699_v21 = vmul.f32 %v17917_v31, %v11683_v14  ;;  %v11686_v13 = vmul.f32 0.03125, %v11662_v2  ;;  %v11729_v43 = vmul.f32 %v17262_v6, %v17262_v6  ;;  %13958 = vmatprep.subr.bf16.mxu1 %v13957_v59  ;;  %v11893_v2 = vld [vmem:[%s17667_s9 + $0x40] sm:$0xff] }
 0xe2c   :  { %v11660_v40 = vpop.xlane.xlu0 %11659  ;;  %13960 = vmatpush3.bf16.msra.mxu1 %v13957_v59 }
 0xe2d   :  { %v17272_v17 = vsub.f32 %v17150_v25, %v11699_v21  ;;  %v11702_v29 = vmul.f32 %v17917_v31, %v11686_v13  ;;  %v11685_v0 = vmul.f32 0.03125, %v11660_v40  ;;  %11747 = vadd.xlane.f32.xlu0 %v11729_v43  ;;  %v11732_v8 = vmul.f32 %v17266_v52, %v17266_v52  ;;  %v11894_v21 = vld [vmem:[%s17667_s9 + $0x48] sm:$0xff] }
 0xe2e   :  { %v11666_v58 = vpop.xlane.xlu1 %11665 }
 0xe2f   :  { %v17278_v56 = vsub.f32 %v17160_v15, %v11702_v29  ;;  %v11701_v42 = vmul.f32 %v17917_v31, %v11685_v0  ;;  %v11688_v10 = vmul.f32 0.03125, %v11666_v58  ;;  %11753 = vadd.xlane.f32.xlu1 %v11732_v8  ;;  %v11731_v16 = vmul.f32 %v17272_v17, %v17272_v17  ;;  %v11895_v58 = vld [vmem:[%s17667_s9 + $0x50] sm:$0xff] }
 0xe30   :  { %v11664_v4 = vpop.xlane.xlu0 %11663  ;;  %v13961_v29 = vpack.c.bf16 %v11894_v21, %v11893_v2 }
 0xe31   :  { %v17284_v5 = vsub.f32 %v17164_v32, %v11701_v42  ;;  %v11704_v30 = vmul.f32 %v17917_v31, %v11688_v10  ;;  %v11687_v1 = vmul.f32 0.03125, %v11664_v4  ;;  %11751 = vadd.xlane.f32.xlu0 %v11731_v16  ;;  %v11734_v48 = vmul.f32 %v17278_v56, %v17278_v56  ;;  %v11896_v42 = vld [vmem:[%s17667_s9 + $0x58] sm:$0xff]  ;;  %v11897_v4 = vld [vmem:[%s17667_s9 + $0x60] sm:$0xff] }
 0xe32   :  { %v11670_v49 = vpop.xlane.xlu1 %11669  ;;  %13962 = vmatprep.subr.bf16.mxu1 %v13961_v29  ;;  %v13965_v16 = vpack.c.bf16 %v11896_v42, %v11895_v58 }
 0xe33   :  { %v17290_v61 = vsub.f32 %v17174_v57, %v11704_v30  ;;  %v11703_v9 = vmul.f32 %v17917_v31, %v11687_v1  ;;  %v11690_v20 = vmul.f32 0.03125, %v11670_v49  ;;  %11757 = vadd.xlane.f32.xlu1 %v11734_v48  ;;  %v11733_v39 = vmul.f32 %v17284_v5, %v17284_v5  ;;  %13964 = vmatpush3.bf16.msra.mxu1 %v13961_v29  ;;  %v11898_v30 = vld [vmem:[%s17667_s9 + $0x68] sm:$0xff]  ;;  %v11899_v48 = vld [vmem:[%s17667_s9 + $0x70] sm:$0xff]  ;;  %v11900_v49 = vld [vmem:[%s17667_s9 + $0x78] sm:$0xff] }
 0xe34   :  { %v11668_v38 = vpop.xlane.xlu0 %11667  ;;  %13966 = vmatprep.subr.bf16.mxu1 %v13965_v16  ;;  %v13969_v1 = vpack.c.bf16 %v11898_v30, %v11897_v4  ;;  %v17371_v30 = vld [vmem:[%s17668_s7] ss:$0 sm:$0xff] }
 0xe35   :  { %v17296_v22 = vsub.f32 %v17178_v11, %v11703_v9  ;;  %v11706_v50 = vmul.f32 %v17917_v31, %v11690_v20  ;;  %v11689_v35 = vmul.f32 0.03125, %v11668_v38  ;;  %11755 = vadd.xlane.f32.xlu0 %v11733_v39  ;;  %v11736_v27 = vmul.f32 %v17290_v61, %v17290_v61 }
 0xe36   :  { %v11674_v19 = vpop.xlane.xlu1 %11673  ;;  %v13973_v9 = vpack.c.bf16 %v11900_v49, %v11899_v48 }
 0xe37   :  { %v17308_v36 = vsub.f32 %v17188_v45, %v11706_v50  ;;  %v11705_v51 = vmul.f32 %v17917_v31, %v11689_v35  ;;  %v11692_v24 = vmul.f32 0.03125, %v11674_v19  ;;  %11761 = vadd.xlane.f32.xlu1 %v11736_v27  ;;  %v11735_v62 = vmul.f32 %v17296_v22, %v17296_v22  ;;  %13968 = vmatpush3.bf16.msra.mxu1 %v13965_v16 }
 0xe38   :  { %v11672_v18 = vpop.xlane.xlu0 %11671  ;;  %13970 = vmatprep.subr.bf16.mxu1 %v13969_v1 }
 0xe39   :  { %v17314_v34 = vsub.f32 %v17192_v26, %v11705_v51  ;;  %v11708_v47 = vmul.f32 %v17917_v31, %v11692_v24  ;;  %v11691_v44 = vmul.f32 0.03125, %v11672_v18  ;;  %11759 = vadd.xlane.f32.xlu0 %v11735_v62  ;;  %v11738_v14 = vmul.f32 %v17308_v36, %v17308_v36 }
 0xe3b   :  { %v17326_v13 = vsub.f32 %v17202_v60, %v11708_v47  ;;  %v11707_v43 = vmul.f32 %v17917_v31, %v11691_v44  ;;  %11765 = vadd.xlane.f32.xlu1 %v11738_v14  ;;  %v11737_v40 = vmul.f32 %v17314_v34, %v17314_v34  ;;  %13972 = vmatpush3.bf16.msra.mxu1 %v13969_v1 }
 0xe3c   :  { %13974 = vmatprep.subr.bf16.mxu1 %v13973_v9 }
 0xe3d   :  { %v17332_v0 = vsub.f32 %v17206_v12, %v11707_v43  ;;  %11763 = vadd.xlane.f32.xlu0 %v11737_v40  ;;  %v11740_v8 = vmul.f32 %v17326_v13, %v17326_v13 }
 0xe3f   :  { %11769 = vadd.xlane.f32.xlu1 %v11740_v8  ;;  %v11739_v10 = vmul.f32 %v17332_v0, %v17332_v0  ;;  %13976 = vmatpush3.bf16.msra.mxu1 %v13973_v9 }
 0xe41   :  { %11767 = vadd.xlane.f32.xlu0 %v11739_v10 }
 0xe68   :  { %v11678_v20 = vpop.xlane.xlu1 %11677 }
 0xe69   :  { %v11694_v39 = vmul.f32 0.03125, %v11678_v20  ;;  %v11676_v38 = vpop.xlane.xlu0 %11675 }
 0xe6a   :  { %v11693_v50 = vmul.f32 0.03125, %v11676_v38 }
 0xe6b   :  { %v11710_v35 = vmul.f32 %v17917_v31, %v11694_v39 }
 0xe6c   :  { %v11709_v27 = vmul.f32 %v17917_v31, %v11693_v50 }
 0xe6d   :  { %v17359_v19 = vsub.f32 %v17217_v28, %v11710_v35  ;;  %v17378_v35 = vld [vmem:[%s17669_s8] ss:$0 sm:$0xff] }
 0xe6e   :  { %v17362_v54 = vsub.f32 %v17220_v53, %v11709_v27 }
 0xe6f   :  { %v11742_v23 = vmul.f32 %v17359_v19, %v17359_v19 }
 0xe70   :  { %v11741_v51 = vmul.f32 %v17362_v54, %v17362_v54 }
 0xe71   :  { %11773 = vadd.xlane.f32.xlu1 %v11742_v23 }
 0xe72   :  { %11771 = vadd.xlane.f32.xlu0 %v11741_v51 }
 0xeb1   :  { %v11746_v24 = vpop.xlane.xlu1 %11745 }
 0xeb2   :  { %v11776_v62 = vmul.f32 0.03125, %v11746_v24  ;;  %v11744_v18 = vpop.xlane.xlu0 %11743 }
 0xeb3   :  { %v11775_v59 = vmul.f32 0.03125, %v11744_v18 }
 0xeb4   :  { %v11792_v47 = vadd.f32 1e-05, %v11776_v62 }
 0xeb5   :  { %v11791_v31 = vadd.f32 1e-05, %v11775_v59 }
 0xeb6   :  { %14318 = vrsqrt.f32 %v11792_v47  ;;  %v11750_v44 = vpop.xlane.xlu1 %11749 }
 0xeb7   :  { %14320 = vrsqrt.f32 %v11791_v31  ;;  %v11778_v14 = vmul.f32 0.03125, %v11750_v44 }
 0xeb9   :  { %v11794_v2 = vadd.f32 1e-05, %v11778_v14 }
 0xeba   :  { %v11748_v21 = vpop.xlane.xlu0 %11747 }
 0xebb   :  { %14322 = vrsqrt.f32 %v11794_v2  ;;  %v11777_v43 = vmul.f32 0.03125, %v11748_v21 }
 0xebc   :  { %v11754_v40 = vpop.xlane.xlu1 %11753 }
 0xebd   :  { %v11793_v29 = vadd.f32 1e-05, %v11777_v43  ;;  %v11780_v8 = vmul.f32 0.03125, %v11754_v40 }
 0xebe   :  { %v11752_v58 = vpop.xlane.xlu0 %11751 }
 0xebf   :  { %14324 = vrsqrt.f32 %v11793_v29  ;;  %v11796_v42 = vadd.f32 1e-05, %v11780_v8  ;;  %v11779_v10 = vmul.f32 0.03125, %v11752_v58 }
 0xec0   :  { %v14319_v16 = vpop.eup %14318  ;;  %v11758_v4 = vpop.xlane.xlu1 %11757 }
 0xec1   :  { %v14321_v1 = vpop.eup %14320  ;;  %14326 = vrsqrt.f32 %v11796_v42  ;;  %v11795_v48 = vadd.f32 1e-05, %v11779_v10  ;;  %v11782_v49 = vmul.f32 0.03125, %v11758_v4  ;;  %v11824_v9 = vmul.f32 %v14319_v16, %v17245_v33 }
 0xec2   :  { %v11756_v20 = vpop.xlane.xlu0 %11755  ;;  %v11823_v39 = vmul.f32 %v14321_v1, %v17248_v63 }
 0xec3   :  { %14328 = vrsqrt.f32 %v11795_v48  ;;  %v11798_v38 = vadd.f32 1e-05, %v11782_v49  ;;  %v11781_v50 = vmul.f32 0.03125, %v11756_v20  ;;  %v11847_v27 = vmul.f32 %v17371_v30, %v11824_v9 }
 0xec4   :  { %v11762_v23 = vpop.xlane.xlu1 %11761  ;;  %v11846_v51 = vmul.f32 %v17371_v30, %v11823_v39 }
 0xec5   :  { %v14323_v24 = vpop.eup %14322  ;;  %14330 = vrsqrt.f32 %v11798_v38  ;;  %v11797_v62 = vadd.f32 1e-05, %v11781_v50  ;;  %v11784_v33 = vmul.f32 0.03125, %v11762_v23  ;;  %v11870_v44 = vadd.f32 %v17378_v35, %v11847_v27 }
 0xec6   :  { %v11760_v18 = vpop.xlane.xlu0 %11759  ;;  %v11869_v63 = vadd.f32 %v17378_v35, %v11846_v51  ;;  %v11826_v59 = vmul.f32 %v14323_v24, %v17256_v37 }
 0xec7   :  { %14332 = vrsqrt.f32 %v11797_v62  ;;  %v11800_v47 = vadd.f32 1e-05, %v11784_v33  ;;  %v11783_v31 = vmul.f32 0.03125, %v11760_v18 }
 0xec8   :  { %v11766_v14 = vpop.xlane.xlu1 %11765  ;;  %13769 = vmatprep.mubr.f32.mxu1 %v11869_v63  ;;  %v11849_v8 = vmul.f32 %v17371_v30, %v11826_v59 }
 0xec9   :  { %v14325_v2 = vpop.eup %14324  ;;  %14334 = vrsqrt.f32 %v11800_v47  ;;  %v11799_v21 = vadd.f32 1e-05, %v11783_v31  ;;  %v11786_v43 = vmul.f32 0.03125, %v11766_v14  ;;  %13770 = vmatmul.mubr.f32.vlgmr.msra.gmra.mrb[152].mxu1 %v11870_v44 }
 0xeca   :  { %v11764_v40 = vpop.xlane.xlu0 %11763  ;;  %v11825_v29 = vmul.f32 %v14325_v2, %v17262_v6  ;;  %v11872_v6 = vadd.f32 %v17378_v35, %v11849_v8 }
 0xecb   :  { %v14327_v58 = vpop.eup %14326  ;;  %14336 = vrsqrt.f32 %v11799_v21  ;;  %v11802_v37 = vadd.f32 1e-05, %v11786_v43  ;;  %v11785_v42 = vmul.f32 0.03125, %v11764_v40 }
 0xecc   :  { %v11770_v10 = vpop.xlane.xlu1 %11769  ;;  %v11848_v16 = vmul.f32 %v17371_v30, %v11825_v29  ;;  %v11828_v4 = vmul.f32 %v14327_v58, %v17266_v52 }
 0xecd   :  { %v14329_v1 = vpop.eup %14328  ;;  %14338 = vrsqrt.f32 %v11802_v37  ;;  %v11801_v48 = vadd.f32 1e-05, %v11785_v42  ;;  %v11788_v49 = vmul.f32 0.03125, %v11770_v10 }
 0xece   :  { %v11768_v9 = vpop.xlane.xlu0 %11767  ;;  %v11871_v20 = vadd.f32 %v17378_v35, %v11848_v16  ;;  %v11827_v39 = vmul.f32 %v14329_v1, %v17272_v17  ;;  %v11851_v23 = vmul.f32 %v17371_v30, %v11828_v4 }
 0xecf   :  { %v14331_v38 = vpop.eup %14330  ;;  %14340 = vrsqrt.f32 %v11801_v48  ;;  %v11804_v50 = vadd.f32 1e-05, %v11788_v49  ;;  %v11787_v27 = vmul.f32 0.03125, %v11768_v9 }
 0xed0   :  { %13772 = vmatprep.mubr.f32.mxu1 %v11871_v20  ;;  %v11850_v52 = vmul.f32 %v17371_v30, %v11827_v39  ;;  %v11830_v51 = vmul.f32 %v14331_v38, %v17278_v56  ;;  %v11874_v63 = vadd.f32 %v17378_v35, %v11851_v23 }
 0xed1   :  { %v14333_v24 = vpop.eup %14332  ;;  %14342 = vrsqrt.f32 %v11804_v50  ;;  %v11803_v62 = vadd.f32 1e-05, %v11787_v27  ;;  %13773 = vmatmul.mubr.f32.gmra.mrb[154].mxu1 %v11872_v6 }
 0xed2   :  { %v11873_v33 = vadd.f32 %v17378_v35, %v11850_v52  ;;  %v11829_v18 = vmul.f32 %v14333_v24, %v17284_v5  ;;  %v11853_v59 = vmul.f32 %v17371_v30, %v11830_v51 }
 0xed3   :  { %v14335_v17 = vpop.eup %14334  ;;  %14344 = vrsqrt.f32 %v11803_v62 }
 0xed4   :  { %13775 = vmatprep.mubr.f32.mxu1 %v11873_v33  ;;  %v11852_v47 = vmul.f32 %v17371_v30, %v11829_v18  ;;  %v11832_v31 = vmul.f32 %v14335_v17, %v17290_v61  ;;  %v11876_v5 = vadd.f32 %v17378_v35, %v11853_v59  ;;  %v12197_v18 = vld [vmem:[%s17670_s11] sm:$0xff]  ;;  %v12202_v59 = vld [vmem:[%s17670_s11 + $0x28] sm:$0xff] }
 0xed5   :  { %v14337_v56 = vpop.eup %14336  ;;  %13776 = vmatmul.mubr.f32.gmra.mrb[156].mxu1 %v11874_v63  ;;  %v12201_v63 = vld [vmem:[%s17670_s11 + $0x20] sm:$0xff] }
 0xed6   :  { %v11875_v44 = vadd.f32 %v17378_v35, %v11852_v47  ;;  %v11831_v14 = vmul.f32 %v14337_v56, %v17296_v22  ;;  %v11855_v21 = vmul.f32 %v17371_v30, %v11832_v31  ;;  %v13985_v47 = vpack.c.bf16 %v12202_v59, %v12201_v63  ;;  %v12203_v31 = vld [vmem:[%s17670_s11 + $0x30] sm:$0xff]  ;;  %v12204_v56 = vld [vmem:[%s17670_s11 + $0x38] sm:$0xff] }
 0xed7   :  { %v14339_v2 = vpop.eup %14338 }
 0xed8   :  { %13778 = vmatprep.mubr.f32.mxu1 %v11875_v44  ;;  %v11854_v43 = vmul.f32 %v17371_v30, %v11831_v14  ;;  %v11834_v40 = vmul.f32 %v14339_v2, %v17308_v36  ;;  %v11878_v37 = vadd.f32 %v17378_v35, %v11855_v21  ;;  %v13989_v44 = vpack.c.bf16 %v12204_v56, %v12203_v31  ;;  %v12205_v14 = vld [vmem:[%s17670_s11 + $0x40] sm:$0xff]  ;;  %v12206_v2 = vld [vmem:[%s17670_s11 + $0x48] sm:$0xff]  ;;  %v12207_v21 = vld [vmem:[%s17670_s11 + $0x50] sm:$0xff] }
 0xed9   :  { %v14341_v29 = vpop.eup %14340  ;;  %13779 = vmatmul.mubr.f32.gmra.mrb[158].mxu1 %v11876_v5  ;;  %v13993_v5 = vpack.c.bf16 %v12206_v2, %v12205_v14 }
 0xeda   :  { %v11877_v61 = vadd.f32 %v17378_v35, %v11854_v43  ;;  %v11833_v8 = vmul.f32 %v14341_v29, %v17314_v34  ;;  %v11857_v22 = vmul.f32 %v17371_v30, %v11834_v40  ;;  %v12208_v43 = vld [vmem:[%s17670_s11 + $0x58] sm:$0xff]  ;;  %v12209_v29 = vld [vmem:[%s17670_s11 + $0x60] sm:$0xff] }
 0xedb   :  { %v14343_v58 = vpop.eup %14342  ;;  %v13997_v40 = vpack.c.bf16 %v12208_v43, %v12207_v21 }
 0xedc   :  { %13781 = vmatprep.mubr.f32.mxu1 %v11877_v61  ;;  %v11856_v42 = vmul.f32 %v17371_v30, %v11833_v8  ;;  %v11836_v10 = vmul.f32 %v14343_v58, %v17326_v13  ;;  %v11880_v1 = vadd.f32 %v17378_v35, %v11857_v22  ;;  %v12210_v61 = vld [vmem:[%s17670_s11 + $0x68] sm:$0xff]  ;;  %v12211_v58 = vld [vmem:[%s17670_s11 + $0x70] sm:$0xff] }
 0xedd   :  { %v14345_v16 = vpop.eup %14344  ;;  %13782 = vmatmul.mubr.f32.gmra.mrb[160].mxu1 %v11878_v37  ;;  %v14001_v8 = vpack.c.bf16 %v12210_v61, %v12209_v29  ;;  %v12212_v37 = vld [vmem:[%s17670_s11 + $0x78] sm:$0xff] }
 0xede   :  { %v11879_v36 = vadd.f32 %v17378_v35, %v11856_v42  ;;  %v11835_v4 = vmul.f32 %v14345_v16, %v17332_v0  ;;  %v11859_v34 = vmul.f32 %v17371_v30, %v11836_v10  ;;  %v14005_v22 = vpack.c.bf16 %v12212_v37, %v12211_v58  ;;  %v17477_v42 = vld [vmem:[%s17671_s10] ss:$0 sm:$0xff] }
 0xee0   :  { %13784 = vmatprep.mubr.f32.mxu1 %v11879_v36  ;;  %v11858_v48 = vmul.f32 %v17371_v30, %v11835_v4  ;;  %v11882_v9 = vadd.f32 %v17378_v35, %v11859_v34 }
 0xee1   :  { %13785 = vmatmul.mubr.f32.gmra.mrb[162].mxu1 %v11880_v1 }
 0xee2   :  { %v11881_v49 = vadd.f32 %v17378_v35, %v11858_v48 }
 0xee4   :  { %13787 = vmatprep.mubr.f32.mxu1 %v11881_v49 }
 0xee5   :  { %13788 = vmatmul.mubr.f32.gmra.mrb[164].mxu1 %v11882_v9 }
 0xefe   :  { %v11774_v13 = vpop.xlane.xlu1 %11773 }
 0xeff   :  { %v11790_v20 = vmul.f32 0.03125, %v11774_v13  ;;  %v11772_v6 = vpop.xlane.xlu0 %11771 }
 0xf00   :  { %v11789_v39 = vmul.f32 0.03125, %v11772_v6 }
 0xf01   :  { %v11806_v38 = vadd.f32 1e-05, %v11790_v20 }
 0xf02   :  { %v11805_v0 = vadd.f32 1e-05, %v11789_v39 }
 0xf03   :  { %14346 = vrsqrt.f32 %v11806_v38 }
 0xf04   :  { %14348 = vrsqrt.f32 %v11805_v0 }
 0xf0d   :  { %v14347_v50 = vpop.eup %14346 }
 0xf0e   :  { %v14349_v27 = vpop.eup %14348  ;;  %v11838_v23 = vmul.f32 %v14347_v50, %v17359_v19  ;;  %v12198_v19 = vld [vmem:[%s17670_s11 + $0x8] sm:$0xff] }
 0xf0f   :  { %v11837_v52 = vmul.f32 %v14349_v27, %v17362_v54  ;;  %v13977_v17 = vpack.c.bf16 %v12198_v19, %v12197_v18  ;;  %v12199_v54 = vld [vmem:[%s17670_s11 + $0x10] sm:$0xff] }
 0xf10   :  { %v11861_v51 = vmul.f32 %v17371_v30, %v11838_v23 }
 0xf11   :  { %v11860_v24 = vmul.f32 %v17371_v30, %v11837_v52  ;;  %13978 = vmatprep.subr.bf16.mxu0 %v13977_v17  ;;  %14009 = vmatprep.subr.bf16.mxu1 %v13977_v17  ;;  %v12200_v30 = vld [vmem:[%s17670_s11 + $0x18] sm:$0xff] }
 0xf12   :  { %v11884_v33 = vadd.f32 %v17378_v35, %v11861_v51  ;;  %13980 = vmatpush3.bf16.msra.mxu0 %v13977_v17  ;;  %14017 = vmatpush3.bf16.msra.mxu1 %v13977_v17 }
 0xf13   :  { %v11883_v62 = vadd.f32 %v17378_v35, %v11860_v24  ;;  %v13981_v35 = vpack.c.bf16 %v12200_v30, %v12199_v54 }
 0xf15   :  { %13790 = vmatprep.mubr.f32.mxu1 %v11883_v62  ;;  %13982 = vmatprep.subr.bf16.mxu0 %v13981_v35 }
 0xf16   :  { %13791 = vmatmul.mubr.f32.gmra.mrb[166].mxu1 %v11884_v33  ;;  %14010 = vmatprep.subr.bf16.mxu1 %v13981_v35 }
 0xf17   :  { %13984 = vmatpush3.bf16.msra.mxu0 %v13981_v35  ;;  %14018 = vmatpush3.bf16.msra.mxu1 %v13981_v35 }
 0xf18   :  { %13986 = vmatprep.subr.bf16.mxu0 %v13985_v47  ;;  %14011 = vmatprep.subr.bf16.mxu1 %v13985_v47 }
 0xf1b   :  { %13988 = vmatpush3.bf16.msra.mxu0 %v13985_v47  ;;  %14019 = vmatpush3.bf16.msra.mxu1 %v13985_v47 }
 0xf1c   :  { %13990 = vmatprep.subr.bf16.mxu0 %v13989_v44  ;;  %14012 = vmatprep.subr.bf16.mxu1 %v13989_v44 }
 0xf1f   :  { %13992 = vmatpush3.bf16.msra.mxu0 %v13989_v44  ;;  %14020 = vmatpush3.bf16.msra.mxu1 %v13989_v44 }
 0xf20   :  { %13994 = vmatprep.subr.bf16.mxu0 %v13993_v5  ;;  %14013 = vmatprep.subr.bf16.mxu1 %v13993_v5 }
 0xf23   :  { %13996 = vmatpush3.bf16.msra.mxu0 %v13993_v5  ;;  %14021 = vmatpush3.bf16.msra.mxu1 %v13993_v5 }
 0xf24   :  { %13998 = vmatprep.subr.bf16.mxu0 %v13997_v40  ;;  %14014 = vmatprep.subr.bf16.mxu1 %v13997_v40 }
 0xf27   :  { %14000 = vmatpush3.bf16.msra.mxu0 %v13997_v40  ;;  %14022 = vmatpush3.bf16.msra.mxu1 %v13997_v40 }
 0xf28   :  { %14002 = vmatprep.subr.bf16.mxu0 %v14001_v8  ;;  %14015 = vmatprep.subr.bf16.mxu1 %v14001_v8 }
 0xf2b   :  { %14004 = vmatpush3.bf16.msra.mxu0 %v14001_v8  ;;  %14023 = vmatpush3.bf16.msra.mxu1 %v14001_v8 }
 0xf2c   :  { %14006 = vmatprep.subr.bf16.mxu0 %v14005_v22  ;;  %14016 = vmatprep.subr.bf16.mxu1 %v14005_v22 }
 0xf2f   :  { %14008 = vmatpush3.bf16.msra.mxu0 %v14005_v22  ;;  %14024 = vmatpush3.bf16.msra.mxu1 %v14005_v22 }
 0xf9c   :  { %v13771_v10 = vpop.f32.mrb[152].mxu1 }
 0xf9d   :  { %v17480_v16 = vadd.f32 %v13771_v10, %v17477_v42  ;;  %v11974_v36 = vpop.f32.mrb[153].mxu1 }
 0xf9e   :  { %v17483_v4 = vadd.f32 %v17477_v42, %v11974_v36 }
 0xf9f   :  { %v12054_v1 = vmul.f32 %v17480_v16, %v17480_v16 }
 0xfa0   :  { %v12053_v34 = vmul.f32 %v17483_v4, %v17483_v4 }
 0xfa1   :  { %v12070_v48 = vmul.f32 %v12054_v1, %v17480_v16 }
 0xfa2   :  { %v12069_v49 = vmul.f32 %v12053_v34, %v17483_v4 }
 0xfa3   :  { %v12086_v9 = vmul.f32 0.044715, %v12070_v48 }
 0xfa4   :  { %v12085_v13 = vmul.f32 0.044715, %v12069_v49  ;;  %v13774_v20 = vpop.f32.mrb[154].mxu1 }
 0xfa5   :  { %v12102_v6 = vadd.f32 %v12086_v9, %v17480_v16  ;;  %v17493_v39 = vadd.f32 %v13774_v20, %v17477_v42  ;;  %v11984_v38 = vpop.f32.mrb[155].mxu1 }
 0xfa6   :  { %v12101_v0 = vadd.f32 %v12085_v13, %v17483_v4  ;;  %v17497_v50 = vadd.f32 %v17477_v42, %v11984_v38 }
 0xfa7   :  { %v12118_v27 = vmul.f32 0.7978846, %v12102_v6  ;;  %v12056_v23 = vmul.f32 %v17493_v39, %v17493_v39 }
 0xfa8   :  { %v12117_v52 = vmul.f32 0.7978846, %v12101_v0  ;;  %v12055_v51 = vmul.f32 %v17497_v50, %v17497_v50  ;;  %v13777_v24 = vpop.f32.mrb[156].mxu1 }
 0xfa9   :  { %14350 = vtanh.f32 %v12118_v27  ;;  %v12072_v62 = vmul.f32 %v12056_v23, %v17493_v39  ;;  %v17505_v33 = vadd.f32 %v13777_v24, %v17477_v42  ;;  %v11994_v18 = vpop.f32.mrb[157].mxu1 }
 0xfaa   :  { %v12071_v19 = vmul.f32 %v12055_v51, %v17497_v50  ;;  %v17509_v17 = vadd.f32 %v17477_v42, %v11994_v18  ;;  %14352 = vtanh.f32 %v12117_v52 }
 0xfab   :  { %v12088_v54 = vmul.f32 0.044715, %v12072_v62  ;;  %v12058_v30 = vmul.f32 %v17505_v33, %v17505_v33 }
 0xfac   :  { %v12087_v35 = vmul.f32 0.044715, %v12071_v19  ;;  %v12057_v63 = vmul.f32 %v17509_v17, %v17509_v17  ;;  %v13780_v59 = vpop.f32.mrb[158].mxu1 }
 0xfad   :  { %v12104_v47 = vadd.f32 %v12088_v54, %v17493_v39  ;;  %v12074_v31 = vmul.f32 %v12058_v30, %v17505_v33  ;;  %v17518_v56 = vadd.f32 %v13780_v59, %v17477_v42  ;;  %v12004_v44 = vpop.f32.mrb[159].mxu1 }
 0xfae   :  { %v12103_v14 = vadd.f32 %v12087_v35, %v17497_v50  ;;  %v12073_v2 = vmul.f32 %v12057_v63, %v17509_v17  ;;  %v17523_v5 = vadd.f32 %v17477_v42, %v12004_v44 }
 0xfaf   :  { %v12120_v21 = vmul.f32 0.7978846, %v12104_v47  ;;  %v12090_v43 = vmul.f32 0.044715, %v12074_v31  ;;  %v12060_v40 = vmul.f32 %v17518_v56, %v17518_v56 }
 0xfb0   :  { %v12119_v29 = vmul.f32 0.7978846, %v12103_v14  ;;  %v12089_v61 = vmul.f32 0.044715, %v12073_v2  ;;  %v12059_v8 = vmul.f32 %v17523_v5, %v17523_v5  ;;  %v13783_v58 = vpop.f32.mrb[160].mxu1 }
 0xfb1   :  { %v12106_v37 = vadd.f32 %v12090_v43, %v17505_v33  ;;  %v12076_v22 = vmul.f32 %v12060_v40, %v17518_v56  ;;  %v17532_v10 = vadd.f32 %v13783_v58, %v17477_v42  ;;  %v12014_v36 = vpop.f32.mrb[161].mxu1  ;;  %14354 = vtanh.f32 %v12120_v21 }
 0xfb2   :  { %v12105_v1 = vadd.f32 %v12089_v61, %v17509_v17  ;;  %v12075_v34 = vmul.f32 %v12059_v8, %v17523_v5  ;;  %v17537_v48 = vadd.f32 %v17477_v42, %v12014_v36  ;;  %14356 = vtanh.f32 %v12119_v29 }
 0xfb3   :  { %v14351_v49 = vpop.eup %14350  ;;  %v12122_v9 = vmul.f32 0.7978846, %v12106_v37  ;;  %v12092_v13 = vmul.f32 0.044715, %v12076_v22  ;;  %v12062_v20 = vmul.f32 %v17532_v10, %v17532_v10 }
 0xfb4   :  { %v14353_v6 = vpop.eup %14352  ;;  %v12150_v38 = vadd.f32 1.0, %v14351_v49  ;;  %v12121_v0 = vmul.f32 0.7978846, %v12105_v1  ;;  %v12091_v27 = vmul.f32 0.044715, %v12075_v34  ;;  %v12061_v23 = vmul.f32 %v17537_v48, %v17537_v48  ;;  %v13786_v52 = vpop.f32.mrb[162].mxu1 }
 0xfb5   :  { %v12108_v51 = vadd.f32 %v12092_v13, %v17518_v56  ;;  %v12078_v24 = vmul.f32 %v12062_v20, %v17532_v10  ;;  %v17546_v62 = vadd.f32 %v13786_v52, %v17477_v42  ;;  %v12024_v18 = vpop.f32.mrb[163].mxu1  ;;  %v12149_v19 = vadd.f32 1.0, %v14353_v6 }
 0xfb6   :  { %v12166_v54 = vmul.f32 0.5, %v12150_v38  ;;  %v12107_v30 = vadd.f32 %v12091_v27, %v17523_v5  ;;  %v12077_v35 = vmul.f32 %v12061_v23, %v17537_v48  ;;  %v17551_v63 = vadd.f32 %v17477_v42, %v12024_v18 }
 0xfb7   :  { %v12124_v59 = vmul.f32 0.7978846, %v12108_v51  ;;  %v12094_v47 = vmul.f32 0.044715, %v12078_v24  ;;  %v12064_v31 = vmul.f32 %v17546_v62, %v17546_v62  ;;  %v12165_v44 = vmul.f32 0.5, %v12149_v19 }
 0xfb8   :  { %v12182_v14 = vmul.f32 %v12166_v54, %v17480_v16  ;;  %v12123_v2 = vmul.f32 0.7978846, %v12107_v30  ;;  %v12093_v21 = vmul.f32 0.044715, %v12077_v35  ;;  %v12063_v43 = vmul.f32 %v17551_v63, %v17551_v63  ;;  %v13789_v40 = vpop.f32.mrb[164].mxu1 }
 0xfb9   :  { %v12110_v29 = vadd.f32 %v12094_v47, %v17532_v10  ;;  %v12080_v61 = vmul.f32 %v12064_v31, %v17546_v62  ;;  %v17561_v8 = vadd.f32 %v13789_v40, %v17477_v42  ;;  %v12034_v58 = vpop.f32.mrb[165].mxu1  ;;  %v12181_v37 = vmul.f32 %v12165_v44, %v17483_v4 }
 0xfba   :  { %v12109_v22 = vadd.f32 %v12093_v21, %v17537_v48  ;;  %v12079_v16 = vmul.f32 %v12063_v43, %v17551_v63  ;;  %v17567_v36 = vadd.f32 %v17477_v42, %v12034_v58  ;;  %14358 = vtanh.f32 %v12121_v0 }
 0xfbb   :  { %v14355_v1 = vpop.eup %14354  ;;  %v12126_v34 = vmul.f32 0.7978846, %v12110_v29  ;;  %v12096_v49 = vmul.f32 0.044715, %v12080_v61  ;;  %v12066_v13 = vmul.f32 %v17561_v8, %v17561_v8  ;;  %13825 = vmatprep.mubr.f32.mxu0 %v12181_v37  ;;  %14360 = vtanh.f32 %v12122_v9 }
 0xfbc   :  { %v14357_v20 = vpop.eup %14356  ;;  %v12125_v6 = vmul.f32 0.7978846, %v12109_v22  ;;  %v12095_v38 = vmul.f32 0.044715, %v12079_v16  ;;  %v12065_v4 = vmul.f32 %v17567_v36, %v17567_v36  ;;  %13826 = vmatmul.mubr.f32.vlgmr.msra.gmra.mrb[168].mxu0 %v12182_v14  ;;  %v12152_v27 = vadd.f32 1.0, %v14355_v1 }
 0xfbd   :  { %14362 = vtanh.f32 %v12126_v34  ;;  %v12112_v23 = vadd.f32 %v12096_v49, %v17546_v62  ;;  %v12082_v0 = vmul.f32 %v12066_v13, %v17561_v8  ;;  %v12151_v52 = vadd.f32 1.0, %v14357_v20 }
 0xfbe   :  { %v12111_v51 = vadd.f32 %v12095_v38, %v17551_v63  ;;  %v12081_v24 = vmul.f32 %v12065_v4, %v17567_v36  ;;  %v12168_v18 = vmul.f32 0.5, %v12152_v27  ;;  %14364 = vtanh.f32 %v12123_v2 }
 0xfbf   :  { %v12128_v9 = vmul.f32 0.7978846, %v12112_v23  ;;  %v12098_v19 = vmul.f32 0.044715, %v12082_v0  ;;  %v12167_v54 = vmul.f32 0.5, %v12151_v52  ;;  %14366 = vtanh.f32 %v12124_v59 }
 0xfc0   :  { %v12127_v30 = vmul.f32 0.7978846, %v12111_v51  ;;  %v12097_v35 = vmul.f32 0.044715, %v12081_v24  ;;  %14368 = vtanh.f32 %v12125_v6  ;;  %v12184_v14 = vmul.f32 %v12168_v18, %v17493_v39 }
 0xfc1   :  { %v12114_v47 = vadd.f32 %v12098_v19, %v17561_v8  ;;  %v12183_v31 = vmul.f32 %v12167_v54, %v17497_v50  ;;  %14370 = vtanh.f32 %v12128_v9 }
 0xfc2   :  { %v12113_v44 = vadd.f32 %v12097_v35, %v17567_v36  ;;  %14372 = vtanh.f32 %v12127_v30 }
 0xfc3   :  { %v12130_v21 = vmul.f32 0.7978846, %v12114_v47  ;;  %13828 = vmatprep.mubr.f32.mxu0 %v12183_v31 }
 0xfc4   :  { %v14359_v2 = vpop.eup %14358  ;;  %v12129_v43 = vmul.f32 0.7978846, %v12113_v44  ;;  %13829 = vmatmul.mubr.f32.gmra.mrb[170].mxu0 %v12184_v14 }
 0xfc5   :  { %v14361_v40 = vpop.eup %14360  ;;  %v12153_v59 = vadd.f32 1.0, %v14359_v2  ;;  %14374 = vtanh.f32 %v12130_v21 }
 0xfc6   :  { %v12154_v29 = vadd.f32 1.0, %v14361_v40  ;;  %14376 = vtanh.f32 %v12129_v43 }
 0xfc7   :  { %v14363_v61 = vpop.eup %14362  ;;  %v12169_v58 = vmul.f32 0.5, %v12153_v59 }
 0xfc8   :  { %v14365_v37 = vpop.eup %14364  ;;  %v12158_v50 = vadd.f32 1.0, %v14363_v61  ;;  %v12170_v22 = vmul.f32 0.5, %v12154_v29 }
 0xfc9   :  { %v14367_v16 = vpop.eup %14366  ;;  %v12185_v1 = vmul.f32 %v12169_v58, %v17509_v17  ;;  %v12155_v39 = vadd.f32 1.0, %v14365_v37 }
 0xfca   :  { %v14369_v34 = vpop.eup %14368  ;;  %v12186_v49 = vmul.f32 %v12170_v22, %v17505_v33  ;;  %v12156_v13 = vadd.f32 1.0, %v14367_v16  ;;  %v12174_v27 = vmul.f32 0.5, %v12158_v50 }
 0xfcb   :  { %v14371_v20 = vpop.eup %14370  ;;  %13831 = vmatprep.mubr.f32.mxu0 %v12185_v1  ;;  %v12171_v6 = vmul.f32 0.5, %v12155_v39  ;;  %v12157_v38 = vadd.f32 1.0, %v14369_v34 }
 0xfcc   :  { %v14373_v4 = vpop.eup %14372  ;;  %13832 = vmatmul.mubr.f32.gmra.mrb[172].mxu0 %v12186_v49  ;;  %v12172_v23 = vmul.f32 0.5, %v12156_v13  ;;  %v12160_v0 = vadd.f32 1.0, %v14371_v20  ;;  %v12190_v54 = vmul.f32 %v12174_v27, %v17532_v10  ;;  %v12600_v13 = vld [vmem:[%s17672_s12] ss:$0 sm:$0xff] }
 0xfcd   :  { %v12187_v52 = vmul.f32 %v12171_v6, %v17523_v5  ;;  %v12173_v51 = vmul.f32 0.5, %v12157_v38  ;;  %v12159_v24 = vadd.f32 1.0, %v14373_v4 }
 0xfce   :  { %v12188_v17 = vmul.f32 %v12172_v23, %v17518_v56  ;;  %v12176_v30 = vmul.f32 0.5, %v12160_v0 }
 0xfcf   :  { %v14375_v18 = vpop.eup %14374  ;;  %13834 = vmatprep.mubr.f32.mxu0 %v12187_v52  ;;  %v12189_v33 = vmul.f32 %v12173_v51, %v17537_v48  ;;  %v12175_v9 = vmul.f32 0.5, %v12159_v24 }
 0xfd0   :  { %v14377_v19 = vpop.eup %14376  ;;  %13835 = vmatmul.mubr.f32.gmra.mrb[174].mxu0 %v12188_v17  ;;  %v12162_v35 = vadd.f32 1.0, %v14375_v18  ;;  %v12192_v56 = vmul.f32 %v12176_v30, %v17546_v62 }
 0xfd1   :  { %13837 = vmatprep.mubr.f32.mxu1 %v12189_v33  ;;  %v12191_v47 = vmul.f32 %v12175_v9, %v17551_v63  ;;  %v12161_v31 = vadd.f32 1.0, %v14377_v19 }
 0xfd2   :  { %13838 = vmatmul.mubr.f32.vlgmr.msra.gmra.mrb[168].mxu1 %v12190_v54  ;;  %v12178_v44 = vmul.f32 0.5, %v12162_v35 }
 0xfd3   :  { %13840 = vmatprep.mubr.f32.mxu1 %v12191_v47  ;;  %v12177_v5 = vmul.f32 0.5, %v12161_v31 }
 0xfd4   :  { %v12194_v48 = vmul.f32 %v12178_v44, %v17561_v8 }
 0xfd5   :  { %v12193_v14 = vmul.f32 %v12177_v5, %v17567_v36 }
 0xfd6   :  { %13841 = vmatmul.mubr.f32.gmra.mrb[170].mxu1 %v12192_v56 }
 0xfd7   :  { %13843 = vmatprep.mubr.f32.mxu1 %v12193_v14 }
 0xfda   :  { %13844 = vmatmul.mubr.f32.gmra.mrb[172].mxu1 %v12194_v48 }
 0xfe9   :  { %v13792_v10 = vpop.f32.mrb[166].mxu1 }
 0xfea   :  { %v12050_v21 = vadd.f32 %v13792_v10, %v17477_v42  ;;  %v12044_v2 = vpop.f32.mrb[167].mxu1 }
 0xfeb   :  { %v12045_v63 = vadd.f32 %v17477_v42, %v12044_v2 }
 0xfec   :  { %v12068_v43 = vmul.f32 %v12050_v21, %v12050_v21 }
 0xfed   :  { %v12067_v40 = vmul.f32 %v12045_v63, %v12045_v63 }
 0xfee   :  { %v12084_v59 = vmul.f32 %v12068_v43, %v12050_v21 }
 0xfef   :  { %v12083_v29 = vmul.f32 %v12067_v40, %v12045_v63 }
 0xff0   :  { %v12100_v61 = vmul.f32 0.044715, %v12084_v59 }
 0xff1   :  { %v12099_v62 = vmul.f32 0.044715, %v12083_v29 }
 0xff2   :  { %v12116_v58 = vadd.f32 %v12100_v61, %v12050_v21 }
 0xff3   :  { %v12115_v37 = vadd.f32 %v12099_v62, %v12045_v63 }
 0xff4   :  { %v12132_v36 = vmul.f32 0.7978846, %v12116_v58 }
 0xff5   :  { %v12131_v50 = vmul.f32 0.7978846, %v12115_v37 }
 0xff6   :  { %14378 = vtanh.f32 %v12132_v36 }
 0xff7   :  { %14380 = vtanh.f32 %v12131_v50 }
0x1000   :  { %v14379_v8 = vpop.eup %14378 }
0x1001   :  { %v14381_v22 = vpop.eup %14380  ;;  %v12164_v16 = vadd.f32 1.0, %v14379_v8 }
0x1002   :  { %v12163_v1 = vadd.f32 1.0, %v14381_v22 }
0x1003   :  { %v12180_v39 = vmul.f32 0.5, %v12164_v16 }
0x1004   :  { %v12179_v34 = vmul.f32 0.5, %v12163_v1 }
0x1005   :  { %v12196_v42 = vmul.f32 %v12180_v39, %v12050_v21 }
0x1006   :  { %v12195_v49 = vmul.f32 %v12179_v34, %v12045_v63 }
0x1008   :  { %13846 = vmatprep.mubr.f32.mxu1 %v12195_v49 }
0x1009   :  { %13847 = vmatmul.mubr.f32.gmra.mrb[174].mxu1 %v12196_v42 }
0x108f   :  { %v13827_v20 = vpop.f32.mrb[168].mxu0 }
0x1090   :  { %v12292_v6 = vadd.f32 %v13827_v20, %v12600_v13  ;;  %v12286_v38 = vpop.f32.mrb[169].mxu0 }
0x1091   :  { %v12287_v4 = vadd.f32 %v12600_v13, %v12286_v38 }
0x1092   :  { %v12366_v27 = vadd.f32 %v12292_v6, %v17119_v41 }
0x1093   :  { %v12365_v23 = vadd.f32 %v12287_v4, %v17122_v7 }
0x1094   :  { %12382 = vst [vmem:[%s17673_s13 + $0x8] sm:$0xff] %v12366_v27 }
0x1095   :  { %12381 = vst [vmem:[%s17673_s13] sm:$0xff] %v12365_v23 }
0x1097   :  { %v13830_v0 = vpop.f32.mrb[170].mxu0 }
0x1098   :  { %v12302_v52 = vadd.f32 %v13830_v0, %v12600_v13  ;;  %v12296_v51 = vpop.f32.mrb[171].mxu0 }
0x1099   :  { %v12297_v24 = vadd.f32 %v12600_v13, %v12296_v51 }
0x109a   :  { %v12368_v17 = vadd.f32 %v12302_v52, %v17130_v46 }
0x109b   :  { %v12367_v18 = vadd.f32 %v12297_v24, %v17137_v55 }
0x109c   :  { %12384 = vst [vmem:[%s17673_s13 + $0x18] sm:$0xff] %v12368_v17 }
0x109d   :  { %12383 = vst [vmem:[%s17673_s13 + $0x10] sm:$0xff] %v12367_v18 }
0x109f   :  { %v13833_v41 = vpop.f32.mrb[172].mxu0 }
0x10a0   :  { %v12312_v7 = vadd.f32 %v13833_v41, %v12600_v13  ;;  %v12306_v33 = vpop.f32.mrb[173].mxu0 }
0x10a1   :  { %v12307_v9 = vadd.f32 %v12600_v13, %v12306_v33 }
0x10a2   :  { %v12370_v19 = vadd.f32 %v12312_v7, %v17146_v3 }
0x10a3   :  { %v12369_v54 = vadd.f32 %v12307_v9, %v17150_v25  ;;  %v13836_v30 = vpop.f32.mrb[174].mxu0 }
0x10a4   :  { %12386 = vst [vmem:[%s17673_s13 + $0x28] sm:$0xff] %v12370_v19  ;;  %v12322_v46 = vadd.f32 %v13836_v30, %v12600_v13  ;;  %v12316_v55 = vpop.f32.mrb[175].mxu0 }
0x10a5   :  { %12385 = vst [vmem:[%s17673_s13 + $0x20] sm:$0xff] %v12369_v54  ;;  %v12317_v35 = vadd.f32 %v12600_v13, %v12316_v55  ;;  %v13839_v47 = vpop.f32.mrb[168].mxu1 }
0x10a6   :  { %v12372_v31 = vadd.f32 %v12322_v46, %v17160_v15  ;;  %v12332_v5 = vadd.f32 %v13839_v47, %v12600_v13  ;;  %v12326_v56 = vpop.f32.mrb[169].mxu1 }
0x10a7   :  { %v12371_v3 = vadd.f32 %v12317_v35, %v17164_v32  ;;  %v12327_v25 = vadd.f32 %v12600_v13, %v12326_v56 }
0x10a8   :  { %12388 = vst [vmem:[%s17673_s13 + $0x38] sm:$0xff] %v12372_v31  ;;  %v12374_v44 = vadd.f32 %v12332_v5, %v17174_v57 }
0x10a9   :  { %12387 = vst [vmem:[%s17673_s13 + $0x30] sm:$0xff] %v12371_v3  ;;  %v12373_v14 = vadd.f32 %v12327_v25, %v17178_v11  ;;  %v13842_v48 = vpop.f32.mrb[170].mxu1 }
0x10aa   :  { %12390 = vst [vmem:[%s17673_s13 + $0x48] sm:$0xff] %v12374_v44  ;;  %v12342_v15 = vadd.f32 %v13842_v48, %v12600_v13  ;;  %v12336_v32 = vpop.f32.mrb[171].mxu1 }
0x10ab   :  { %12389 = vst [vmem:[%s17673_s13 + $0x40] sm:$0xff] %v12373_v14  ;;  %v12337_v10 = vadd.f32 %v12600_v13, %v12336_v32 }
0x10ac   :  { %v12376_v57 = vadd.f32 %v12342_v15, %v17188_v45 }
0x10ad   :  { %v12375_v21 = vadd.f32 %v12337_v10, %v17192_v26  ;;  %v13845_v2 = vpop.f32.mrb[172].mxu1 }
0x10ae   :  { %12392 = vst [vmem:[%s17673_s13 + $0x58] sm:$0xff] %v12376_v57  ;;  %v12352_v11 = vadd.f32 %v13845_v2, %v12600_v13  ;;  %v12346_v63 = vpop.f32.mrb[173].mxu1 }
0x10af   :  { %12391 = vst [vmem:[%s17673_s13 + $0x50] sm:$0xff] %v12375_v21  ;;  %v12347_v43 = vadd.f32 %v12600_v13, %v12346_v63 }
0x10b0   :  { %v12378_v40 = vadd.f32 %v12352_v11, %v17202_v60 }
0x10b1   :  { %v12377_v59 = vadd.f32 %v12347_v43, %v17206_v12 }
0x10b2   :  { %12394 = vst [vmem:[%s17673_s13 + $0x68] sm:$0xff] %v12378_v40 }
0x10b3   :  { %12393 = vst [vmem:[%s17673_s13 + $0x60] sm:$0xff] %v12377_v59 }
0x10dc   :  { %v13848_v45 = vpop.f32.mrb[174].mxu1 }
0x10dd   :  { %v12362_v26 = vadd.f32 %v13848_v45, %v12600_v13  ;;  %v12356_v29 = vpop.f32.mrb[175].mxu1 }
0x10de   :  { %v12357_v61 = vadd.f32 %v12600_v13, %v12356_v29 }
0x10df   :  { %v12380_v62 = vadd.f32 %v12362_v26, %v17217_v28 }
0x10e0   :  { %v12379_v58 = vadd.f32 %v12357_v61, %v17220_v53 }
0x10e1   :  { %12396 = vst [vmem:[%s17673_s13 + $0x78] sm:$0xff] %v12380_v62 }
0x10e2   :  { %12395 = vst [vmem:[%s17673_s13 + $0x70] sm:$0xff] %v12379_v58 }

</bundles_post_ra>
